<compile_context>
chip_gen: v7x
topology: tpu7x:2x2x1
jax: 0.10.0
libtpu: 0.0.40
codegen_flags: <defaults>
</compile_context>

<pallas_src>
import math

import jax
import jax.numpy as jnp
from jax.experimental import pallas as pl

# ----------------------------- "para" config --------------------------------
SIZE = 16                      # optical field size
PAD = 8                        # para.paddings
PADDED = SIZE + 2 * PAD        # 32
NUM_LAYERS = 2
SCALE = 1.0                    # para.scale
EXT = 1.0                      # para.extension
KSIZE = 4                      # para.kernel_size
STRIDE = 4                     # para.stride
MAP = (SIZE - KSIZE) // STRIDE + 1   # para.map_size = 4
WIN = 2                        # para.win_size
DIM_IN = MAP * MAP             # para.dim_in = 16
HIDDEN = 32                    # para.hidden
DIM_OUT = 4                    # para.dim_out
RANGE = 4                      # para.range (>= dim_out)
TEMP = 1.0                     # para.T
THRESH = 0.01                  # para.thershold
SHIFT = 0.0                    # para.shift
BATCH = 2
BN_EPS = 1e-5


# -------------------- fused forward kernel (single dispatch) -----------------
def _forward_kernel(xpad_ref,
                    fs_re_ref, fs_im_ref, fst_re_ref, fst_im_ref,
                    g_re_ref, g_im_ref, gt_re_ref, gt_im_ref,
                    hpro_re_ref, hpro_im_ref, h_re_ref, h_im_ref,
                    hdet_re_ref, hdet_im_ref,
                    mod_re_ref, mod_im_ref, crop_ref,
                    a_row_ref, a_col_ref, masks_rep_ref,
                    w1_ref, b1_ref, w2_ref, b2_ref,
                    out_ref):
    f32 = jnp.float32

    def mm(a, b):
        return jnp.dot(a, b, preferred_element_type=f32)

    def cmm(ar, ai, br, bi):       # complex matmul (Ar+iAi)@(Br+iBi)
        return mm(ar, br) - mm(ai, bi), mm(ar, bi) + mm(ai, br)

    fs_re, fs_im = fs_re_ref[...], fs_im_ref[...]
    fst_re, fst_im = fst_re_ref[...], fst_im_ref[...]
    g_re, g_im = g_re_ref[...], g_im_ref[...]
    gt_re, gt_im = gt_re_ref[...], gt_im_ref[...]
    crop = crop_ref[...]
    a_row, a_col = a_row_ref[...], a_col_ref[...]
    hpro_re, hpro_im = hpro_re_ref[...], hpro_im_ref[...]
    h_re, h_im = h_re_ref[...], h_im_ref[...]
    hdet_re, hdet_im = hdet_re_ref[...], hdet_im_ref[...]
    mod_re = [mod_re_ref[l] for l in range(NUM_LAYERS)]
    mod_im = [mod_im_ref[l] for l in range(NUM_LAYERS)]

    def diff_step(wr, wi, tr, ti):
        # fft2(fftshift(W))  ==  Fs @ W @ Fs^T   (shift folded into the DFT matrix)
        ur, ui = cmm(fs_re, fs_im, wr, wi)
        yr, yi = cmm(ur, ui, fst_re, fst_im)
        # frequency-domain transfer function (elementwise complex multiply)
        zr = yr * tr - yi * ti
        zi = yr * ti + yi * tr
        # ifftshift(ifft2(Z)) ==  G @ Z @ G^T
        vr, vi = cmm(g_re, g_im, zr, zi)
        return cmm(vr, vi, gt_re, gt_im)

    # identity matrix used to pull the diagonal of the pooled 16x16 product
    r16 = jax.lax.broadcasted_iota(jnp.int32, (DIM_IN, DIM_IN), 0)
    c16 = jax.lax.broadcasted_iota(jnp.int32, (DIM_IN, DIM_IN), 1)
    eye16 = jnp.where(r16 == c16, 1.0, 0.0)

    pooled_rows = []
    for b in range(BATCH):
        wr = xpad_ref[b]                      # (32,32) real field (pre-padded)
        wi = jnp.zeros_like(wr)
        # free-space propagation to the first modulation plane
        wr, wi = diff_step(wr, wi, hpro_re, hpro_im)
        wr, wi = wr * crop, wi * crop         # crop + zero re-pad
        for l in range(NUM_LAYERS):
            wr, wi = diff_step(wr, wi, h_re, h_im)
            nr = wr * mod_re[l] - wi * mod_im[l]      # phase modulation
            ni = wr * mod_im[l] + wi * mod_re[l]
            wr, wi = nr * crop, ni * crop
        # propagation to the detector plane
        wr, wi = diff_step(wr, wi, hdet_re, hdet_im)
        inten = wr * wr + wi * wi             # (32,32); A_row/A_col read interior only
        # AvgPool2d(4,4) + row-major flatten in one shot:
        # diag(A_row @ I @ A_col)[k] = pooled[k//4, k%4]
        p16 = mm(mm(a_row, inten), a_col)     # (16,16)
        pooled_rows.append(jnp.sum(p16 * eye16, axis=0, keepdims=True))   # (1,16)

    pooled = jnp.concatenate(pooled_rows, axis=0)          # (BATCH, 16)

    # --------- classifier: all MAP*MAP windows x BATCH rows at once ----------
    masks_rep = masks_rep_ref[...]                         # (32,16), row = w*BATCH + b
    pooled_tiled = jnp.concatenate([pooled] * (MAP * MAP), axis=0)   # (32,16)
    masked = masks_rep * pooled_tiled                      # masked CCD signal

    # BatchNorm2d(1), training-mode batch statistics over the masked (B,4,4)
    # tensor (weight=1, bias=0, biased variance), one (mean, var) per window.
    colsum = jnp.sum(pooled, axis=0, keepdims=True)                  # (1,16)
    colsumsq = jnp.sum(pooled * pooled, axis=0, keepdims=True)       # (1,16)
    inv_n = 1.0 / float(BATCH * DIM_IN)
    mean = jnp.sum(masks_rep * colsum, axis=-1, keepdims=True) * inv_n     # (32,1)
    ex2 = jnp.sum(masks_rep * colsumsq, axis=-1, keepdims=True) * inv_n
    var = ex2 - mean * mean
    inv_std = jax.lax.rsqrt(var + BN_EPS)
    z = (masked - mean) * inv_std                                    # (32,16)

    # MLP: one GEMM per layer for all (window, batch) rows.
    hidden = jnp.maximum(mm(z, w1_ref[...]) + b1_ref[...], 0.0)      # (32,32)
    # TODO(synk): nn.Dropout(0.5) treated as eval-mode identity (deterministic).
    logits = (mm(hidden, w2_ref[...]) + b2_ref[...]) * (1.0 / TEMP)  # (32,4)
    logits = logits - jnp.max(logits, axis=-1, keepdims=True)
    e = jnp.exp(logits)
    out_ref[...] = e / jnp.sum(e, axis=-1, keepdims=True)            # single store


# --------------------------- constant matrices --------------------------------
def _build_constants():
    # DFT matrices with fftshift/ifftshift folded in (torch.fft "backward" norm)
    n = jnp.arange(PADDED, dtype=jnp.float32)
    ang = -2.0 * math.pi * (n[:, None] * n[None, :]) / PADDED
    f_re, f_im = jnp.cos(ang), jnp.sin(ang)
    fi_re, fi_im = f_re / PADDED, -f_im / PADDED
    s = jnp.roll(jnp.eye(PADDED, dtype=jnp.float32), PADDED // 2, axis=1)
    fs_re, fs_im = f_re @ s, f_im @ s            # F @ S    (fft2  o fftshift)
    g_re, g_im = s @ fi_re, s @ fi_im            # S @ F^-1 (ifftshift o ifft2)

    # crop-to-interior mask (crop + zero re-pad between diffraction steps)
    idx = jnp.arange(PADDED)
    inside = (idx >= PAD) & (idx < PAD + SIZE)
    crop = (inside[:, None] & inside[None, :]).astype(jnp.float32)

    # AvgPool(4,4) matrices whose product's diagonal is the row-major flattened
    # pooled vector; they only weight the interior of the padded field.
    k = jnp.arange(DIM_IN)
    c = jnp.arange(PADDED)
    lo_r = PAD + (k // MAP) * STRIDE
    lo_c = PAD + (k % MAP) * STRIDE
    a_row = jnp.where((c[None, :] >= lo_r[:, None]) &
                      (c[None, :] < lo_r[:, None] + KSIZE),
                      1.0 / KSIZE, 0.0).astype(jnp.float32)          # (16,32)
    a_col = jnp.where((c[:, None] >= lo_c[None, :]) &
                      (c[:, None] < lo_c[None, :] + KSIZE),
                      1.0 / KSIZE, 0.0).astype(jnp.float32)          # (32,16)

    # I_block window masks, one row per (window, batch) pair (truncated at the
    # border exactly like the reference slice i:i+win).
    m = jnp.arange(MAP)
    wi_, wj_ = m[:, None, None, None], m[None, :, None, None]
    fm, fn = m[None, None, :, None], m[None, None, None, :]
    masks = ((fm >= wi_) & (fm < wi_ + WIN) &
             (fn >= wj_) & (fn < wj_ + WIN)).astype(jnp.float32)
    masks = masks.reshape(MAP * MAP, MAP * MAP)
    masks_rep = jnp.repeat(masks, BATCH, axis=0)                     # (32,16)

    return (fs_re, fs_im, fs_re.T, fs_im.T, g_re, g_im, g_re.T, g_im.T,
            crop, a_row, a_col, masks_rep)


# ----------------------- voting / result-map bookkeeping ----------------------
def _vote(probs):
    classes = jnp.arange(RANGE + 1)
    a = jnp.argmax(probs, axis=-1)                      # (MAP, MAP, BATCH)
    a2 = jnp.argmin(probs, axis=-1)
    bmax = jnp.take_along_axis(probs, a[..., None], axis=-1)[..., 0]
    bmin = jnp.take_along_axis(probs, a2[..., None], axis=-1)[..., 0]
    delta0 = bmax - bmin                                # (MAP, MAP, BATCH)

    votes = jnp.sum(a[..., None] == classes, axis=-2)   # (MAP, MAP, RANGE+1)
    final0 = jnp.argmax(votes, axis=-1)                 # (MAP, MAP)

    ind = (a == final0[..., None]).astype(jnp.float32)
    delta = delta0 * ind
    nz = delta != 0
    cnt = jnp.sum(nz, axis=-1).astype(jnp.float32)
    # mean of the nonzero entries (csr_matrix drops zeros); 0/0 -> NaN, and
    # NaN < threshold is False, exactly matching the PyTorch behaviour.
    delta1 = jnp.sum(jnp.where(nz, delta, 0.0), axis=-1) / cnt
    final = jnp.where(delta1 < THRESH, 0, final0 + 1)   # (MAP, MAP) int32

    result = jnp.where(final == 0, 0.0, final.astype(jnp.float32) + SHIFT)
    ch_map = (final != 0).astype(jnp.float32)
    histo = jnp.sum(final[..., None] == classes, axis=(0, 1)).astype(jnp.float32)
    return result, ch_map, histo


# ---------------------------------- forward -----------------------------------
def forward(x, params):
    (phase, w1, b1, w2, b2,
     h_re, h_im, hpro_re, hpro_im, hdet_re, hdet_im) = params

    # NCHW input: squeeze the channel dim explicitly (torch.squeeze would also
    # drop the batch dim if batch_size == 1) and pre-pad to the optical grid.
    xpad = jnp.pad(x[:, 0, :, :], ((0, 0), (PAD, PAD), (PAD, PAD)))

    (fs_re, fs_im, fst_re, fst_im, g_re, g_im, gt_re, gt_im,
     crop, a_row, a_col, masks_rep) = _build_constants()

    # precomputed modulation phasors: exp(i*scale*pi*(sin(ext*pad(phase)) + 1))
    phase_pad = jnp.pad(phase, ((0, 0), (PAD, PAD), (PAD, PAD)))
    theta = SCALE * math.pi * (jnp.sin(EXT * phase_pad) + 1.0)
    mod_re, mod_im = jnp.cos(theta), jnp.sin(theta)

    probs_flat = pl.pallas_call(
        _forward_kernel,
        out_shape=jax.ShapeDtypeStruct((MAP * MAP * BATCH, DIM_OUT), jnp.float32),
    )(xpad, fs_re, fs_im, fst_re, fst_im, g_re, g_im, gt_re, gt_im,
      hpro_re, hpro_im, h_re, h_im, hdet_re, hdet_im,
      mod_re, mod_im, crop, a_row, a_col, masks_rep, w1, b1, w2, b2)

    probs = probs_flat.reshape(MAP, MAP, BATCH, DIM_OUT)
    return _vote(probs)


# ---------------------------------- main ---------------------------------------
if __name__ == "__main__":
    key = jax.random.PRNGKey(0)
    ks = jax.random.split(key, 9)

    # Parameters (deterministic). NOTE: the original phase init scale is
    # sqrt(0.0*pi) == 0; small nonzero values are used so the modulation path
    # is actually exercised.
    phase = 0.5 * jax.random.normal(ks[0], (NUM_LAYERS, SIZE, SIZE), jnp.float32)
    w1 = 0.1 * jax.random.normal(ks[1], (DIM_IN, HIDDEN), jnp.float32)
    b1 = 0.01 * jax.random.normal(ks[2], (1, HIDDEN), jnp.float32)
    w2 = 0.1 * jax.random.normal(ks[3], (HIDDEN, DIM_OUT), jnp.float32)
    b2 = 0.01 * jax.random.normal(ks[4], (1, DIM_OUT), jnp.float32)

    def unit_trans(k):
        ph = 2.0 * math.pi * jax.random.uniform(k, (PADDED, PADDED), jnp.float32)
        return jnp.cos(ph), jnp.sin(ph)

    h_re, h_im = unit_trans(ks[5])
    hpro_re, hpro_im = unit_trans(ks[6])
    hdet_re, hdet_im = unit_trans(ks[7])

    # Input (NCHW, C=1), batch_size = 2
    x = jax.random.normal(ks[8], (BATCH, 1, SIZE, SIZE), jnp.float32)

    params = (phase, w1, b1, w2, b2,
              h_re, h_im, hpro_re, hpro_im, hdet_re, hdet_im)

    result, ch_map, histo = jax.jit(forward)(x, params)
    jax.block_until_ready(result)
    jax.block_until_ready(ch_map)
    jax.block_until_ready(histo)

    assert result.shape == (MAP, MAP)
    assert ch_map.shape == (MAP, MAP)
    assert histo.shape == (RANGE + 1,)
    print("KERNEL_OK")
</pallas_src>

<mosaic_0001>
module attributes {stable_mosaic.version = 11 : i64} {
  func.func @_forward_kernel(%arg0: memref<2x32x32xf32, #tpu.memory_space<vmem>>, %arg1: memref<32x32xf32, #tpu.memory_space<vmem>>, %arg2: memref<32x32xf32, #tpu.memory_space<vmem>>, %arg3: memref<32x32xf32, #tpu.memory_space<vmem>>, %arg4: memref<32x32xf32, #tpu.memory_space<vmem>>, %arg5: memref<32x32xf32, #tpu.memory_space<vmem>>, %arg6: memref<32x32xf32, #tpu.memory_space<vmem>>, %arg7: memref<32x32xf32, #tpu.memory_space<vmem>>, %arg8: memref<32x32xf32, #tpu.memory_space<vmem>>, %arg9: memref<32x32xf32, #tpu.memory_space<vmem>>, %arg10: memref<32x32xf32, #tpu.memory_space<vmem>>, %arg11: memref<32x32xf32, #tpu.memory_space<vmem>>, %arg12: memref<32x32xf32, #tpu.memory_space<vmem>>, %arg13: memref<32x32xf32, #tpu.memory_space<vmem>>, %arg14: memref<32x32xf32, #tpu.memory_space<vmem>>, %arg15: memref<2x32x32xf32, #tpu.memory_space<vmem>>, %arg16: memref<2x32x32xf32, #tpu.memory_space<vmem>>, %arg17: memref<32x32xf32, #tpu.memory_space<vmem>>, %arg18: memref<16x32xf32, #tpu.memory_space<vmem>>, %arg19: memref<32x16xf32, #tpu.memory_space<vmem>>, %arg20: memref<32x16xf32, #tpu.memory_space<vmem>>, %arg21: memref<16x32xf32, #tpu.memory_space<vmem>>, %arg22: memref<1x32xf32, #tpu.memory_space<vmem>>, %arg23: memref<32x4xf32, #tpu.memory_space<vmem>>, %arg24: memref<1x4xf32, #tpu.memory_space<vmem>>, %arg25: memref<32x4xf32, #tpu.memory_space<vmem>>) attributes {dimension_semantics = [], scalar_prefetch = 0 : i64, scratch_operands = 0 : i64, tpu.core_type = #tpu.core_type<tc>} {
    %c0 = arith.constant 0 : index
    %c0_0 = arith.constant 0 : index
    %0 = vector.load %arg1[%c0, %c0_0] : memref<32x32xf32, #tpu.memory_space<vmem>>, vector<32x32xf32>
    %c0_1 = arith.constant 0 : index
    %c0_2 = arith.constant 0 : index
    %1 = vector.load %arg2[%c0_1, %c0_2] : memref<32x32xf32, #tpu.memory_space<vmem>>, vector<32x32xf32>
    %c0_3 = arith.constant 0 : index
    %c0_4 = arith.constant 0 : index
    %2 = vector.load %arg3[%c0_3, %c0_4] : memref<32x32xf32, #tpu.memory_space<vmem>>, vector<32x32xf32>
    %c0_5 = arith.constant 0 : index
    %c0_6 = arith.constant 0 : index
    %3 = vector.load %arg4[%c0_5, %c0_6] : memref<32x32xf32, #tpu.memory_space<vmem>>, vector<32x32xf32>
    %c0_7 = arith.constant 0 : index
    %c0_8 = arith.constant 0 : index
    %4 = vector.load %arg5[%c0_7, %c0_8] : memref<32x32xf32, #tpu.memory_space<vmem>>, vector<32x32xf32>
    %c0_9 = arith.constant 0 : index
    %c0_10 = arith.constant 0 : index
    %5 = vector.load %arg6[%c0_9, %c0_10] : memref<32x32xf32, #tpu.memory_space<vmem>>, vector<32x32xf32>
    %c0_11 = arith.constant 0 : index
    %c0_12 = arith.constant 0 : index
    %6 = vector.load %arg7[%c0_11, %c0_12] : memref<32x32xf32, #tpu.memory_space<vmem>>, vector<32x32xf32>
    %c0_13 = arith.constant 0 : index
    %c0_14 = arith.constant 0 : index
    %7 = vector.load %arg8[%c0_13, %c0_14] : memref<32x32xf32, #tpu.memory_space<vmem>>, vector<32x32xf32>
    %c0_15 = arith.constant 0 : index
    %c0_16 = arith.constant 0 : index
    %8 = vector.load %arg17[%c0_15, %c0_16] : memref<32x32xf32, #tpu.memory_space<vmem>>, vector<32x32xf32>
    %c0_17 = arith.constant 0 : index
    %c0_18 = arith.constant 0 : index
    %9 = vector.load %arg18[%c0_17, %c0_18] : memref<16x32xf32, #tpu.memory_space<vmem>>, vector<16x32xf32>
    %c0_19 = arith.constant 0 : index
    %c0_20 = arith.constant 0 : index
    %10 = vector.load %arg19[%c0_19, %c0_20] : memref<32x16xf32, #tpu.memory_space<vmem>>, vector<32x16xf32>
    %c0_21 = arith.constant 0 : index
    %c0_22 = arith.constant 0 : index
    %11 = vector.load %arg9[%c0_21, %c0_22] : memref<32x32xf32, #tpu.memory_space<vmem>>, vector<32x32xf32>
    %c0_23 = arith.constant 0 : index
    %c0_24 = arith.constant 0 : index
    %12 = vector.load %arg10[%c0_23, %c0_24] : memref<32x32xf32, #tpu.memory_space<vmem>>, vector<32x32xf32>
    %c0_25 = arith.constant 0 : index
    %c0_26 = arith.constant 0 : index
    %13 = vector.load %arg11[%c0_25, %c0_26] : memref<32x32xf32, #tpu.memory_space<vmem>>, vector<32x32xf32>
    %c0_27 = arith.constant 0 : index
    %c0_28 = arith.constant 0 : index
    %14 = vector.load %arg12[%c0_27, %c0_28] : memref<32x32xf32, #tpu.memory_space<vmem>>, vector<32x32xf32>
    %c0_29 = arith.constant 0 : index
    %c0_30 = arith.constant 0 : index
    %15 = vector.load %arg13[%c0_29, %c0_30] : memref<32x32xf32, #tpu.memory_space<vmem>>, vector<32x32xf32>
    %c0_31 = arith.constant 0 : index
    %c0_32 = arith.constant 0 : index
    %16 = vector.load %arg14[%c0_31, %c0_32] : memref<32x32xf32, #tpu.memory_space<vmem>>, vector<32x32xf32>
    %c0_33 = arith.constant 0 : index
    %c0_34 = arith.constant 0 : index
    %c0_35 = arith.constant 0 : index
    %17 = vector.load %arg15[%c0_33, %c0_34, %c0_35] : memref<2x32x32xf32, #tpu.memory_space<vmem>>, vector<1x32x32xf32>
    %18 = vector.shape_cast %17 : vector<1x32x32xf32> to vector<32x32xf32>
    %c1 = arith.constant 1 : index
    %c0_36 = arith.constant 0 : index
    %c0_37 = arith.constant 0 : index
    %19 = vector.load %arg15[%c1, %c0_36, %c0_37] : memref<2x32x32xf32, #tpu.memory_space<vmem>>, vector<1x32x32xf32>
    %20 = vector.shape_cast %19 : vector<1x32x32xf32> to vector<32x32xf32>
    %c0_38 = arith.constant 0 : index
    %c0_39 = arith.constant 0 : index
    %c0_40 = arith.constant 0 : index
    %21 = vector.load %arg16[%c0_38, %c0_39, %c0_40] : memref<2x32x32xf32, #tpu.memory_space<vmem>>, vector<1x32x32xf32>
    %22 = vector.shape_cast %21 : vector<1x32x32xf32> to vector<32x32xf32>
    %c1_41 = arith.constant 1 : index
    %c0_42 = arith.constant 0 : index
    %c0_43 = arith.constant 0 : index
    %23 = vector.load %arg16[%c1_41, %c0_42, %c0_43] : memref<2x32x32xf32, #tpu.memory_space<vmem>>, vector<1x32x32xf32>
    %24 = vector.shape_cast %23 : vector<1x32x32xf32> to vector<32x32xf32>
    %25 = tpu.iota {dimensions = array<i32: 0>} : vector<16x16xi32>
    %26 = tpu.iota {dimensions = array<i32: 1>} : vector<16x16xi32>
    %27 = arith.cmpi eq, %25, %26 : vector<16x16xi32>
    %cst = arith.constant 1.000000e+00 : f32
    %cst_44 = arith.constant 0.000000e+00 : f32
    %28 = vector.broadcast %cst : f32 to vector<16x16xf32>
    %29 = vector.broadcast %cst_44 : f32 to vector<16x16xf32>
    %30 = arith.select %27, %28, %29 : vector<16x16xi1>, vector<16x16xf32>
    %c0_45 = arith.constant 0 : index
    %c0_46 = arith.constant 0 : index
    %c0_47 = arith.constant 0 : index
    %31 = vector.load %arg0[%c0_45, %c0_46, %c0_47] : memref<2x32x32xf32, #tpu.memory_space<vmem>>, vector<1x32x32xf32>
    %32 = vector.shape_cast %31 : vector<1x32x32xf32> to vector<32x32xf32>
    %cst_48 = arith.constant 0.000000e+00 : f32
    %33 = vector.broadcast %cst_48 : f32 to vector<32x32xf32>
    %cst_49 = arith.constant dense<0.000000e+00> : vector<32x32xf32>
    %34 = tpu.matmul %0, %32, %cst_49 {dimension_numbers = #tpu.dot_dimension_numbers<[1], [0], [0], [1], [0, 0, 1, 1], [], []>} : vector<32x32xf32>, vector<32x32xf32>, vector<32x32xf32> -> vector<32x32xf32>
    %cst_50 = arith.constant dense<0.000000e+00> : vector<32x32xf32>
    %35 = tpu.matmul %1, %33, %cst_50 {dimension_numbers = #tpu.dot_dimension_numbers<[1], [0], [0], [1], [0, 0, 1, 1], [], []>} : vector<32x32xf32>, vector<32x32xf32>, vector<32x32xf32> -> vector<32x32xf32>
    %36 = arith.subf %34, %35 : vector<32x32xf32>
    %cst_51 = arith.constant dense<0.000000e+00> : vector<32x32xf32>
    %37 = tpu.matmul %0, %33, %cst_51 {dimension_numbers = #tpu.dot_dimension_numbers<[1], [0], [0], [1], [0, 0, 1, 1], [], []>} : vector<32x32xf32>, vector<32x32xf32>, vector<32x32xf32> -> vector<32x32xf32>
    %cst_52 = arith.constant dense<0.000000e+00> : vector<32x32xf32>
    %38 = tpu.matmul %1, %32, %cst_52 {dimension_numbers = #tpu.dot_dimension_numbers<[1], [0], [0], [1], [0, 0, 1, 1], [], []>} : vector<32x32xf32>, vector<32x32xf32>, vector<32x32xf32> -> vector<32x32xf32>
    %39 = arith.addf %37, %38 : vector<32x32xf32>
    %cst_53 = arith.constant dense<0.000000e+00> : vector<32x32xf32>
    %40 = tpu.matmul %36, %2, %cst_53 {dimension_numbers = #tpu.dot_dimension_numbers<[1], [0], [0], [1], [0, 0, 1, 1], [], []>} : vector<32x32xf32>, vector<32x32xf32>, vector<32x32xf32> -> vector<32x32xf32>
    %cst_54 = arith.constant dense<0.000000e+00> : vector<32x32xf32>
    %41 = tpu.matmul %39, %3, %cst_54 {dimension_numbers = #tpu.dot_dimension_numbers<[1], [0], [0], [1], [0, 0, 1, 1], [], []>} : vector<32x32xf32>, vector<32x32xf32>, vector<32x32xf32> -> vector<32x32xf32>
    %42 = arith.subf %40, %41 : vector<32x32xf32>
    %cst_55 = arith.constant dense<0.000000e+00> : vector<32x32xf32>
    %43 = tpu.matmul %36, %3, %cst_55 {dimension_numbers = #tpu.dot_dimension_numbers<[1], [0], [0], [1], [0, 0, 1, 1], [], []>} : vector<32x32xf32>, vector<32x32xf32>, vector<32x32xf32> -> vector<32x32xf32>
    %cst_56 = arith.constant dense<0.000000e+00> : vector<32x32xf32>
    %44 = tpu.matmul %39, %2, %cst_56 {dimension_numbers = #tpu.dot_dimension_numbers<[1], [0], [0], [1], [0, 0, 1, 1], [], []>} : vector<32x32xf32>, vector<32x32xf32>, vector<32x32xf32> -> vector<32x32xf32>
    %45 = arith.addf %43, %44 : vector<32x32xf32>
    %46 = arith.mulf %42, %11 : vector<32x32xf32>
    %47 = arith.mulf %45, %12 : vector<32x32xf32>
    %48 = arith.subf %46, %47 : vector<32x32xf32>
    %49 = arith.mulf %42, %12 : vector<32x32xf32>
    %50 = arith.mulf %45, %11 : vector<32x32xf32>
    %51 = arith.addf %49, %50 : vector<32x32xf32>
    %cst_57 = arith.constant dense<0.000000e+00> : vector<32x32xf32>
    %52 = tpu.matmul %4, %48, %cst_57 {dimension_numbers = #tpu.dot_dimension_numbers<[1], [0], [0], [1], [0, 0, 1, 1], [], []>} : vector<32x32xf32>, vector<32x32xf32>, vector<32x32xf32> -> vector<32x32xf32>
    %cst_58 = arith.constant dense<0.000000e+00> : vector<32x32xf32>
    %53 = tpu.matmul %5, %51, %cst_58 {dimension_numbers = #tpu.dot_dimension_numbers<[1], [0], [0], [1], [0, 0, 1, 1], [], []>} : vector<32x32xf32>, vector<32x32xf32>, vector<32x32xf32> -> vector<32x32xf32>
    %54 = arith.subf %52, %53 : vector<32x32xf32>
    %cst_59 = arith.constant dense<0.000000e+00> : vector<32x32xf32>
    %55 = tpu.matmul %4, %51, %cst_59 {dimension_numbers = #tpu.dot_dimension_numbers<[1], [0], [0], [1], [0, 0, 1, 1], [], []>} : vector<32x32xf32>, vector<32x32xf32>, vector<32x32xf32> -> vector<32x32xf32>
    %cst_60 = arith.constant dense<0.000000e+00> : vector<32x32xf32>
    %56 = tpu.matmul %5, %48, %cst_60 {dimension_numbers = #tpu.dot_dimension_numbers<[1], [0], [0], [1], [0, 0, 1, 1], [], []>} : vector<32x32xf32>, vector<32x32xf32>, vector<32x32xf32> -> vector<32x32xf32>
    %57 = arith.addf %55, %56 : vector<32x32xf32>
    %cst_61 = arith.constant dense<0.000000e+00> : vector<32x32xf32>
    %58 = tpu.matmul %54, %6, %cst_61 {dimension_numbers = #tpu.dot_dimension_numbers<[1], [0], [0], [1], [0, 0, 1, 1], [], []>} : vector<32x32xf32>, vector<32x32xf32>, vector<32x32xf32> -> vector<32x32xf32>
    %cst_62 = arith.constant dense<0.000000e+00> : vector<32x32xf32>
    %59 = tpu.matmul %57, %7, %cst_62 {dimension_numbers = #tpu.dot_dimension_numbers<[1], [0], [0], [1], [0, 0, 1, 1], [], []>} : vector<32x32xf32>, vector<32x32xf32>, vector<32x32xf32> -> vector<32x32xf32>
    %60 = arith.subf %58, %59 : vector<32x32xf32>
    %cst_63 = arith.constant dense<0.000000e+00> : vector<32x32xf32>
    %61 = tpu.matmul %54, %7, %cst_63 {dimension_numbers = #tpu.dot_dimension_numbers<[1], [0], [0], [1], [0, 0, 1, 1], [], []>} : vector<32x32xf32>, vector<32x32xf32>, vector<32x32xf32> -> vector<32x32xf32>
    %cst_64 = arith.constant dense<0.000000e+00> : vector<32x32xf32>
    %62 = tpu.matmul %57, %6, %cst_64 {dimension_numbers = #tpu.dot_dimension_numbers<[1], [0], [0], [1], [0, 0, 1, 1], [], []>} : vector<32x32xf32>, vector<32x32xf32>, vector<32x32xf32> -> vector<32x32xf32>
    %63 = arith.addf %61, %62 : vector<32x32xf32>
    %64 = arith.mulf %60, %8 : vector<32x32xf32>
    %65 = arith.mulf %63, %8 : vector<32x32xf32>
    %cst_65 = arith.constant dense<0.000000e+00> : vector<32x32xf32>
    %66 = tpu.matmul %0, %64, %cst_65 {dimension_numbers = #tpu.dot_dimension_numbers<[1], [0], [0], [1], [0, 0, 1, 1], [], []>} : vector<32x32xf32>, vector<32x32xf32>, vector<32x32xf32> -> vector<32x32xf32>
    %cst_66 = arith.constant dense<0.000000e+00> : vector<32x32xf32>
    %67 = tpu.matmul %1, %65, %cst_66 {dimension_numbers = #tpu.dot_dimension_numbers<[1], [0], [0], [1], [0, 0, 1, 1], [], []>} : vector<32x32xf32>, vector<32x32xf32>, vector<32x32xf32> -> vector<32x32xf32>
    %68 = arith.subf %66, %67 : vector<32x32xf32>
    %cst_67 = arith.constant dense<0.000000e+00> : vector<32x32xf32>
    %69 = tpu.matmul %0, %65, %cst_67 {dimension_numbers = #tpu.dot_dimension_numbers<[1], [0], [0], [1], [0, 0, 1, 1], [], []>} : vector<32x32xf32>, vector<32x32xf32>, vector<32x32xf32> -> vector<32x32xf32>
    %cst_68 = arith.constant dense<0.000000e+00> : vector<32x32xf32>
    %70 = tpu.matmul %1, %64, %cst_68 {dimension_numbers = #tpu.dot_dimension_numbers<[1], [0], [0], [1], [0, 0, 1, 1], [], []>} : vector<32x32xf32>, vector<32x32xf32>, vector<32x32xf32> -> vector<32x32xf32>
    %71 = arith.addf %69, %70 : vector<32x32xf32>
    %cst_69 = arith.constant dense<0.000000e+00> : vector<32x32xf32>
    %72 = tpu.matmul %68, %2, %cst_69 {dimension_numbers = #tpu.dot_dimension_numbers<[1], [0], [0], [1], [0, 0, 1, 1], [], []>} : vector<32x32xf32>, vector<32x32xf32>, vector<32x32xf32> -> vector<32x32xf32>
    %cst_70 = arith.constant dense<0.000000e+00> : vector<32x32xf32>
    %73 = tpu.matmul %71, %3, %cst_70 {dimension_numbers = #tpu.dot_dimension_numbers<[1], [0], [0], [1], [0, 0, 1, 1], [], []>} : vector<32x32xf32>, vector<32x32xf32>, vector<32x32xf32> -> vector<32x32xf32>
    %74 = arith.subf %72, %73 : vector<32x32xf32>
    %cst_71 = arith.constant dense<0.000000e+00> : vector<32x32xf32>
    %75 = tpu.matmul %68, %3, %cst_71 {dimension_numbers = #tpu.dot_dimension_numbers<[1], [0], [0], [1], [0, 0, 1, 1], [], []>} : vector<32x32xf32>, vector<32x32xf32>, vector<32x32xf32> -> vector<32x32xf32>
    %cst_72 = arith.constant dense<0.000000e+00> : vector<32x32xf32>
    %76 = tpu.matmul %71, %2, %cst_72 {dimension_numbers = #tpu.dot_dimension_numbers<[1], [0], [0], [1], [0, 0, 1, 1], [], []>} : vector<32x32xf32>, vector<32x32xf32>, vector<32x32xf32> -> vector<32x32xf32>
    %77 = arith.addf %75, %76 : vector<32x32xf32>
    %78 = arith.mulf %74, %13 : vector<32x32xf32>
    %79 = arith.mulf %77, %14 : vector<32x32xf32>
    %80 = arith.subf %78, %79 : vector<32x32xf32>
    %81 = arith.mulf %74, %14 : vector<32x32xf32>
    %82 = arith.mulf %77, %13 : vector<32x32xf32>
    %83 = arith.addf %81, %82 : vector<32x32xf32>
    %cst_73 = arith.constant dense<0.000000e+00> : vector<32x32xf32>
    %84 = tpu.matmul %4, %80, %cst_73 {dimension_numbers = #tpu.dot_dimension_numbers<[1], [0], [0], [1], [0, 0, 1, 1], [], []>} : vector<32x32xf32>, vector<32x32xf32>, vector<32x32xf32> -> vector<32x32xf32>
    %cst_74 = arith.constant dense<0.000000e+00> : vector<32x32xf32>
    %85 = tpu.matmul %5, %83, %cst_74 {dimension_numbers = #tpu.dot_dimension_numbers<[1], [0], [0], [1], [0, 0, 1, 1], [], []>} : vector<32x32xf32>, vector<32x32xf32>, vector<32x32xf32> -> vector<32x32xf32>
    %86 = arith.subf %84, %85 : vector<32x32xf32>
    %cst_75 = arith.constant dense<0.000000e+00> : vector<32x32xf32>
    %87 = tpu.matmul %4, %83, %cst_75 {dimension_numbers = #tpu.dot_dimension_numbers<[1], [0], [0], [1], [0, 0, 1, 1], [], []>} : vector<32x32xf32>, vector<32x32xf32>, vector<32x32xf32> -> vector<32x32xf32>
    %cst_76 = arith.constant dense<0.000000e+00> : vector<32x32xf32>
    %88 = tpu.matmul %5, %80, %cst_76 {dimension_numbers = #tpu.dot_dimension_numbers<[1], [0], [0], [1], [0, 0, 1, 1], [], []>} : vector<32x32xf32>, vector<32x32xf32>, vector<32x32xf32> -> vector<32x32xf32>
    %89 = arith.addf %87, %88 : vector<32x32xf32>
    %cst_77 = arith.constant dense<0.000000e+00> : vector<32x32xf32>
    %90 = tpu.matmul %86, %6, %cst_77 {dimension_numbers = #tpu.dot_dimension_numbers<[1], [0], [0], [1], [0, 0, 1, 1], [], []>} : vector<32x32xf32>, vector<32x32xf32>, vector<32x32xf32> -> vector<32x32xf32>
    %cst_78 = arith.constant dense<0.000000e+00> : vector<32x32xf32>
    %91 = tpu.matmul %89, %7, %cst_78 {dimension_numbers = #tpu.dot_dimension_numbers<[1], [0], [0], [1], [0, 0, 1, 1], [], []>} : vector<32x32xf32>, vector<32x32xf32>, vector<32x32xf32> -> vector<32x32xf32>
    %92 = arith.subf %90, %91 : vector<32x32xf32>
    %cst_79 = arith.constant dense<0.000000e+00> : vector<32x32xf32>
    %93 = tpu.matmul %86, %7, %cst_79 {dimension_numbers = #tpu.dot_dimension_numbers<[1], [0], [0], [1], [0, 0, 1, 1], [], []>} : vector<32x32xf32>, vector<32x32xf32>, vector<32x32xf32> -> vector<32x32xf32>
    %cst_80 = arith.constant dense<0.000000e+00> : vector<32x32xf32>
    %94 = tpu.matmul %89, %6, %cst_80 {dimension_numbers = #tpu.dot_dimension_numbers<[1], [0], [0], [1], [0, 0, 1, 1], [], []>} : vector<32x32xf32>, vector<32x32xf32>, vector<32x32xf32> -> vector<32x32xf32>
    %95 = arith.addf %93, %94 : vector<32x32xf32>
    %96 = arith.mulf %92, %18 : vector<32x32xf32>
    %97 = arith.mulf %95, %22 : vector<32x32xf32>
    %98 = arith.subf %96, %97 : vector<32x32xf32>
    %99 = arith.mulf %92, %22 : vector<32x32xf32>
    %100 = arith.mulf %95, %18 : vector<32x32xf32>
    %101 = arith.addf %99, %100 : vector<32x32xf32>
    %102 = arith.mulf %98, %8 : vector<32x32xf32>
    %103 = arith.mulf %101, %8 : vector<32x32xf32>
    %cst_81 = arith.constant dense<0.000000e+00> : vector<32x32xf32>
    %104 = tpu.matmul %0, %102, %cst_81 {dimension_numbers = #tpu.dot_dimension_numbers<[1], [0], [0], [1], [0, 0, 1, 1], [], []>} : vector<32x32xf32>, vector<32x32xf32>, vector<32x32xf32> -> vector<32x32xf32>
    %cst_82 = arith.constant dense<0.000000e+00> : vector<32x32xf32>
    %105 = tpu.matmul %1, %103, %cst_82 {dimension_numbers = #tpu.dot_dimension_numbers<[1], [0], [0], [1], [0, 0, 1, 1], [], []>} : vector<32x32xf32>, vector<32x32xf32>, vector<32x32xf32> -> vector<32x32xf32>
    %106 = arith.subf %104, %105 : vector<32x32xf32>
    %cst_83 = arith.constant dense<0.000000e+00> : vector<32x32xf32>
    %107 = tpu.matmul %0, %103, %cst_83 {dimension_numbers = #tpu.dot_dimension_numbers<[1], [0], [0], [1], [0, 0, 1, 1], [], []>} : vector<32x32xf32>, vector<32x32xf32>, vector<32x32xf32> -> vector<32x32xf32>
    %cst_84 = arith.constant dense<0.000000e+00> : vector<32x32xf32>
    %108 = tpu.matmul %1, %102, %cst_84 {dimension_numbers = #tpu.dot_dimension_numbers<[1], [0], [0], [1], [0, 0, 1, 1], [], []>} : vector<32x32xf32>, vector<32x32xf32>, vector<32x32xf32> -> vector<32x32xf32>
    %109 = arith.addf %107, %108 : vector<32x32xf32>
    %cst_85 = arith.constant dense<0.000000e+00> : vector<32x32xf32>
    %110 = tpu.matmul %106, %2, %cst_85 {dimension_numbers = #tpu.dot_dimension_numbers<[1], [0], [0], [1], [0, 0, 1, 1], [], []>} : vector<32x32xf32>, vector<32x32xf32>, vector<32x32xf32> -> vector<32x32xf32>
    %cst_86 = arith.constant dense<0.000000e+00> : vector<32x32xf32>
    %111 = tpu.matmul %109, %3, %cst_86 {dimension_numbers = #tpu.dot_dimension_numbers<[1], [0], [0], [1], [0, 0, 1, 1], [], []>} : vector<32x32xf32>, vector<32x32xf32>, vector<32x32xf32> -> vector<32x32xf32>
    %112 = arith.subf %110, %111 : vector<32x32xf32>
    %cst_87 = arith.constant dense<0.000000e+00> : vector<32x32xf32>
    %113 = tpu.matmul %106, %3, %cst_87 {dimension_numbers = #tpu.dot_dimension_numbers<[1], [0], [0], [1], [0, 0, 1, 1], [], []>} : vector<32x32xf32>, vector<32x32xf32>, vector<32x32xf32> -> vector<32x32xf32>
    %cst_88 = arith.constant dense<0.000000e+00> : vector<32x32xf32>
    %114 = tpu.matmul %109, %2, %cst_88 {dimension_numbers = #tpu.dot_dimension_numbers<[1], [0], [0], [1], [0, 0, 1, 1], [], []>} : vector<32x32xf32>, vector<32x32xf32>, vector<32x32xf32> -> vector<32x32xf32>
    %115 = arith.addf %113, %114 : vector<32x32xf32>
    %116 = arith.mulf %112, %13 : vector<32x32xf32>
    %117 = arith.mulf %115, %14 : vector<32x32xf32>
    %118 = arith.subf %116, %117 : vector<32x32xf32>
    %119 = arith.mulf %112, %14 : vector<32x32xf32>
    %120 = arith.mulf %115, %13 : vector<32x32xf32>
    %121 = arith.addf %119, %120 : vector<32x32xf32>
    %cst_89 = arith.constant dense<0.000000e+00> : vector<32x32xf32>
    %122 = tpu.matmul %4, %118, %cst_89 {dimension_numbers = #tpu.dot_dimension_numbers<[1], [0], [0], [1], [0, 0, 1, 1], [], []>} : vector<32x32xf32>, vector<32x32xf32>, vector<32x32xf32> -> vector<32x32xf32>
    %cst_90 = arith.constant dense<0.000000e+00> : vector<32x32xf32>
    %123 = tpu.matmul %5, %121, %cst_90 {dimension_numbers = #tpu.dot_dimension_numbers<[1], [0], [0], [1], [0, 0, 1, 1], [], []>} : vector<32x32xf32>, vector<32x32xf32>, vector<32x32xf32> -> vector<32x32xf32>
    %124 = arith.subf %122, %123 : vector<32x32xf32>
    %cst_91 = arith.constant dense<0.000000e+00> : vector<32x32xf32>
    %125 = tpu.matmul %4, %121, %cst_91 {dimension_numbers = #tpu.dot_dimension_numbers<[1], [0], [0], [1], [0, 0, 1, 1], [], []>} : vector<32x32xf32>, vector<32x32xf32>, vector<32x32xf32> -> vector<32x32xf32>
    %cst_92 = arith.constant dense<0.000000e+00> : vector<32x32xf32>
    %126 = tpu.matmul %5, %118, %cst_92 {dimension_numbers = #tpu.dot_dimension_numbers<[1], [0], [0], [1], [0, 0, 1, 1], [], []>} : vector<32x32xf32>, vector<32x32xf32>, vector<32x32xf32> -> vector<32x32xf32>
    %127 = arith.addf %125, %126 : vector<32x32xf32>
    %cst_93 = arith.constant dense<0.000000e+00> : vector<32x32xf32>
    %128 = tpu.matmul %124, %6, %cst_93 {dimension_numbers = #tpu.dot_dimension_numbers<[1], [0], [0], [1], [0, 0, 1, 1], [], []>} : vector<32x32xf32>, vector<32x32xf32>, vector<32x32xf32> -> vector<32x32xf32>
    %cst_94 = arith.constant dense<0.000000e+00> : vector<32x32xf32>
    %129 = tpu.matmul %127, %7, %cst_94 {dimension_numbers = #tpu.dot_dimension_numbers<[1], [0], [0], [1], [0, 0, 1, 1], [], []>} : vector<32x32xf32>, vector<32x32xf32>, vector<32x32xf32> -> vector<32x32xf32>
    %130 = arith.subf %128, %129 : vector<32x32xf32>
    %cst_95 = arith.constant dense<0.000000e+00> : vector<32x32xf32>
    %131 = tpu.matmul %124, %7, %cst_95 {dimension_numbers = #tpu.dot_dimension_numbers<[1], [0], [0], [1], [0, 0, 1, 1], [], []>} : vector<32x32xf32>, vector<32x32xf32>, vector<32x32xf32> -> vector<32x32xf32>
    %cst_96 = arith.constant dense<0.000000e+00> : vector<32x32xf32>
    %132 = tpu.matmul %127, %6, %cst_96 {dimension_numbers = #tpu.dot_dimension_numbers<[1], [0], [0], [1], [0, 0, 1, 1], [], []>} : vector<32x32xf32>, vector<32x32xf32>, vector<32x32xf32> -> vector<32x32xf32>
    %133 = arith.addf %131, %132 : vector<32x32xf32>
    %134 = arith.mulf %130, %20 : vector<32x32xf32>
    %135 = arith.mulf %133, %24 : vector<32x32xf32>
    %136 = arith.subf %134, %135 : vector<32x32xf32>
    %137 = arith.mulf %130, %24 : vector<32x32xf32>
    %138 = arith.mulf %133, %20 : vector<32x32xf32>
    %139 = arith.addf %137, %138 : vector<32x32xf32>
    %140 = arith.mulf %136, %8 : vector<32x32xf32>
    %141 = arith.mulf %139, %8 : vector<32x32xf32>
    %cst_97 = arith.constant dense<0.000000e+00> : vector<32x32xf32>
    %142 = tpu.matmul %0, %140, %cst_97 {dimension_numbers = #tpu.dot_dimension_numbers<[1], [0], [0], [1], [0, 0, 1, 1], [], []>} : vector<32x32xf32>, vector<32x32xf32>, vector<32x32xf32> -> vector<32x32xf32>
    %cst_98 = arith.constant dense<0.000000e+00> : vector<32x32xf32>
    %143 = tpu.matmul %1, %141, %cst_98 {dimension_numbers = #tpu.dot_dimension_numbers<[1], [0], [0], [1], [0, 0, 1, 1], [], []>} : vector<32x32xf32>, vector<32x32xf32>, vector<32x32xf32> -> vector<32x32xf32>
    %144 = arith.subf %142, %143 : vector<32x32xf32>
    %cst_99 = arith.constant dense<0.000000e+00> : vector<32x32xf32>
    %145 = tpu.matmul %0, %141, %cst_99 {dimension_numbers = #tpu.dot_dimension_numbers<[1], [0], [0], [1], [0, 0, 1, 1], [], []>} : vector<32x32xf32>, vector<32x32xf32>, vector<32x32xf32> -> vector<32x32xf32>
    %cst_100 = arith.constant dense<0.000000e+00> : vector<32x32xf32>
    %146 = tpu.matmul %1, %140, %cst_100 {dimension_numbers = #tpu.dot_dimension_numbers<[1], [0], [0], [1], [0, 0, 1, 1], [], []>} : vector<32x32xf32>, vector<32x32xf32>, vector<32x32xf32> -> vector<32x32xf32>
    %147 = arith.addf %145, %146 : vector<32x32xf32>
    %cst_101 = arith.constant dense<0.000000e+00> : vector<32x32xf32>
    %148 = tpu.matmul %144, %2, %cst_101 {dimension_numbers = #tpu.dot_dimension_numbers<[1], [0], [0], [1], [0, 0, 1, 1], [], []>} : vector<32x32xf32>, vector<32x32xf32>, vector<32x32xf32> -> vector<32x32xf32>
    %cst_102 = arith.constant dense<0.000000e+00> : vector<32x32xf32>
    %149 = tpu.matmul %147, %3, %cst_102 {dimension_numbers = #tpu.dot_dimension_numbers<[1], [0], [0], [1], [0, 0, 1, 1], [], []>} : vector<32x32xf32>, vector<32x32xf32>, vector<32x32xf32> -> vector<32x32xf32>
    %150 = arith.subf %148, %149 : vector<32x32xf32>
    %cst_103 = arith.constant dense<0.000000e+00> : vector<32x32xf32>
    %151 = tpu.matmul %144, %3, %cst_103 {dimension_numbers = #tpu.dot_dimension_numbers<[1], [0], [0], [1], [0, 0, 1, 1], [], []>} : vector<32x32xf32>, vector<32x32xf32>, vector<32x32xf32> -> vector<32x32xf32>
    %cst_104 = arith.constant dense<0.000000e+00> : vector<32x32xf32>
    %152 = tpu.matmul %147, %2, %cst_104 {dimension_numbers = #tpu.dot_dimension_numbers<[1], [0], [0], [1], [0, 0, 1, 1], [], []>} : vector<32x32xf32>, vector<32x32xf32>, vector<32x32xf32> -> vector<32x32xf32>
    %153 = arith.addf %151, %152 : vector<32x32xf32>
    %154 = arith.mulf %150, %15 : vector<32x32xf32>
    %155 = arith.mulf %153, %16 : vector<32x32xf32>
    %156 = arith.subf %154, %155 : vector<32x32xf32>
    %157 = arith.mulf %150, %16 : vector<32x32xf32>
    %158 = arith.mulf %153, %15 : vector<32x32xf32>
    %159 = arith.addf %157, %158 : vector<32x32xf32>
    %cst_105 = arith.constant dense<0.000000e+00> : vector<32x32xf32>
    %160 = tpu.matmul %4, %156, %cst_105 {dimension_numbers = #tpu.dot_dimension_numbers<[1], [0], [0], [1], [0, 0, 1, 1], [], []>} : vector<32x32xf32>, vector<32x32xf32>, vector<32x32xf32> -> vector<32x32xf32>
    %cst_106 = arith.constant dense<0.000000e+00> : vector<32x32xf32>
    %161 = tpu.matmul %5, %159, %cst_106 {dimension_numbers = #tpu.dot_dimension_numbers<[1], [0], [0], [1], [0, 0, 1, 1], [], []>} : vector<32x32xf32>, vector<32x32xf32>, vector<32x32xf32> -> vector<32x32xf32>
    %162 = arith.subf %160, %161 : vector<32x32xf32>
    %cst_107 = arith.constant dense<0.000000e+00> : vector<32x32xf32>
    %163 = tpu.matmul %4, %159, %cst_107 {dimension_numbers = #tpu.dot_dimension_numbers<[1], [0], [0], [1], [0, 0, 1, 1], [], []>} : vector<32x32xf32>, vector<32x32xf32>, vector<32x32xf32> -> vector<32x32xf32>
    %cst_108 = arith.constant dense<0.000000e+00> : vector<32x32xf32>
    %164 = tpu.matmul %5, %156, %cst_108 {dimension_numbers = #tpu.dot_dimension_numbers<[1], [0], [0], [1], [0, 0, 1, 1], [], []>} : vector<32x32xf32>, vector<32x32xf32>, vector<32x32xf32> -> vector<32x32xf32>
    %165 = arith.addf %163, %164 : vector<32x32xf32>
    %cst_109 = arith.constant dense<0.000000e+00> : vector<32x32xf32>
    %166 = tpu.matmul %162, %6, %cst_109 {dimension_numbers = #tpu.dot_dimension_numbers<[1], [0], [0], [1], [0, 0, 1, 1], [], []>} : vector<32x32xf32>, vector<32x32xf32>, vector<32x32xf32> -> vector<32x32xf32>
    %cst_110 = arith.constant dense<0.000000e+00> : vector<32x32xf32>
    %167 = tpu.matmul %165, %7, %cst_110 {dimension_numbers = #tpu.dot_dimension_numbers<[1], [0], [0], [1], [0, 0, 1, 1], [], []>} : vector<32x32xf32>, vector<32x32xf32>, vector<32x32xf32> -> vector<32x32xf32>
    %168 = arith.subf %166, %167 : vector<32x32xf32>
    %cst_111 = arith.constant dense<0.000000e+00> : vector<32x32xf32>
    %169 = tpu.matmul %162, %7, %cst_111 {dimension_numbers = #tpu.dot_dimension_numbers<[1], [0], [0], [1], [0, 0, 1, 1], [], []>} : vector<32x32xf32>, vector<32x32xf32>, vector<32x32xf32> -> vector<32x32xf32>
    %cst_112 = arith.constant dense<0.000000e+00> : vector<32x32xf32>
    %170 = tpu.matmul %165, %6, %cst_112 {dimension_numbers = #tpu.dot_dimension_numbers<[1], [0], [0], [1], [0, 0, 1, 1], [], []>} : vector<32x32xf32>, vector<32x32xf32>, vector<32x32xf32> -> vector<32x32xf32>
    %171 = arith.addf %169, %170 : vector<32x32xf32>
    %172 = arith.mulf %168, %168 : vector<32x32xf32>
    %173 = arith.mulf %171, %171 : vector<32x32xf32>
    %174 = arith.addf %172, %173 : vector<32x32xf32>
    %cst_113 = arith.constant dense<0.000000e+00> : vector<16x32xf32>
    %175 = tpu.matmul %9, %174, %cst_113 {dimension_numbers = #tpu.dot_dimension_numbers<[1], [0], [0], [1], [0, 0, 1, 1], [], []>} : vector<16x32xf32>, vector<32x32xf32>, vector<16x32xf32> -> vector<16x32xf32>
    %cst_114 = arith.constant dense<0.000000e+00> : vector<16x16xf32>
    %176 = tpu.matmul %175, %10, %cst_114 {dimension_numbers = #tpu.dot_dimension_numbers<[1], [0], [0], [1], [0, 0, 1, 1], [], []>} : vector<16x32xf32>, vector<32x16xf32>, vector<16x16xf32> -> vector<16x16xf32>
    %177 = arith.mulf %176, %30 : vector<16x16xf32>
    %cst_115 = arith.constant dense<0.000000e+00> : vector<16xf32>
    %178 = vector.multi_reduction <add>, %177, %cst_115 [0] : vector<16x16xf32> to vector<16xf32>
    %179 = vector.shape_cast %178 : vector<16xf32> to vector<1x16xf32>
    %c1_116 = arith.constant 1 : index
    %c0_117 = arith.constant 0 : index
    %c0_118 = arith.constant 0 : index
    %180 = vector.load %arg0[%c1_116, %c0_117, %c0_118] : memref<2x32x32xf32, #tpu.memory_space<vmem>>, vector<1x32x32xf32>
    %181 = vector.shape_cast %180 : vector<1x32x32xf32> to vector<32x32xf32>
    %cst_119 = arith.constant 0.000000e+00 : f32
    %182 = vector.broadcast %cst_119 : f32 to vector<32x32xf32>
    %cst_120 = arith.constant dense<0.000000e+00> : vector<32x32xf32>
    %183 = tpu.matmul %0, %181, %cst_120 {dimension_numbers = #tpu.dot_dimension_numbers<[1], [0], [0], [1], [0, 0, 1, 1], [], []>} : vector<32x32xf32>, vector<32x32xf32>, vector<32x32xf32> -> vector<32x32xf32>
    %cst_121 = arith.constant dense<0.000000e+00> : vector<32x32xf32>
    %184 = tpu.matmul %1, %182, %cst_121 {dimension_numbers = #tpu.dot_dimension_numbers<[1], [0], [0], [1], [0, 0, 1, 1], [], []>} : vector<32x32xf32>, vector<32x32xf32>, vector<32x32xf32> -> vector<32x32xf32>
    %185 = arith.subf %183, %184 : vector<32x32xf32>
    %cst_122 = arith.constant dense<0.000000e+00> : vector<32x32xf32>
    %186 = tpu.matmul %0, %182, %cst_122 {dimension_numbers = #tpu.dot_dimension_numbers<[1], [0], [0], [1], [0, 0, 1, 1], [], []>} : vector<32x32xf32>, vector<32x32xf32>, vector<32x32xf32> -> vector<32x32xf32>
    %cst_123 = arith.constant dense<0.000000e+00> : vector<32x32xf32>
    %187 = tpu.matmul %1, %181, %cst_123 {dimension_numbers = #tpu.dot_dimension_numbers<[1], [0], [0], [1], [0, 0, 1, 1], [], []>} : vector<32x32xf32>, vector<32x32xf32>, vector<32x32xf32> -> vector<32x32xf32>
    %188 = arith.addf %186, %187 : vector<32x32xf32>
    %cst_124 = arith.constant dense<0.000000e+00> : vector<32x32xf32>
    %189 = tpu.matmul %185, %2, %cst_124 {dimension_numbers = #tpu.dot_dimension_numbers<[1], [0], [0], [1], [0, 0, 1, 1], [], []>} : vector<32x32xf32>, vector<32x32xf32>, vector<32x32xf32> -> vector<32x32xf32>
    %cst_125 = arith.constant dense<0.000000e+00> : vector<32x32xf32>
    %190 = tpu.matmul %188, %3, %cst_125 {dimension_numbers = #tpu.dot_dimension_numbers<[1], [0], [0], [1], [0, 0, 1, 1], [], []>} : vector<32x32xf32>, vector<32x32xf32>, vector<32x32xf32> -> vector<32x32xf32>
    %191 = arith.subf %189, %190 : vector<32x32xf32>
    %cst_126 = arith.constant dense<0.000000e+00> : vector<32x32xf32>
    %192 = tpu.matmul %185, %3, %cst_126 {dimension_numbers = #tpu.dot_dimension_numbers<[1], [0], [0], [1], [0, 0, 1, 1], [], []>} : vector<32x32xf32>, vector<32x32xf32>, vector<32x32xf32> -> vector<32x32xf32>
    %cst_127 = arith.constant dense<0.000000e+00> : vector<32x32xf32>
    %193 = tpu.matmul %188, %2, %cst_127 {dimension_numbers = #tpu.dot_dimension_numbers<[1], [0], [0], [1], [0, 0, 1, 1], [], []>} : vector<32x32xf32>, vector<32x32xf32>, vector<32x32xf32> -> vector<32x32xf32>
    %194 = arith.addf %192, %193 : vector<32x32xf32>
    %195 = arith.mulf %191, %11 : vector<32x32xf32>
    %196 = arith.mulf %194, %12 : vector<32x32xf32>
    %197 = arith.subf %195, %196 : vector<32x32xf32>
    %198 = arith.mulf %191, %12 : vector<32x32xf32>
    %199 = arith.mulf %194, %11 : vector<32x32xf32>
    %200 = arith.addf %198, %199 : vector<32x32xf32>
    %cst_128 = arith.constant dense<0.000000e+00> : vector<32x32xf32>
    %201 = tpu.matmul %4, %197, %cst_128 {dimension_numbers = #tpu.dot_dimension_numbers<[1], [0], [0], [1], [0, 0, 1, 1], [], []>} : vector<32x32xf32>, vector<32x32xf32>, vector<32x32xf32> -> vector<32x32xf32>
    %cst_129 = arith.constant dense<0.000000e+00> : vector<32x32xf32>
    %202 = tpu.matmul %5, %200, %cst_129 {dimension_numbers = #tpu.dot_dimension_numbers<[1], [0], [0], [1], [0, 0, 1, 1], [], []>} : vector<32x32xf32>, vector<32x32xf32>, vector<32x32xf32> -> vector<32x32xf32>
    %203 = arith.subf %201, %202 : vector<32x32xf32>
    %cst_130 = arith.constant dense<0.000000e+00> : vector<32x32xf32>
    %204 = tpu.matmul %4, %200, %cst_130 {dimension_numbers = #tpu.dot_dimension_numbers<[1], [0], [0], [1], [0, 0, 1, 1], [], []>} : vector<32x32xf32>, vector<32x32xf32>, vector<32x32xf32> -> vector<32x32xf32>
    %cst_131 = arith.constant dense<0.000000e+00> : vector<32x32xf32>
    %205 = tpu.matmul %5, %197, %cst_131 {dimension_numbers = #tpu.dot_dimension_numbers<[1], [0], [0], [1], [0, 0, 1, 1], [], []>} : vector<32x32xf32>, vector<32x32xf32>, vector<32x32xf32> -> vector<32x32xf32>
    %206 = arith.addf %204, %205 : vector<32x32xf32>
    %cst_132 = arith.constant dense<0.000000e+00> : vector<32x32xf32>
    %207 = tpu.matmul %203, %6, %cst_132 {dimension_numbers = #tpu.dot_dimension_numbers<[1], [0], [0], [1], [0, 0, 1, 1], [], []>} : vector<32x32xf32>, vector<32x32xf32>, vector<32x32xf32> -> vector<32x32xf32>
    %cst_133 = arith.constant dense<0.000000e+00> : vector<32x32xf32>
    %208 = tpu.matmul %206, %7, %cst_133 {dimension_numbers = #tpu.dot_dimension_numbers<[1], [0], [0], [1], [0, 0, 1, 1], [], []>} : vector<32x32xf32>, vector<32x32xf32>, vector<32x32xf32> -> vector<32x32xf32>
    %209 = arith.subf %207, %208 : vector<32x32xf32>
    %cst_134 = arith.constant dense<0.000000e+00> : vector<32x32xf32>
    %210 = tpu.matmul %203, %7, %cst_134 {dimension_numbers = #tpu.dot_dimension_numbers<[1], [0], [0], [1], [0, 0, 1, 1], [], []>} : vector<32x32xf32>, vector<32x32xf32>, vector<32x32xf32> -> vector<32x32xf32>
    %cst_135 = arith.constant dense<0.000000e+00> : vector<32x32xf32>
    %211 = tpu.matmul %206, %6, %cst_135 {dimension_numbers = #tpu.dot_dimension_numbers<[1], [0], [0], [1], [0, 0, 1, 1], [], []>} : vector<32x32xf32>, vector<32x32xf32>, vector<32x32xf32> -> vector<32x32xf32>
    %212 = arith.addf %210, %211 : vector<32x32xf32>
    %213 = arith.mulf %209, %8 : vector<32x32xf32>
    %214 = arith.mulf %212, %8 : vector<32x32xf32>
    %cst_136 = arith.constant dense<0.000000e+00> : vector<32x32xf32>
    %215 = tpu.matmul %0, %213, %cst_136 {dimension_numbers = #tpu.dot_dimension_numbers<[1], [0], [0], [1], [0, 0, 1, 1], [], []>} : vector<32x32xf32>, vector<32x32xf32>, vector<32x32xf32> -> vector<32x32xf32>
    %cst_137 = arith.constant dense<0.000000e+00> : vector<32x32xf32>
    %216 = tpu.matmul %1, %214, %cst_137 {dimension_numbers = #tpu.dot_dimension_numbers<[1], [0], [0], [1], [0, 0, 1, 1], [], []>} : vector<32x32xf32>, vector<32x32xf32>, vector<32x32xf32> -> vector<32x32xf32>
    %217 = arith.subf %215, %216 : vector<32x32xf32>
    %cst_138 = arith.constant dense<0.000000e+00> : vector<32x32xf32>
    %218 = tpu.matmul %0, %214, %cst_138 {dimension_numbers = #tpu.dot_dimension_numbers<[1], [0], [0], [1], [0, 0, 1, 1], [], []>} : vector<32x32xf32>, vector<32x32xf32>, vector<32x32xf32> -> vector<32x32xf32>
    %cst_139 = arith.constant dense<0.000000e+00> : vector<32x32xf32>
    %219 = tpu.matmul %1, %213, %cst_139 {dimension_numbers = #tpu.dot_dimension_numbers<[1], [0], [0], [1], [0, 0, 1, 1], [], []>} : vector<32x32xf32>, vector<32x32xf32>, vector<32x32xf32> -> vector<32x32xf32>
    %220 = arith.addf %218, %219 : vector<32x32xf32>
    %cst_140 = arith.constant dense<0.000000e+00> : vector<32x32xf32>
    %221 = tpu.matmul %217, %2, %cst_140 {dimension_numbers = #tpu.dot_dimension_numbers<[1], [0], [0], [1], [0, 0, 1, 1], [], []>} : vector<32x32xf32>, vector<32x32xf32>, vector<32x32xf32> -> vector<32x32xf32>
    %cst_141 = arith.constant dense<0.000000e+00> : vector<32x32xf32>
    %222 = tpu.matmul %220, %3, %cst_141 {dimension_numbers = #tpu.dot_dimension_numbers<[1], [0], [0], [1], [0, 0, 1, 1], [], []>} : vector<32x32xf32>, vector<32x32xf32>, vector<32x32xf32> -> vector<32x32xf32>
    %223 = arith.subf %221, %222 : vector<32x32xf32>
    %cst_142 = arith.constant dense<0.000000e+00> : vector<32x32xf32>
    %224 = tpu.matmul %217, %3, %cst_142 {dimension_numbers = #tpu.dot_dimension_numbers<[1], [0], [0], [1], [0, 0, 1, 1], [], []>} : vector<32x32xf32>, vector<32x32xf32>, vector<32x32xf32> -> vector<32x32xf32>
    %cst_143 = arith.constant dense<0.000000e+00> : vector<32x32xf32>
    %225 = tpu.matmul %220, %2, %cst_143 {dimension_numbers = #tpu.dot_dimension_numbers<[1], [0], [0], [1], [0, 0, 1, 1], [], []>} : vector<32x32xf32>, vector<32x32xf32>, vector<32x32xf32> -> vector<32x32xf32>
    %226 = arith.addf %224, %225 : vector<32x32xf32>
    %227 = arith.mulf %223, %13 : vector<32x32xf32>
    %228 = arith.mulf %226, %14 : vector<32x32xf32>
    %229 = arith.subf %227, %228 : vector<32x32xf32>
    %230 = arith.mulf %223, %14 : vector<32x32xf32>
    %231 = arith.mulf %226, %13 : vector<32x32xf32>
    %232 = arith.addf %230, %231 : vector<32x32xf32>
    %cst_144 = arith.constant dense<0.000000e+00> : vector<32x32xf32>
    %233 = tpu.matmul %4, %229, %cst_144 {dimension_numbers = #tpu.dot_dimension_numbers<[1], [0], [0], [1], [0, 0, 1, 1], [], []>} : vector<32x32xf32>, vector<32x32xf32>, vector<32x32xf32> -> vector<32x32xf32>
    %cst_145 = arith.constant dense<0.000000e+00> : vector<32x32xf32>
    %234 = tpu.matmul %5, %232, %cst_145 {dimension_numbers = #tpu.dot_dimension_numbers<[1], [0], [0], [1], [0, 0, 1, 1], [], []>} : vector<32x32xf32>, vector<32x32xf32>, vector<32x32xf32> -> vector<32x32xf32>
    %235 = arith.subf %233, %234 : vector<32x32xf32>
    %cst_146 = arith.constant dense<0.000000e+00> : vector<32x32xf32>
    %236 = tpu.matmul %4, %232, %cst_146 {dimension_numbers = #tpu.dot_dimension_numbers<[1], [0], [0], [1], [0, 0, 1, 1], [], []>} : vector<32x32xf32>, vector<32x32xf32>, vector<32x32xf32> -> vector<32x32xf32>
    %cst_147 = arith.constant dense<0.000000e+00> : vector<32x32xf32>
    %237 = tpu.matmul %5, %229, %cst_147 {dimension_numbers = #tpu.dot_dimension_numbers<[1], [0], [0], [1], [0, 0, 1, 1], [], []>} : vector<32x32xf32>, vector<32x32xf32>, vector<32x32xf32> -> vector<32x32xf32>
    %238 = arith.addf %236, %237 : vector<32x32xf32>
    %cst_148 = arith.constant dense<0.000000e+00> : vector<32x32xf32>
    %239 = tpu.matmul %235, %6, %cst_148 {dimension_numbers = #tpu.dot_dimension_numbers<[1], [0], [0], [1], [0, 0, 1, 1], [], []>} : vector<32x32xf32>, vector<32x32xf32>, vector<32x32xf32> -> vector<32x32xf32>
    %cst_149 = arith.constant dense<0.000000e+00> : vector<32x32xf32>
    %240 = tpu.matmul %238, %7, %cst_149 {dimension_numbers = #tpu.dot_dimension_numbers<[1], [0], [0], [1], [0, 0, 1, 1], [], []>} : vector<32x32xf32>, vector<32x32xf32>, vector<32x32xf32> -> vector<32x32xf32>
    %241 = arith.subf %239, %240 : vector<32x32xf32>
    %cst_150 = arith.constant dense<0.000000e+00> : vector<32x32xf32>
    %242 = tpu.matmul %235, %7, %cst_150 {dimension_numbers = #tpu.dot_dimension_numbers<[1], [0], [0], [1], [0, 0, 1, 1], [], []>} : vector<32x32xf32>, vector<32x32xf32>, vector<32x32xf32> -> vector<32x32xf32>
    %cst_151 = arith.constant dense<0.000000e+00> : vector<32x32xf32>
    %243 = tpu.matmul %238, %6, %cst_151 {dimension_numbers = #tpu.dot_dimension_numbers<[1], [0], [0], [1], [0, 0, 1, 1], [], []>} : vector<32x32xf32>, vector<32x32xf32>, vector<32x32xf32> -> vector<32x32xf32>
    %244 = arith.addf %242, %243 : vector<32x32xf32>
    %245 = arith.mulf %241, %18 : vector<32x32xf32>
    %246 = arith.mulf %244, %22 : vector<32x32xf32>
    %247 = arith.subf %245, %246 : vector<32x32xf32>
    %248 = arith.mulf %241, %22 : vector<32x32xf32>
    %249 = arith.mulf %244, %18 : vector<32x32xf32>
    %250 = arith.addf %248, %249 : vector<32x32xf32>
    %251 = arith.mulf %247, %8 : vector<32x32xf32>
    %252 = arith.mulf %250, %8 : vector<32x32xf32>
    %cst_152 = arith.constant dense<0.000000e+00> : vector<32x32xf32>
    %253 = tpu.matmul %0, %251, %cst_152 {dimension_numbers = #tpu.dot_dimension_numbers<[1], [0], [0], [1], [0, 0, 1, 1], [], []>} : vector<32x32xf32>, vector<32x32xf32>, vector<32x32xf32> -> vector<32x32xf32>
    %cst_153 = arith.constant dense<0.000000e+00> : vector<32x32xf32>
    %254 = tpu.matmul %1, %252, %cst_153 {dimension_numbers = #tpu.dot_dimension_numbers<[1], [0], [0], [1], [0, 0, 1, 1], [], []>} : vector<32x32xf32>, vector<32x32xf32>, vector<32x32xf32> -> vector<32x32xf32>
    %255 = arith.subf %253, %254 : vector<32x32xf32>
    %cst_154 = arith.constant dense<0.000000e+00> : vector<32x32xf32>
    %256 = tpu.matmul %0, %252, %cst_154 {dimension_numbers = #tpu.dot_dimension_numbers<[1], [0], [0], [1], [0, 0, 1, 1], [], []>} : vector<32x32xf32>, vector<32x32xf32>, vector<32x32xf32> -> vector<32x32xf32>
    %cst_155 = arith.constant dense<0.000000e+00> : vector<32x32xf32>
    %257 = tpu.matmul %1, %251, %cst_155 {dimension_numbers = #tpu.dot_dimension_numbers<[1], [0], [0], [1], [0, 0, 1, 1], [], []>} : vector<32x32xf32>, vector<32x32xf32>, vector<32x32xf32> -> vector<32x32xf32>
    %258 = arith.addf %256, %257 : vector<32x32xf32>
    %cst_156 = arith.constant dense<0.000000e+00> : vector<32x32xf32>
    %259 = tpu.matmul %255, %2, %cst_156 {dimension_numbers = #tpu.dot_dimension_numbers<[1], [0], [0], [1], [0, 0, 1, 1], [], []>} : vector<32x32xf32>, vector<32x32xf32>, vector<32x32xf32> -> vector<32x32xf32>
    %cst_157 = arith.constant dense<0.000000e+00> : vector<32x32xf32>
    %260 = tpu.matmul %258, %3, %cst_157 {dimension_numbers = #tpu.dot_dimension_numbers<[1], [0], [0], [1], [0, 0, 1, 1], [], []>} : vector<32x32xf32>, vector<32x32xf32>, vector<32x32xf32> -> vector<32x32xf32>
    %261 = arith.subf %259, %260 : vector<32x32xf32>
    %cst_158 = arith.constant dense<0.000000e+00> : vector<32x32xf32>
    %262 = tpu.matmul %255, %3, %cst_158 {dimension_numbers = #tpu.dot_dimension_numbers<[1], [0], [0], [1], [0, 0, 1, 1], [], []>} : vector<32x32xf32>, vector<32x32xf32>, vector<32x32xf32> -> vector<32x32xf32>
    %cst_159 = arith.constant dense<0.000000e+00> : vector<32x32xf32>
    %263 = tpu.matmul %258, %2, %cst_159 {dimension_numbers = #tpu.dot_dimension_numbers<[1], [0], [0], [1], [0, 0, 1, 1], [], []>} : vector<32x32xf32>, vector<32x32xf32>, vector<32x32xf32> -> vector<32x32xf32>
    %264 = arith.addf %262, %263 : vector<32x32xf32>
    %265 = arith.mulf %261, %13 : vector<32x32xf32>
    %266 = arith.mulf %264, %14 : vector<32x32xf32>
    %267 = arith.subf %265, %266 : vector<32x32xf32>
    %268 = arith.mulf %261, %14 : vector<32x32xf32>
    %269 = arith.mulf %264, %13 : vector<32x32xf32>
    %270 = arith.addf %268, %269 : vector<32x32xf32>
    %cst_160 = arith.constant dense<0.000000e+00> : vector<32x32xf32>
    %271 = tpu.matmul %4, %267, %cst_160 {dimension_numbers = #tpu.dot_dimension_numbers<[1], [0], [0], [1], [0, 0, 1, 1], [], []>} : vector<32x32xf32>, vector<32x32xf32>, vector<32x32xf32> -> vector<32x32xf32>
    %cst_161 = arith.constant dense<0.000000e+00> : vector<32x32xf32>
    %272 = tpu.matmul %5, %270, %cst_161 {dimension_numbers = #tpu.dot_dimension_numbers<[1], [0], [0], [1], [0, 0, 1, 1], [], []>} : vector<32x32xf32>, vector<32x32xf32>, vector<32x32xf32> -> vector<32x32xf32>
    %273 = arith.subf %271, %272 : vector<32x32xf32>
    %cst_162 = arith.constant dense<0.000000e+00> : vector<32x32xf32>
    %274 = tpu.matmul %4, %270, %cst_162 {dimension_numbers = #tpu.dot_dimension_numbers<[1], [0], [0], [1], [0, 0, 1, 1], [], []>} : vector<32x32xf32>, vector<32x32xf32>, vector<32x32xf32> -> vector<32x32xf32>
    %cst_163 = arith.constant dense<0.000000e+00> : vector<32x32xf32>
    %275 = tpu.matmul %5, %267, %cst_163 {dimension_numbers = #tpu.dot_dimension_numbers<[1], [0], [0], [1], [0, 0, 1, 1], [], []>} : vector<32x32xf32>, vector<32x32xf32>, vector<32x32xf32> -> vector<32x32xf32>
    %276 = arith.addf %274, %275 : vector<32x32xf32>
    %cst_164 = arith.constant dense<0.000000e+00> : vector<32x32xf32>
    %277 = tpu.matmul %273, %6, %cst_164 {dimension_numbers = #tpu.dot_dimension_numbers<[1], [0], [0], [1], [0, 0, 1, 1], [], []>} : vector<32x32xf32>, vector<32x32xf32>, vector<32x32xf32> -> vector<32x32xf32>
    %cst_165 = arith.constant dense<0.000000e+00> : vector<32x32xf32>
    %278 = tpu.matmul %276, %7, %cst_165 {dimension_numbers = #tpu.dot_dimension_numbers<[1], [0], [0], [1], [0, 0, 1, 1], [], []>} : vector<32x32xf32>, vector<32x32xf32>, vector<32x32xf32> -> vector<32x32xf32>
    %279 = arith.subf %277, %278 : vector<32x32xf32>
    %cst_166 = arith.constant dense<0.000000e+00> : vector<32x32xf32>
    %280 = tpu.matmul %273, %7, %cst_166 {dimension_numbers = #tpu.dot_dimension_numbers<[1], [0], [0], [1], [0, 0, 1, 1], [], []>} : vector<32x32xf32>, vector<32x32xf32>, vector<32x32xf32> -> vector<32x32xf32>
    %cst_167 = arith.constant dense<0.000000e+00> : vector<32x32xf32>
    %281 = tpu.matmul %276, %6, %cst_167 {dimension_numbers = #tpu.dot_dimension_numbers<[1], [0], [0], [1], [0, 0, 1, 1], [], []>} : vector<32x32xf32>, vector<32x32xf32>, vector<32x32xf32> -> vector<32x32xf32>
    %282 = arith.addf %280, %281 : vector<32x32xf32>
    %283 = arith.mulf %279, %20 : vector<32x32xf32>
    %284 = arith.mulf %282, %24 : vector<32x32xf32>
    %285 = arith.subf %283, %284 : vector<32x32xf32>
    %286 = arith.mulf %279, %24 : vector<32x32xf32>
    %287 = arith.mulf %282, %20 : vector<32x32xf32>
    %288 = arith.addf %286, %287 : vector<32x32xf32>
    %289 = arith.mulf %285, %8 : vector<32x32xf32>
    %290 = arith.mulf %288, %8 : vector<32x32xf32>
    %cst_168 = arith.constant dense<0.000000e+00> : vector<32x32xf32>
    %291 = tpu.matmul %0, %289, %cst_168 {dimension_numbers = #tpu.dot_dimension_numbers<[1], [0], [0], [1], [0, 0, 1, 1], [], []>} : vector<32x32xf32>, vector<32x32xf32>, vector<32x32xf32> -> vector<32x32xf32>
    %cst_169 = arith.constant dense<0.000000e+00> : vector<32x32xf32>
    %292 = tpu.matmul %1, %290, %cst_169 {dimension_numbers = #tpu.dot_dimension_numbers<[1], [0], [0], [1], [0, 0, 1, 1], [], []>} : vector<32x32xf32>, vector<32x32xf32>, vector<32x32xf32> -> vector<32x32xf32>
    %293 = arith.subf %291, %292 : vector<32x32xf32>
    %cst_170 = arith.constant dense<0.000000e+00> : vector<32x32xf32>
    %294 = tpu.matmul %0, %290, %cst_170 {dimension_numbers = #tpu.dot_dimension_numbers<[1], [0], [0], [1], [0, 0, 1, 1], [], []>} : vector<32x32xf32>, vector<32x32xf32>, vector<32x32xf32> -> vector<32x32xf32>
    %cst_171 = arith.constant dense<0.000000e+00> : vector<32x32xf32>
    %295 = tpu.matmul %1, %289, %cst_171 {dimension_numbers = #tpu.dot_dimension_numbers<[1], [0], [0], [1], [0, 0, 1, 1], [], []>} : vector<32x32xf32>, vector<32x32xf32>, vector<32x32xf32> -> vector<32x32xf32>
    %296 = arith.addf %294, %295 : vector<32x32xf32>
    %cst_172 = arith.constant dense<0.000000e+00> : vector<32x32xf32>
    %297 = tpu.matmul %293, %2, %cst_172 {dimension_numbers = #tpu.dot_dimension_numbers<[1], [0], [0], [1], [0, 0, 1, 1], [], []>} : vector<32x32xf32>, vector<32x32xf32>, vector<32x32xf32> -> vector<32x32xf32>
    %cst_173 = arith.constant dense<0.000000e+00> : vector<32x32xf32>
    %298 = tpu.matmul %296, %3, %cst_173 {dimension_numbers = #tpu.dot_dimension_numbers<[1], [0], [0], [1], [0, 0, 1, 1], [], []>} : vector<32x32xf32>, vector<32x32xf32>, vector<32x32xf32> -> vector<32x32xf32>
    %299 = arith.subf %297, %298 : vector<32x32xf32>
    %cst_174 = arith.constant dense<0.000000e+00> : vector<32x32xf32>
    %300 = tpu.matmul %293, %3, %cst_174 {dimension_numbers = #tpu.dot_dimension_numbers<[1], [0], [0], [1], [0, 0, 1, 1], [], []>} : vector<32x32xf32>, vector<32x32xf32>, vector<32x32xf32> -> vector<32x32xf32>
    %cst_175 = arith.constant dense<0.000000e+00> : vector<32x32xf32>
    %301 = tpu.matmul %296, %2, %cst_175 {dimension_numbers = #tpu.dot_dimension_numbers<[1], [0], [0], [1], [0, 0, 1, 1], [], []>} : vector<32x32xf32>, vector<32x32xf32>, vector<32x32xf32> -> vector<32x32xf32>
    %302 = arith.addf %300, %301 : vector<32x32xf32>
    %303 = arith.mulf %299, %15 : vector<32x32xf32>
    %304 = arith.mulf %302, %16 : vector<32x32xf32>
    %305 = arith.subf %303, %304 : vector<32x32xf32>
    %306 = arith.mulf %299, %16 : vector<32x32xf32>
    %307 = arith.mulf %302, %15 : vector<32x32xf32>
    %308 = arith.addf %306, %307 : vector<32x32xf32>
    %cst_176 = arith.constant dense<0.000000e+00> : vector<32x32xf32>
    %309 = tpu.matmul %4, %305, %cst_176 {dimension_numbers = #tpu.dot_dimension_numbers<[1], [0], [0], [1], [0, 0, 1, 1], [], []>} : vector<32x32xf32>, vector<32x32xf32>, vector<32x32xf32> -> vector<32x32xf32>
    %cst_177 = arith.constant dense<0.000000e+00> : vector<32x32xf32>
    %310 = tpu.matmul %5, %308, %cst_177 {dimension_numbers = #tpu.dot_dimension_numbers<[1], [0], [0], [1], [0, 0, 1, 1], [], []>} : vector<32x32xf32>, vector<32x32xf32>, vector<32x32xf32> -> vector<32x32xf32>
    %311 = arith.subf %309, %310 : vector<32x32xf32>
    %cst_178 = arith.constant dense<0.000000e+00> : vector<32x32xf32>
    %312 = tpu.matmul %4, %308, %cst_178 {dimension_numbers = #tpu.dot_dimension_numbers<[1], [0], [0], [1], [0, 0, 1, 1], [], []>} : vector<32x32xf32>, vector<32x32xf32>, vector<32x32xf32> -> vector<32x32xf32>
    %cst_179 = arith.constant dense<0.000000e+00> : vector<32x32xf32>
    %313 = tpu.matmul %5, %305, %cst_179 {dimension_numbers = #tpu.dot_dimension_numbers<[1], [0], [0], [1], [0, 0, 1, 1], [], []>} : vector<32x32xf32>, vector<32x32xf32>, vector<32x32xf32> -> vector<32x32xf32>
    %314 = arith.addf %312, %313 : vector<32x32xf32>
    %cst_180 = arith.constant dense<0.000000e+00> : vector<32x32xf32>
    %315 = tpu.matmul %311, %6, %cst_180 {dimension_numbers = #tpu.dot_dimension_numbers<[1], [0], [0], [1], [0, 0, 1, 1], [], []>} : vector<32x32xf32>, vector<32x32xf32>, vector<32x32xf32> -> vector<32x32xf32>
    %cst_181 = arith.constant dense<0.000000e+00> : vector<32x32xf32>
    %316 = tpu.matmul %314, %7, %cst_181 {dimension_numbers = #tpu.dot_dimension_numbers<[1], [0], [0], [1], [0, 0, 1, 1], [], []>} : vector<32x32xf32>, vector<32x32xf32>, vector<32x32xf32> -> vector<32x32xf32>
    %317 = arith.subf %315, %316 : vector<32x32xf32>
    %cst_182 = arith.constant dense<0.000000e+00> : vector<32x32xf32>
    %318 = tpu.matmul %311, %7, %cst_182 {dimension_numbers = #tpu.dot_dimension_numbers<[1], [0], [0], [1], [0, 0, 1, 1], [], []>} : vector<32x32xf32>, vector<32x32xf32>, vector<32x32xf32> -> vector<32x32xf32>
    %cst_183 = arith.constant dense<0.000000e+00> : vector<32x32xf32>
    %319 = tpu.matmul %314, %6, %cst_183 {dimension_numbers = #tpu.dot_dimension_numbers<[1], [0], [0], [1], [0, 0, 1, 1], [], []>} : vector<32x32xf32>, vector<32x32xf32>, vector<32x32xf32> -> vector<32x32xf32>
    %320 = arith.addf %318, %319 : vector<32x32xf32>
    %321 = arith.mulf %317, %317 : vector<32x32xf32>
    %322 = arith.mulf %320, %320 : vector<32x32xf32>
    %323 = arith.addf %321, %322 : vector<32x32xf32>
    %cst_184 = arith.constant dense<0.000000e+00> : vector<16x32xf32>
    %324 = tpu.matmul %9, %323, %cst_184 {dimension_numbers = #tpu.dot_dimension_numbers<[1], [0], [0], [1], [0, 0, 1, 1], [], []>} : vector<16x32xf32>, vector<32x32xf32>, vector<16x32xf32> -> vector<16x32xf32>
    %cst_185 = arith.constant dense<0.000000e+00> : vector<16x16xf32>
    %325 = tpu.matmul %324, %10, %cst_185 {dimension_numbers = #tpu.dot_dimension_numbers<[1], [0], [0], [1], [0, 0, 1, 1], [], []>} : vector<16x32xf32>, vector<32x16xf32>, vector<16x16xf32> -> vector<16x16xf32>
    %326 = arith.mulf %325, %30 : vector<16x16xf32>
    %cst_186 = arith.constant dense<0.000000e+00> : vector<16xf32>
    %327 = vector.multi_reduction <add>, %326, %cst_186 [0] : vector<16x16xf32> to vector<16xf32>
    %328 = vector.shape_cast %327 : vector<16xf32> to vector<1x16xf32>
    %329 = tpu.concatenate %179, %328 in 0 : vector<1x16xf32>, vector<1x16xf32> -> vector<2x16xf32>
    %c0_187 = arith.constant 0 : index
    %c0_188 = arith.constant 0 : index
    %330 = vector.load %arg20[%c0_187, %c0_188] : memref<32x16xf32, #tpu.memory_space<vmem>>, vector<32x16xf32>
    %331 = tpu.concatenate %329, %329, %329, %329, %329, %329, %329, %329, %329, %329, %329, %329, %329, %329, %329, %329 in 0 : vector<2x16xf32>, vector<2x16xf32>, vector<2x16xf32>, vector<2x16xf32>, vector<2x16xf32>, vector<2x16xf32>, vector<2x16xf32>, vector<2x16xf32>, vector<2x16xf32>, vector<2x16xf32>, vector<2x16xf32>, vector<2x16xf32>, vector<2x16xf32>, vector<2x16xf32>, vector<2x16xf32>, vector<2x16xf32> -> vector<32x16xf32>
    %332 = arith.mulf %330, %331 : vector<32x16xf32>
    %cst_189 = arith.constant dense<0.000000e+00> : vector<16xf32>
    %333 = vector.multi_reduction <add>, %329, %cst_189 [0] : vector<2x16xf32> to vector<16xf32>
    %334 = vector.shape_cast %333 : vector<16xf32> to vector<1x16xf32>
    %335 = arith.mulf %329, %329 : vector<2x16xf32>
    %cst_190 = arith.constant dense<0.000000e+00> : vector<16xf32>
    %336 = vector.multi_reduction <add>, %335, %cst_190 [0] : vector<2x16xf32> to vector<16xf32>
    %337 = vector.shape_cast %336 : vector<16xf32> to vector<1x16xf32>
    %338 = vector.broadcast %334 : vector<1x16xf32> to vector<32x16xf32>
    %339 = arith.mulf %330, %338 : vector<32x16xf32>
    %cst_191 = arith.constant dense<0.000000e+00> : vector<32xf32>
    %340 = vector.multi_reduction <add>, %339, %cst_191 [1] : vector<32x16xf32> to vector<32xf32>
    %341 = vector.shape_cast %340 : vector<32xf32> to vector<32x1xf32>
    %cst_192 = arith.constant 3.125000e-02 : f32
    %342 = vector.broadcast %cst_192 : f32 to vector<32x1xf32>
    %343 = arith.mulf %341, %342 : vector<32x1xf32>
    %344 = vector.broadcast %337 : vector<1x16xf32> to vector<32x16xf32>
    %345 = arith.mulf %330, %344 : vector<32x16xf32>
    %cst_193 = arith.constant dense<0.000000e+00> : vector<32xf32>
    %346 = vector.multi_reduction <add>, %345, %cst_193 [1] : vector<32x16xf32> to vector<32xf32>
    %347 = vector.shape_cast %346 : vector<32xf32> to vector<32x1xf32>
    %cst_194 = arith.constant 3.125000e-02 : f32
    %348 = vector.broadcast %cst_194 : f32 to vector<32x1xf32>
    %349 = arith.mulf %347, %348 : vector<32x1xf32>
    %350 = arith.mulf %343, %343 : vector<32x1xf32>
    %351 = arith.subf %349, %350 : vector<32x1xf32>
    %cst_195 = arith.constant 9.99999974E-6 : f32
    %352 = vector.broadcast %cst_195 : f32 to vector<32x1xf32>
    %353 = arith.addf %351, %352 : vector<32x1xf32>
    %354 = math.rsqrt %353 : vector<32x1xf32>
    %355 = vector.broadcast %343 : vector<32x1xf32> to vector<32x16xf32>
    %356 = arith.subf %332, %355 : vector<32x16xf32>
    %357 = vector.broadcast %354 : vector<32x1xf32> to vector<32x16xf32>
    %358 = arith.mulf %356, %357 : vector<32x16xf32>
    %c0_196 = arith.constant 0 : index
    %c0_197 = arith.constant 0 : index
    %359 = vector.load %arg21[%c0_196, %c0_197] : memref<16x32xf32, #tpu.memory_space<vmem>>, vector<16x32xf32>
    %cst_198 = arith.constant dense<0.000000e+00> : vector<32x32xf32>
    %360 = tpu.matmul %358, %359, %cst_198 {dimension_numbers = #tpu.dot_dimension_numbers<[1], [0], [0], [1], [0, 0, 1, 1], [], []>} : vector<32x16xf32>, vector<16x32xf32>, vector<32x32xf32> -> vector<32x32xf32>
    %c0_199 = arith.constant 0 : index
    %c0_200 = arith.constant 0 : index
    %361 = vector.load %arg22[%c0_199, %c0_200] : memref<1x32xf32, #tpu.memory_space<vmem>>, vector<1x32xf32>
    %362 = vector.broadcast %361 : vector<1x32xf32> to vector<32x32xf32>
    %363 = arith.addf %360, %362 : vector<32x32xf32>
    %cst_201 = arith.constant 0.000000e+00 : f32
    %364 = vector.broadcast %cst_201 : f32 to vector<32x32xf32>
    %365 = arith.maximumf %363, %364 : vector<32x32xf32>
    %c0_202 = arith.constant 0 : index
    %c0_203 = arith.constant 0 : index
    %366 = vector.load %arg23[%c0_202, %c0_203] : memref<32x4xf32, #tpu.memory_space<vmem>>, vector<32x4xf32>
    %cst_204 = arith.constant dense<0.000000e+00> : vector<32x4xf32>
    %367 = tpu.matmul %365, %366, %cst_204 {dimension_numbers = #tpu.dot_dimension_numbers<[1], [0], [0], [1], [0, 0, 1, 1], [], []>} : vector<32x32xf32>, vector<32x4xf32>, vector<32x4xf32> -> vector<32x4xf32>
    %c0_205 = arith.constant 0 : index
    %c0_206 = arith.constant 0 : index
    %368 = vector.load %arg24[%c0_205, %c0_206] : memref<1x4xf32, #tpu.memory_space<vmem>>, vector<1x4xf32>
    %369 = vector.broadcast %368 : vector<1x4xf32> to vector<32x4xf32>
    %370 = arith.addf %367, %369 : vector<32x4xf32>
    %cst_207 = arith.constant 1.000000e+00 : f32
    %371 = vector.broadcast %cst_207 : f32 to vector<32x4xf32>
    %372 = arith.mulf %370, %371 : vector<32x4xf32>
    %cst_208 = arith.constant dense<0xFF800000> : vector<32xf32>
    %373 = vector.multi_reduction <maximumf>, %372, %cst_208 [1] : vector<32x4xf32> to vector<32xf32>
    %374 = vector.shape_cast %373 : vector<32xf32> to vector<32x1xf32>
    %375 = vector.broadcast %374 : vector<32x1xf32> to vector<32x4xf32>
    %376 = arith.subf %372, %375 : vector<32x4xf32>
    %377 = math.exp %376 : vector<32x4xf32>
    %cst_209 = arith.constant dense<0.000000e+00> : vector<32xf32>
    %378 = vector.multi_reduction <add>, %377, %cst_209 [1] : vector<32x4xf32> to vector<32xf32>
    %379 = vector.shape_cast %378 : vector<32xf32> to vector<32x1xf32>
    %380 = vector.broadcast %379 : vector<32x1xf32> to vector<32x4xf32>
    %381 = arith.divf %377, %380 : vector<32x4xf32>
    %c0_210 = arith.constant 0 : index
    %c0_211 = arith.constant 0 : index
    %382 = vector.load %arg25[%c0_210, %c0_211] : memref<32x4xf32, #tpu.memory_space<vmem>>, vector<32x4xf32>
    tpu.vector_store %arg25[%c0_210, %c0_211], %381 {strides = array<i32>} : memref<32x4xf32, #tpu.memory_space<vmem>>, vector<32x4xf32>,
    return
  }
}

</mosaic_0001>

<bundles_post_ra>
// kernel: forward.1
= control target key start
LH: loop header
LB: loop body
LE: loop exit
PB: predicated region body
PF: predicated region fallthrough
CT: control target
= control target key end

     0   :  { %vm177_vm0 = vcmask 261120   ;;  %v19512_v0 = vmov 0.0   ;;  %vm6266_vm3 = vcmask 130048   ;;  %vm12239_vm4 = vcmask 1040384   ;;  %s19475_s2 = inlined_call_operand.vmem [shape: f32[32,32], index: 2, kind: input, shape index: {}]   ;;  %s19476_s0 = inlined_call_operand.vmem [shape: f32[2,32,32], index: 0, kind: input, shape index: {}]   ;;  %s19477_s1 = inlined_call_operand.vmem [shape: f32[32,32], index: 1, kind: input, shape index: {}]   ;;  %s19478_s3 = inlined_call_operand.vmem [shape: f32[32,32], index: 3, kind: input, shape index: {}]   ;;  %s19479_s4 = inlined_call_operand.vmem [shape: f32[32,32], index: 4, kind: input, shape index: {}]   ;;  %s19480_s5 = inlined_call_operand.vmem [shape: f32[32,32], index: 5, kind: input, shape index: {}]   ;;  %s19481_s6 = inlined_call_operand.vmem [shape: f32[32,32], index: 6, kind: input, shape index: {}]   ;;  %s19482_s9 = inlined_call_operand.vmem [shape: f32[32,32], index: 9, kind: input, shape index: {}]   ;;  %s19483_s10 = inlined_call_operand.vmem [shape: f32[32,32], index: 10, kind: input, shape index: {}]   ;;  %s19484_s7 = inlined_call_operand.vmem [shape: f32[32,32], index: 7, kind: input, shape index: {}]   ;;  %s19485_s8 = inlined_call_operand.vmem [shape: f32[32,32], index: 8, kind: input, shape index: {}]   ;;  %s19486_s17 = inlined_call_operand.vmem [shape: f32[32,32], index: 17, kind: input, shape index: {}]   ;;  %s19487_s11 = inlined_call_operand.vmem [shape: f32[32,32], index: 11, kind: input, shape index: {}]   ;;  %s19488_s12 = inlined_call_operand.vmem [shape: f32[32,32], index: 12, kind: input, shape index: {}]   ;;  %s19489_s15 = inlined_call_operand.vmem [shape: f32[2,32,32], index: 15, kind: input, shape index: {}]   ;;  %s19490_s16 = inlined_call_operand.vmem [shape: f32[2,32,32], index: 16, kind: input, shape index: {}]   ;;  %s19491_s13 = inlined_call_operand.vmem [shape: f32[32,32], index: 13, kind: input, shape index: {}]   ;;  %s19492_s14 = inlined_call_operand.vmem [shape: f32[32,32], index: 14, kind: input, shape index: {}]   ;;  %s19493_s18 = inlined_call_operand.vmem [shape: f32[16,32], index: 18, kind: input, shape index: {}]   ;;  %s19494_s19 = inlined_call_operand.vmem [shape: f32[32,16], index: 19, kind: input, shape index: {}]   ;;  %s19495_s20 = inlined_call_operand.vmem [shape: f32[32,16], index: 20, kind: input, shape index: {}]   ;;  %s19496_s21 = inlined_call_operand.vmem [shape: f32[16,32], index: 21, kind: input, shape index: {}]   ;;  %s19497_s23 = inlined_call_operand.vmem [shape: f32[32,4], index: 23, kind: input, shape index: {}]   ;;  %s19498_s22 = inlined_call_operand.vmem [shape: f32[1,32], index: 22, kind: input, shape index: {}]   ;;  %s19499_s24 = inlined_call_operand.vmem [shape: f32[1,4], index: 24, kind: input, shape index: {}]   ;;  %s19500_s25 = inlined_call_operand.vmem [shape: f32[32,4], index: 25, kind: output, shape index: {}]  }
   0x1   :  { %19525 = sst [smem:[#allocation9_spill]] %s19475_s2  ;;  %14210 = vmatprep.subr.mxu1 %v19512_v0  ;;  %vm12262_vm5 = vcmask 123904   ;;  %vm12252_vm6 = vcmask 1041408   ;;  %vm12254_vm7 = vcmask 1043456   ;;  %vm12256_vm8 = vcmask 1045504  }
   0x2   :  { %19526 = sst [smem:[#allocation10_spill]] %s19476_s0  ;;  %14211 = vmatpush3.msra.mxu1 %v19512_v0  ;;  %vm12560_vm9 = vcmask 31744  }
   0x3   :  { %19527 = sst [smem:[#allocation11_spill]] %s19477_s1  ;;  %s19537_s0 = sld [smem:[#allocation10_spill]] }
   0x4   :  { %19528 = sst [smem:[#allocation12_spill]] %s19478_s3 }
   0x5   :  { %19529 = sst [smem:[#allocation13_spill]] %s19479_s4  ;;  %s19539_s2 = sld [smem:[#allocation12_spill]] }
   0x6   :  { %19530 = sst [smem:[#allocation14_spill]] %s19480_s5  ;;  %s19540_s5 = sld [smem:[#allocation13_spill]] }
   0x7   :  { %19531 = sst [smem:[#allocation15_spill]] %s19481_s6  ;;  %s19536_s6 = sld [smem:[#allocation9_spill]] }
   0x8   :  { %19532 = sst [smem:[#allocation16_spill]] %s19482_s9  ;;  %s19538_s9 = sld [smem:[#allocation11_spill]] }
   0x9   :  { %19533 = sst [smem:[#allocation17_spill]] %s19483_s10  ;;  %v173_v3 = vld [vmem:[%s19537_s0] sm:$0xff]  ;;  %v174_v4 = vld [vmem:[%s19537_s0 + $0x8] sm:$0xff]  ;;  %v175_v7 = vld [vmem:[%s19537_s0 + $0x10] sm:$0xff]  ;;  %s19541_s4 = sld [smem:[#allocation14_spill]] }
   0xa   :  { %19534 = sst [smem:[#allocation18_spill]] %s19484_s7  ;;  %v16024_v6 = vpack.c.bf16 %v174_v4, %v173_v3  ;;  %v176_v8 = vld [vmem:[%s19537_s0 + $0x18] sm:$0xff]  ;;  %s19544_s26 = sld [smem:[#allocation17_spill]] }
   0xb   :  { %19535 = sst [smem:[#allocation19_spill]] %s19500_s25  ;;  %v16028_v11 = vpack.c.bf16 %v176_v8, %v175_v7  ;;  %v88_v15 = vld [vmem:[%s19539_s2] sm:$0xff]  ;;  %v89_v16 = vld [vmem:[%s19539_s2 + $0x8] sm:$0xff]  ;;  %v90_v18 = vld [vmem:[%s19539_s2 + $0x10] sm:$0xff]  ;;  %s19545_s28 = sld [smem:[#allocation18_spill]] }
   0xc   :  { %16025 = vmatprep.subr.bf16.mxu0 %v16024_v6  ;;  %16033 = vmatprep.subr.bf16.mxu1 %v16024_v6  ;;  %v17536_v17 = vpack.c.bf16 %v89_v16, %v88_v15  ;;  %v91_v19 = vld [vmem:[%s19539_s2 + $0x18] sm:$0xff]  ;;  %v92_v21 = vld [vmem:[%s19540_s5] sm:$0xff]  ;;  %v93_v22 = vld [vmem:[%s19540_s5 + $0x8] sm:$0xff]  ;;  %s19543_s2 = sld [smem:[#allocation16_spill]]  ;;  %s19561_s30 = sld [smem:[#allocation19_spill]] }
   0xd   :  { %v17446_v1 = vld [vmem:[%s19536_s6] sm:$0xff]  ;;  %v17451_v2 = vld [vmem:[%s19536_s6 + $0x8] sm:$0xff]  ;;  %v17465_v5 = vld [vmem:[%s19536_s6 + $0x10] sm:$0xff]  ;;  %16027 = vmatpush3.bf16.msra.mxu0 %v16024_v6  ;;  %v17548_v20 = vpack.c.bf16 %v91_v19, %v90_v18  ;;  %v17560_v23 = vpack.c.bf16 %v93_v22, %v92_v21 }
   0xe   :  { %14212 = vmatprep.mubr.msk.f32.mxu1 %vm177_vm0, %v17446_v1  ;;  %v17478_v9 = vld [vmem:[%s19538_s9] sm:$0xff]  ;;  %v17485_v10 = vld [vmem:[%s19536_s6 + $0x18] sm:$0xff]  ;;  %16029 = vmatprep.subr.bf16.mxu0 %v16028_v11  ;;  %v17496_v12 = vld [vmem:[%s19538_s9 + $0x8] sm:$0xff] }
   0xf   :  { %14213 = vmatmul.mubr.msk.f32.vlgmr.msra.gmra.mrb[0].mxu1 %vm177_vm0, %v17451_v2  ;;  %14204 = vmatprep.mubr.msk.f32.mxu0 %vm177_vm0, %v17478_v9  ;;  %v17502_v13 = vld [vmem:[%s19538_s9 + $0x10] sm:$0xff]  ;;  %v17514_v14 = vld [vmem:[%s19538_s9 + $0x18] sm:$0xff]  ;;  %v17609_v43 = vld [vmem:[%s19541_s4] sm:$0xff] }
  0x10   :  { %14215 = vmatprep.mubr.msk.f32.mxu1 %vm177_vm0, %v17465_v5  ;;  %16035 = vmatpush3.bf16.msra.mxu1 %v16024_v6  ;;  %v94_v29 = vld [vmem:[%s19540_s5 + $0x10] sm:$0xff]  ;;  %v95_v30 = vld [vmem:[%s19540_s5 + $0x18] sm:$0xff]  ;;  %s19542_s5 = sld [smem:[#allocation15_spill]]  ;;  %v127_v54 = vld [vmem:[%s19544_s26 + $0x8] sm:$0xff] }
  0x11   :  { %16037 = vmatprep.subr.bf16.mxu1 %v16028_v11  ;;  %16031 = vmatpush3.bf16.msra.mxu0 %v16028_v11  ;;  %v17580_v34 = vpack.c.bf16 %v95_v30, %v94_v29  ;;  %v126_v57 = vld [vmem:[%s19544_s26] sm:$0xff]  ;;  %v129_v4 = vld [vmem:[%s19544_s26 + $0x18] sm:$0xff]  ;;  %v128_v18 = vld [vmem:[%s19544_s26 + $0x10] sm:$0xff] }
  0x12   :  { %16041 = vmatprep.subr.bf16.mxu0 %v17536_v17  ;;  %v123_v53 = vld [vmem:[%s19543_s2 + $0x8] sm:$0xff]  ;;  %v122_v56 = vld [vmem:[%s19543_s2] sm:$0xff]  ;;  %v125_v3 = vld [vmem:[%s19543_s2 + $0x18] sm:$0xff] }
  0x13   :  { %14216 = vmatmul.mubr.msk.f32.gmra.mrb[2].mxu1 %vm177_vm0, %v17485_v10  ;;  %v124_v16 = vld [vmem:[%s19543_s2 + $0x10] sm:$0xff] }
  0x14   :  { %14226 = vmatprep.mubr.msk.f32.mxu1 %vm177_vm0, %v17446_v1  ;;  %16039 = vmatpush3.bf16.msra.mxu1 %v16028_v11 }
  0x15   :  { %14232 = vmatprep.subr.mxu1 %v19512_v0  ;;  %14205 = vmatmul.mubr.msk.f32.vlgmr.msra.gmra.mrb[0].mxu0 %vm177_vm0, %v17496_v12 }
  0x16   :  { %14207 = vmatprep.mubr.msk.f32.mxu0 %vm177_vm0, %v17502_v13  ;;  %16043 = vmatpush3.bf16.msra.mxu0 %v17536_v17  ;;  %v17614_v44 = vld [vmem:[%s19542_s5] sm:$0xff] }
  0x17   :  { %14227 = vmatmul.mubr.msk.f32.vlgmr.msra.gmra.mrb[4].mxu1 %vm177_vm0, %v17451_v2  ;;  %16045 = vmatprep.subr.bf16.mxu0 %v17548_v20 }
  0x18   :  { %14233 = vmatpush3.msra.mxu1 %v19512_v0  ;;  %14229 = vmatprep.mubr.msk.f32.mxu1 %vm177_vm0, %v17465_v5 }
  0x19   :  { %14208 = vmatmul.mubr.msk.f32.gmra.mrb[2].mxu0 %vm177_vm0, %v17514_v14  ;;  %16057 = vmatprep.subr.bf16.mxu1 %v17536_v17 }
  0x1a   :  { %16047 = vmatpush3.bf16.msra.mxu0 %v17548_v20 }
  0x1b   :  { %14230 = vmatmul.mubr.msk.f32.gmra.mrb[6].mxu1 %vm177_vm0, %v17485_v10  ;;  %16049 = vmatprep.subr.bf16.mxu0 %v17560_v23 }
  0x1c   :  { %14234 = vmatprep.mubr.msk.f32.mxu1 %vm177_vm0, %v17478_v9 }
  0x1f   :  { %14235 = vmatmul.mubr.msk.f32.vlgmr.msra.gmra.mrb[4].mxu1 %vm177_vm0, %v17496_v12 }
  0x20   :  { %14237 = vmatprep.mubr.msk.f32.mxu1 %vm177_vm0, %v17502_v13  ;;  %16059 = vmatpush3.bf16.msra.mxu1 %v17536_v17 }
  0x21   :  { %16061 = vmatprep.subr.bf16.mxu1 %v17548_v20 }
  0x23   :  { %14238 = vmatmul.mubr.msk.f32.gmra.mrb[6].mxu1 %vm177_vm0, %v17514_v14 }
  0x24   :  { %16063 = vmatpush3.bf16.msra.mxu1 %v17548_v20 }
  0x25   :  { %16065 = vmatprep.subr.bf16.mxu1 %v17560_v23 }
  0xe2   :  { %v17564_v24 = vpop.f32.mrb[0].mxu1 }
  0xe3   :  { %v17566_v25 = vpop.f32.mrb[1].mxu1 }
  0xe6   :  { %v17568_v26 = vpop.f32.mrb[2].mxu1 }
  0xe7   :  { %v17570_v27 = vpop.f32.mrb[3].mxu1 }
  0xe8   :  { %v14206_v28 = vpop.f32.mrb[0].mxu0 }
  0xe9   :  { %v373_v31 = vsub.f32 %v14206_v28, %v17564_v24  ;;  %v256_v32 = vpop.f32.mrb[1].mxu0 }
  0xea   :  { %v372_v33 = vsub.f32 %v256_v32, %v17566_v25 }
  0xec   :  { %v14209_v35 = vpop.f32.mrb[2].mxu0  ;;  %14248 = vmatprep.mubr.msk.f32.mxu0 %vm177_vm0, %v372_v33 }
  0xed   :  { %v375_v36 = vsub.f32 %v14209_v35, %v17568_v26  ;;  %v266_v37 = vpop.f32.mrb[3].mxu0  ;;  %14249 = vmatmul.mubr.msk.f32.vlgmr.msra.gmra.mrb[4].mxu0 %vm177_vm0, %v373_v31 }
  0xee   :  { %v374_v38 = vsub.f32 %v266_v37, %v17570_v27  ;;  %16051 = vmatpush3.bf16.msra.mxu0 %v17560_v23 }
  0xef   :  { %16053 = vmatprep.subr.bf16.mxu0 %v17580_v34 }
  0xf0   :  { %14251 = vmatprep.mubr.msk.f32.mxu0 %vm177_vm0, %v374_v38 }
  0xf1   :  { %14252 = vmatmul.mubr.msk.f32.gmra.mrb[6].mxu0 %vm177_vm0, %v375_v36 }
  0xf2   :  { %v14236_v39 = vpop.f32.mrb[4].mxu1  ;;  %16055 = vmatpush3.bf16.msra.mxu0 %v17580_v34 }
  0xf3   :  { %v527_v40 = vpop.f32.mrb[5].mxu1 }
  0xf4   :  { %14262 = vmatprep.mubr.msk.f32.mxu0 %vm177_vm0, %v527_v40  ;;  %14276 = vmatprep.mubr.msk.f32.mxu1 %vm177_vm0, %v527_v40 }
  0xf5   :  { %14277 = vmatmul.mubr.msk.f32.vlgmr.msra.gmra.mrb[8].mxu1 %vm177_vm0, %v14236_v39  ;;  %14263 = vmatmul.mubr.msk.f32.vlgmr.msra.gmra.mrb[8].mxu0 %vm177_vm0, %v14236_v39 }
  0xf6   :  { %v14239_v41 = vpop.f32.mrb[6].mxu1  ;;  %16067 = vmatpush3.bf16.msra.mxu1 %v17560_v23 }
  0xf7   :  { %v537_v42 = vpop.f32.mrb[7].mxu1  ;;  %16069 = vmatprep.subr.bf16.mxu1 %v17580_v34 }
  0xf8   :  { %14265 = vmatprep.mubr.msk.f32.mxu0 %vm177_vm0, %v537_v42  ;;  %14279 = vmatprep.mubr.msk.f32.mxu1 %vm177_vm0, %v537_v42 }
  0xf9   :  { %14280 = vmatmul.mubr.msk.f32.gmra.mrb[10].mxu1 %vm177_vm0, %v14239_v41  ;;  %14266 = vmatmul.mubr.msk.f32.gmra.mrb[10].mxu0 %vm177_vm0, %v14239_v41 }
  0xfa   :  { %16071 = vmatpush3.bf16.msra.mxu1 %v17580_v34  ;;  %14290 = vmatprep.mubr.msk.f32.mxu1 %vm177_vm0, %v372_v33 }
  0xfb   :  { %14304 = vmatprep.mubr.msk.f32.mxu0 %vm177_vm0, %v17609_v43 }
  0xfd   :  { %14291 = vmatmul.mubr.msk.f32.vlgmr.msra.gmra.mrb[8].mxu1 %vm177_vm0, %v373_v31 }
  0xfe   :  { %14293 = vmatprep.mubr.msk.f32.mxu1 %vm177_vm0, %v374_v38 }
 0x101   :  { %14294 = vmatmul.mubr.msk.f32.gmra.mrb[10].mxu1 %vm177_vm0, %v375_v36 }
 0x102   :  { %14332 = vmatprep.mubr.msk.f32.mxu1 %vm177_vm0, %v17614_v44 }
 0x1c0   :  { %v14250_v45 = vpop.f32.mrb[4].mxu0 }
 0x1c1   :  { %v624_v46 = vpop.f32.mrb[5].mxu0 }
 0x1c4   :  { %v14253_v47 = vpop.f32.mrb[6].mxu0 }
 0x1c5   :  { %v634_v48 = vpop.f32.mrb[7].mxu0 }
 0x1c8   :  { %v14264_v49 = vpop.f32.mrb[8].mxu0 }
 0x1c9   :  { %v741_v50 = vsub.f32 %v14250_v45, %v14264_v49  ;;  %v721_v51 = vpop.f32.mrb[9].mxu0 }
 0x1ca   :  { %v740_v52 = vsub.f32 %v624_v46, %v721_v51 }
 0x1cb   :  { %v915_v62 = vmul.f32 %v741_v50, %v123_v53  ;;  %v927_v63 = vmul.f32 %v741_v50, %v127_v54 }
 0x1cc   :  { %v14267_v55 = vpop.f32.mrb[10].mxu0  ;;  %v914_v11 = vmul.f32 %v740_v52, %v122_v56  ;;  %v926_v15 = vmul.f32 %v740_v52, %v126_v57  ;;  %v17647_v52 = vld [vmem:[%s19541_s4 + $0x8] sm:$0xff] }
 0x1cd   :  { %v743_v58 = vsub.f32 %v14253_v47, %v14267_v55  ;;  %v731_v59 = vpop.f32.mrb[11].mxu0  ;;  %v17666_v55 = vld [vmem:[%s19542_s5 + $0x10] sm:$0xff] }
 0x1ce   :  { %v742_v60 = vsub.f32 %v634_v48, %v731_v59  ;;  %v105_v59 = vld [vmem:[%s19545_s28 + $0x8] sm:$0xff] }
 0x1cf   :  { %v917_v29 = vmul.f32 %v743_v58, %v125_v3  ;;  %v929_v30 = vmul.f32 %v743_v58, %v129_v4  ;;  %v104_v58 = vld [vmem:[%s19545_s28] sm:$0xff] }
 0x1d0   :  { %v14292_v61 = vpop.f32.mrb[8].mxu1  ;;  %v916_v35 = vmul.f32 %v742_v60, %v124_v16  ;;  %v928_v36 = vmul.f32 %v742_v60, %v128_v18  ;;  %v17708_v60 = vpack.c.bf16 %v105_v59, %v104_v58  ;;  %v17785_v58 = vld [vmem:[%s19486_s17 + $0x18] sm:$0xff] }
 0x1d1   :  { %v919_v6 = vmul.f32 %v14292_v61, %v127_v54  ;;  %v931_v7 = vmul.f32 %v14292_v61, %v123_v53  ;;  %v895_v8 = vpop.f32.mrb[9].mxu1  ;;  %v17652_v53 = vld [vmem:[%s19542_s5 + $0x8] sm:$0xff]  ;;  %v17661_v54 = vld [vmem:[%s19541_s4 + $0x10] sm:$0xff] }
 0x1d2   :  { %v918_v19 = vmul.f32 %v895_v8, %v126_v57  ;;  %v930_v21 = vmul.f32 %v895_v8, %v122_v56  ;;  %v17671_v56 = vld [vmem:[%s19541_s4 + $0x18] sm:$0xff]  ;;  %v106_v61 = vld [vmem:[%s19545_s28 + $0x10] sm:$0xff] }
 0x1d3   :  { %v923_v22 = vsub.f32 %v915_v62, %v919_v6  ;;  %v935_v28 = vadd.f32 %v931_v7, %v927_v63  ;;  %v17676_v57 = vld [vmem:[%s19542_s5 + $0x18] sm:$0xff] }
 0x1d4   :  { %v922_v31 = vsub.f32 %v914_v11, %v918_v19  ;;  %v934_v32 = vadd.f32 %v930_v21, %v926_v15  ;;  %v14295_v33 = vpop.f32.mrb[10].mxu1  ;;  %v107_v62 = vld [vmem:[%s19545_s28 + $0x18] sm:$0xff] }
 0x1d5   :  { %v921_v37 = vmul.f32 %v14295_v33, %v129_v4  ;;  %v933_v38 = vmul.f32 %v14295_v33, %v125_v3  ;;  %v905_v39 = vpop.f32.mrb[11].mxu1  ;;  %v17720_v63 = vpack.c.bf16 %v107_v62, %v106_v61  ;;  %v108_v3 = vld [vmem:[%s19485_s8] sm:$0xff]  ;;  %v109_v4 = vld [vmem:[%s19485_s8 + $0x8] sm:$0xff]  ;;  %v17790_v62 = vld [vmem:[%s19486_s17 + $0x10] sm:$0xff] }
 0x1d6   :  { %v16072_v40 = vpack.c.bf16 %v923_v22, %v922_v31  ;;  %v16080_v41 = vpack.c.bf16 %v935_v28, %v934_v32  ;;  %v920_v42 = vmul.f32 %v905_v39, %v128_v18  ;;  %v932_v45 = vmul.f32 %v905_v39, %v124_v16  ;;  %v110_v16 = vld [vmem:[%s19485_s8 + $0x10] sm:$0xff]  ;;  %v111_v18 = vld [vmem:[%s19485_s8 + $0x18] sm:$0xff] }
 0x1d7   :  { %v925_v46 = vsub.f32 %v917_v29, %v921_v37  ;;  %v937_v47 = vadd.f32 %v933_v38, %v929_v30  ;;  %v17732_v6 = vpack.c.bf16 %v109_v4, %v108_v3  ;;  %v17742_v30 = vpack.c.bf16 %v111_v18, %v110_v16 }
 0x1d8   :  { %v924_v48 = vsub.f32 %v916_v35, %v920_v42  ;;  %v936_v49 = vadd.f32 %v932_v45, %v928_v36  ;;  %16073 = vmatprep.subr.bf16.mxu0 %v16072_v40  ;;  %16089 = vmatprep.subr.bf16.mxu1 %v16072_v40  ;;  %v17773_v42 = vld [vmem:[%s19486_s17 + $0x8] sm:$0xff] }
 0x1d9   :  { %16075 = vmatpush3.bf16.msra.mxu0 %v16072_v40  ;;  %16091 = vmatpush3.bf16.msra.mxu1 %v16072_v40  ;;  %19546 = vst [vmem:[#allocation2_spill] sm:$0xff] %v17742_v30 }
 0x1da   :  { %v16076_v50 = vpack.c.bf16 %v925_v46, %v924_v48  ;;  %v16084_v51 = vpack.c.bf16 %v937_v47, %v936_v49  ;;  %v17778_v46 = vld [vmem:[%s19486_s17] sm:$0xff] }
 0x1dc   :  { %16077 = vmatprep.subr.bf16.mxu0 %v16076_v50  ;;  %16093 = vmatprep.subr.bf16.mxu1 %v16076_v50 }
 0x1dd   :  { %16079 = vmatpush3.bf16.msra.mxu0 %v16076_v50  ;;  %16095 = vmatpush3.bf16.msra.mxu1 %v16076_v50 }
 0x1de   :  { %16081 = vmatprep.subr.bf16.mxu0 %v16080_v41  ;;  %16097 = vmatprep.subr.bf16.mxu1 %v16080_v41 }
 0x1e0   :  { %14305 = vmatmul.mubr.msk.f32.vlgmr.msra.gmra.mrb[12].mxu0 %vm177_vm0, %v17647_v52  ;;  %14333 = vmatmul.mubr.msk.f32.vlgmr.msra.gmra.mrb[12].mxu1 %vm177_vm0, %v17652_v53 }
 0x1e1   :  { %16083 = vmatpush3.bf16.msra.mxu0 %v16080_v41  ;;  %16099 = vmatpush3.bf16.msra.mxu1 %v16080_v41 }
 0x1e2   :  { %16085 = vmatprep.subr.bf16.mxu0 %v16084_v51  ;;  %16101 = vmatprep.subr.bf16.mxu1 %v16084_v51 }
 0x1e3   :  { %14307 = vmatprep.mubr.msk.f32.mxu0 %vm177_vm0, %v17661_v54  ;;  %14335 = vmatprep.mubr.msk.f32.mxu1 %vm177_vm0, %v17666_v55 }
 0x1e4   :  { %14308 = vmatmul.mubr.msk.f32.gmra.mrb[14].mxu0 %vm177_vm0, %v17671_v56  ;;  %14336 = vmatmul.mubr.msk.f32.gmra.mrb[14].mxu1 %vm177_vm0, %v17676_v57 }
 0x1e5   :  { %16087 = vmatpush3.bf16.msra.mxu0 %v16084_v51  ;;  %16103 = vmatpush3.bf16.msra.mxu1 %v16084_v51 }
 0x1e6   :  { %14318 = vmatprep.mubr.msk.f32.mxu0 %vm177_vm0, %v17614_v44  ;;  %14346 = vmatprep.mubr.msk.f32.mxu1 %vm177_vm0, %v17609_v43 }
 0x1e7   :  { %16121 = vmatprep.subr.bf16.mxu1 %v17708_v60  ;;  %16105 = vmatprep.subr.bf16.mxu0 %v17708_v60 }
 0x1e8   :  { %14319 = vmatmul.mubr.msk.f32.vlgmr.msra.gmra.mrb[16].mxu0 %vm177_vm0, %v17652_v53  ;;  %14347 = vmatmul.mubr.msk.f32.vlgmr.msra.gmra.mrb[12].mxu1 %vm177_vm0, %v17647_v52 }
 0x1e9   :  { %14321 = vmatprep.mubr.msk.f32.mxu0 %vm177_vm0, %v17666_v55  ;;  %14349 = vmatprep.mubr.msk.f32.mxu1 %vm177_vm0, %v17661_v54 }
 0x1ea   :  { %16123 = vmatpush3.bf16.msra.mxu1 %v17708_v60  ;;  %16107 = vmatpush3.bf16.msra.mxu0 %v17708_v60 }
 0x1eb   :  { %16125 = vmatprep.subr.bf16.mxu1 %v17720_v63  ;;  %16109 = vmatprep.subr.bf16.mxu0 %v17720_v63 }
 0x1ec   :  { %14322 = vmatmul.mubr.msk.f32.gmra.mrb[18].mxu0 %vm177_vm0, %v17676_v57  ;;  %14350 = vmatmul.mubr.msk.f32.gmra.mrb[14].mxu1 %vm177_vm0, %v17671_v56 }
 0x1ee   :  { %16127 = vmatpush3.bf16.msra.mxu1 %v17720_v63  ;;  %16111 = vmatpush3.bf16.msra.mxu0 %v17720_v63 }
 0x1ef   :  { %16129 = vmatprep.subr.bf16.mxu1 %v17732_v6  ;;  %16113 = vmatprep.subr.bf16.mxu0 %v17732_v6 }
 0x2b3   :  { %v14306_v7 = vpop.f32.mrb[12].mxu0 }
 0x2b4   :  { %v1016_v8 = vpop.f32.mrb[13].mxu0 }
 0x2b7   :  { %v14309_v11 = vpop.f32.mrb[14].mxu0 }
 0x2b8   :  { %v1026_v15 = vpop.f32.mrb[15].mxu0 }
 0x2bb   :  { %v14320_v19 = vpop.f32.mrb[16].mxu0  ;;  %v14348_v21 = vpop.f32.mrb[12].mxu1 }
 0x2bc   :  { %v1133_v22 = vsub.f32 %v14306_v7, %v14320_v19  ;;  %v1113_v28 = vpop.f32.mrb[17].mxu0  ;;  %v1287_v29 = vpop.f32.mrb[13].mxu1 }
 0x2bd   :  { %v1132_v31 = vsub.f32 %v1016_v8, %v1113_v28  ;;  %14388 = vmatprep.mubr.msk.f32.mxu1 %vm177_vm0, %v1287_v29 }
 0x2be   :  { %14389 = vmatmul.mubr.msk.f32.vlgmr.msra.gmra.mrb[16].mxu1 %vm177_vm0, %v14348_v21 }
 0x2bf   :  { %v14323_v32 = vpop.f32.mrb[18].mxu0  ;;  %v14351_v33 = vpop.f32.mrb[14].mxu1  ;;  %14360 = vmatprep.mubr.msk.f32.mxu0 %vm177_vm0, %v1132_v31  ;;  %16131 = vmatpush3.bf16.msra.mxu1 %v17732_v6 }
 0x2c0   :  { %v1135_v35 = vsub.f32 %v14309_v11, %v14323_v32  ;;  %v1123_v36 = vpop.f32.mrb[19].mxu0  ;;  %v1297_v37 = vpop.f32.mrb[15].mxu1  ;;  %14361 = vmatmul.mubr.msk.f32.vlgmr.msra.gmra.mrb[20].mxu0 %vm177_vm0, %v1133_v22  ;;  %16133 = vmatprep.subr.bf16.mxu1 %v17742_v30 }
 0x2c1   :  { %v1134_v38 = vsub.f32 %v1026_v15, %v1123_v36  ;;  %16115 = vmatpush3.bf16.msra.mxu0 %v17732_v6  ;;  %14391 = vmatprep.mubr.msk.f32.mxu1 %vm177_vm0, %v1297_v37 }
 0x2c2   :  { %14392 = vmatmul.mubr.msk.f32.gmra.mrb[18].mxu1 %vm177_vm0, %v14351_v33  ;;  %16117 = vmatprep.subr.bf16.mxu0 %v17742_v30 }
 0x2c3   :  { %14363 = vmatprep.mubr.msk.f32.mxu0 %vm177_vm0, %v1134_v38  ;;  %16135 = vmatpush3.bf16.msra.mxu1 %v17742_v30 }
 0x2c4   :  { %14402 = vmatprep.mubr.msk.f32.mxu1 %vm177_vm0, %v1132_v31  ;;  %14364 = vmatmul.mubr.msk.f32.gmra.mrb[22].mxu0 %vm177_vm0, %v1135_v35 }
 0x2c5   :  { %16119 = vmatpush3.bf16.msra.mxu0 %v17742_v30  ;;  %14374 = vmatprep.mubr.msk.f32.mxu0 %vm177_vm0, %v1287_v29 }
 0x2c6   :  { %14403 = vmatmul.mubr.msk.f32.vlgmr.msra.gmra.mrb[16].mxu1 %vm177_vm0, %v1133_v22 }
 0x2c7   :  { %14405 = vmatprep.mubr.msk.f32.mxu1 %vm177_vm0, %v1134_v38 }
 0x2c8   :  { %14375 = vmatmul.mubr.msk.f32.vlgmr.msra.gmra.mrb[24].mxu0 %vm177_vm0, %v14348_v21 }
 0x2c9   :  { %14377 = vmatprep.mubr.msk.f32.mxu0 %vm177_vm0, %v1297_v37 }
 0x2ca   :  { %14406 = vmatmul.mubr.msk.f32.gmra.mrb[18].mxu1 %vm177_vm0, %v1135_v35 }
 0x2cb   :  { %14444 = vmatprep.mubr.msk.f32.mxu1 %vm177_vm0, %v17446_v1 }
 0x2cc   :  { %14378 = vmatmul.mubr.msk.f32.gmra.mrb[26].mxu0 %vm177_vm0, %v14351_v33 }
 0x2cd   :  { %14416 = vmatprep.mubr.msk.f32.mxu0 %vm177_vm0, %v17478_v9 }
 0x393   :  { %v14362_v39 = vpop.f32.mrb[20].mxu0 }
 0x394   :  { %v1384_v40 = vpop.f32.mrb[21].mxu0 }
 0x397   :  { %v14365_v41 = vpop.f32.mrb[22].mxu0 }
 0x398   :  { %v1394_v45 = vpop.f32.mrb[23].mxu0 }
 0x399   :  { %v14404_v47 = vpop.f32.mrb[16].mxu1 }
 0x39a   :  { %v1679_v48 = vmul.f32 %v14404_v47, %v17773_v42  ;;  %v1655_v49 = vpop.f32.mrb[17].mxu1 }
 0x39b   :  { %v1678_v50 = vmul.f32 %v1655_v49, %v17778_v46  ;;  %v14376_v51 = vpop.f32.mrb[24].mxu0 }
 0x39c   :  { %v1501_v59 = vsub.f32 %v14362_v39, %v14376_v51  ;;  %v1481_v61 = vpop.f32.mrb[25].mxu0 }
 0x39d   :  { %v16144_v3 = vpack.c.bf16 %v1679_v48, %v1678_v50  ;;  %v1500_v4 = vsub.f32 %v1384_v40, %v1481_v61  ;;  %v14407_v7 = vpop.f32.mrb[18].mxu1 }
 0x39e   :  { %v1675_v8 = vmul.f32 %v1501_v59, %v17773_v42  ;;  %v1681_v11 = vmul.f32 %v14407_v7, %v17785_v58  ;;  %v1665_v15 = vpop.f32.mrb[19].mxu1  ;;  %v17865_v7 = vld [vmem:[%s19487_s11 + $0x8] sm:$0xff] }
 0x39f   :  { %v1674_v16 = vmul.f32 %v1500_v4, %v17778_v46  ;;  %v1680_v18 = vmul.f32 %v1665_v15, %v17790_v62  ;;  %v14379_v19 = vpop.f32.mrb[26].mxu0  ;;  %v17875_v15 = vld [vmem:[%s19487_s11] sm:$0xff] }
 0x3a0   :  { %v1503_v21 = vsub.f32 %v14365_v41, %v14379_v19  ;;  %v1491_v22 = vpop.f32.mrb[27].mxu0 }
 0x3a1   :  { %v16136_v28 = vpack.c.bf16 %v1675_v8, %v1674_v16  ;;  %v16148_v29 = vpack.c.bf16 %v1681_v11, %v1680_v18  ;;  %v1502_v31 = vsub.f32 %v1394_v45, %v1491_v22  ;;  %v17870_v8 = vld [vmem:[%s19488_s12 + $0x8] sm:$0xff]  ;;  %v17880_v16 = vld [vmem:[%s19488_s12] sm:$0xff]  ;;  %v17885_v22 = vld [vmem:[%s19488_s12 + $0x18] sm:$0xff] }
 0x3a2   :  { %v1677_v32 = vmul.f32 %v1503_v21, %v17785_v58 }
 0x3a3   :  { %v1676_v33 = vmul.f32 %v1502_v31, %v17790_v62  ;;  %16137 = vmatprep.subr.bf16.mxu0 %v16136_v28  ;;  %16153 = vmatprep.subr.bf16.mxu1 %v16136_v28 }
 0x3a4   :  { %16139 = vmatpush3.bf16.msra.mxu0 %v16136_v28  ;;  %16155 = vmatpush3.bf16.msra.mxu1 %v16136_v28 }
 0x3a5   :  { %v16140_v35 = vpack.c.bf16 %v1677_v32, %v1676_v33 }
 0x3a7   :  { %16141 = vmatprep.subr.bf16.mxu0 %v16140_v35  ;;  %16157 = vmatprep.subr.bf16.mxu1 %v16140_v35 }
 0x3a8   :  { %16143 = vmatpush3.bf16.msra.mxu0 %v16140_v35  ;;  %16159 = vmatpush3.bf16.msra.mxu1 %v16140_v35  ;;  %v17894_v35 = vld [vmem:[%s19487_s11 + $0x18] sm:$0xff] }
 0x3a9   :  { %16145 = vmatprep.subr.bf16.mxu0 %v16144_v3  ;;  %16161 = vmatprep.subr.bf16.mxu1 %v16144_v3 }
 0x3ab   :  { %14417 = vmatmul.mubr.msk.f32.vlgmr.msra.gmra.mrb[28].mxu0 %vm177_vm0, %v17496_v12  ;;  %14445 = vmatmul.mubr.msk.f32.vlgmr.msra.gmra.mrb[20].mxu1 %vm177_vm0, %v17451_v2 }
 0x3ac   :  { %16147 = vmatpush3.bf16.msra.mxu0 %v16144_v3  ;;  %16163 = vmatpush3.bf16.msra.mxu1 %v16144_v3 }
 0x3ad   :  { %16149 = vmatprep.subr.bf16.mxu0 %v16148_v29  ;;  %16165 = vmatprep.subr.bf16.mxu1 %v16148_v29 }
 0x3ae   :  { %14419 = vmatprep.mubr.msk.f32.mxu0 %vm177_vm0, %v17502_v13  ;;  %14447 = vmatprep.mubr.msk.f32.mxu1 %vm177_vm0, %v17465_v5 }
 0x3af   :  { %14420 = vmatmul.mubr.msk.f32.gmra.mrb[30].mxu0 %vm177_vm0, %v17514_v14  ;;  %14448 = vmatmul.mubr.msk.f32.gmra.mrb[22].mxu1 %vm177_vm0, %v17485_v10 }
 0x3b0   :  { %16151 = vmatpush3.bf16.msra.mxu0 %v16148_v29  ;;  %16167 = vmatpush3.bf16.msra.mxu1 %v16148_v29 }
 0x3b1   :  { %14430 = vmatprep.mubr.msk.f32.mxu0 %vm177_vm0, %v17446_v1  ;;  %14458 = vmatprep.mubr.msk.f32.mxu1 %vm177_vm0, %v17478_v9 }
 0x3b2   :  { %16185 = vmatprep.subr.bf16.mxu1 %v17536_v17  ;;  %16169 = vmatprep.subr.bf16.mxu0 %v17536_v17 }
 0x3b3   :  { %14431 = vmatmul.mubr.msk.f32.vlgmr.msra.gmra.mrb[32].mxu0 %vm177_vm0, %v17451_v2  ;;  %14459 = vmatmul.mubr.msk.f32.vlgmr.msra.gmra.mrb[20].mxu1 %vm177_vm0, %v17496_v12 }
 0x3b4   :  { %14433 = vmatprep.mubr.msk.f32.mxu0 %vm177_vm0, %v17465_v5  ;;  %14461 = vmatprep.mubr.msk.f32.mxu1 %vm177_vm0, %v17502_v13 }
 0x3b5   :  { %16187 = vmatpush3.bf16.msra.mxu1 %v17536_v17  ;;  %16171 = vmatpush3.bf16.msra.mxu0 %v17536_v17 }
 0x3b6   :  { %16189 = vmatprep.subr.bf16.mxu1 %v17548_v20  ;;  %16173 = vmatprep.subr.bf16.mxu0 %v17548_v20 }
 0x3b7   :  { %14434 = vmatmul.mubr.msk.f32.gmra.mrb[34].mxu0 %vm177_vm0, %v17485_v10  ;;  %14462 = vmatmul.mubr.msk.f32.gmra.mrb[22].mxu1 %vm177_vm0, %v17514_v14 }
 0x3b9   :  { %16191 = vmatpush3.bf16.msra.mxu1 %v17548_v20  ;;  %16175 = vmatpush3.bf16.msra.mxu0 %v17548_v20 }
 0x3ba   :  { %16193 = vmatprep.subr.bf16.mxu1 %v17560_v23  ;;  %16177 = vmatprep.subr.bf16.mxu0 %v17560_v23 }
 0x47e   :  { %v14418_v2 = vpop.f32.mrb[28].mxu0 }
 0x47f   :  { %v1748_v5 = vpop.f32.mrb[29].mxu0 }
 0x482   :  { %v14421_v12 = vpop.f32.mrb[30].mxu0 }
 0x483   :  { %v1758_v13 = vpop.f32.mrb[31].mxu0 }
 0x486   :  { %v14432_v36 = vpop.f32.mrb[32].mxu0  ;;  %v14460_v37 = vpop.f32.mrb[20].mxu1 }
 0x487   :  { %v1853_v38 = vsub.f32 %v14418_v2, %v14432_v36  ;;  %v1833_v39 = vpop.f32.mrb[33].mxu0  ;;  %v2007_v10 = vpop.f32.mrb[21].mxu1 }
 0x488   :  { %v1852_v40 = vsub.f32 %v1748_v5, %v1833_v39  ;;  %14500 = vmatprep.mubr.msk.f32.mxu1 %vm177_vm0, %v2007_v10 }
 0x489   :  { %14501 = vmatmul.mubr.msk.f32.vlgmr.msra.gmra.mrb[24].mxu1 %vm177_vm0, %v14460_v37 }
 0x48a   :  { %v14435_v14 = vpop.f32.mrb[34].mxu0  ;;  %v14463_v41 = vpop.f32.mrb[22].mxu1  ;;  %14472 = vmatprep.mubr.msk.f32.mxu0 %vm177_vm0, %v1852_v40  ;;  %16195 = vmatpush3.bf16.msra.mxu1 %v17560_v23 }
 0x48b   :  { %v1855_v45 = vsub.f32 %v14421_v12, %v14435_v14  ;;  %v1843_v47 = vpop.f32.mrb[35].mxu0  ;;  %v2017_v48 = vpop.f32.mrb[23].mxu1  ;;  %14473 = vmatmul.mubr.msk.f32.vlgmr.msra.gmra.mrb[36].mxu0 %vm177_vm0, %v1853_v38  ;;  %16197 = vmatprep.subr.bf16.mxu1 %v17580_v34 }
 0x48c   :  { %v1854_v49 = vsub.f32 %v1758_v13, %v1843_v47  ;;  %16179 = vmatpush3.bf16.msra.mxu0 %v17560_v23  ;;  %14503 = vmatprep.mubr.msk.f32.mxu1 %vm177_vm0, %v2017_v48 }
 0x48d   :  { %14504 = vmatmul.mubr.msk.f32.gmra.mrb[26].mxu1 %vm177_vm0, %v14463_v41  ;;  %16181 = vmatprep.subr.bf16.mxu0 %v17580_v34 }
 0x48e   :  { %14475 = vmatprep.mubr.msk.f32.mxu0 %vm177_vm0, %v1854_v49  ;;  %16199 = vmatpush3.bf16.msra.mxu1 %v17580_v34 }
 0x48f   :  { %14514 = vmatprep.mubr.msk.f32.mxu1 %vm177_vm0, %v1852_v40  ;;  %14476 = vmatmul.mubr.msk.f32.gmra.mrb[38].mxu0 %vm177_vm0, %v1855_v45 }
 0x490   :  { %16183 = vmatpush3.bf16.msra.mxu0 %v17580_v34  ;;  %14486 = vmatprep.mubr.msk.f32.mxu0 %vm177_vm0, %v2007_v10 }
 0x491   :  { %14515 = vmatmul.mubr.msk.f32.vlgmr.msra.gmra.mrb[24].mxu1 %vm177_vm0, %v1853_v38  ;;  %v17908_v38 = vld [vmem:[%s19488_s12 + $0x10] sm:$0xff] }
 0x492   :  { %14517 = vmatprep.mubr.msk.f32.mxu1 %vm177_vm0, %v1854_v49 }
 0x493   :  { %14487 = vmatmul.mubr.msk.f32.vlgmr.msra.gmra.mrb[40].mxu0 %vm177_vm0, %v14460_v37  ;;  %v17903_v37 = vld [vmem:[%s19487_s11 + $0x10] sm:$0xff] }
 0x494   :  { %14489 = vmatprep.mubr.msk.f32.mxu0 %vm177_vm0, %v2017_v48 }
 0x495   :  { %14518 = vmatmul.mubr.msk.f32.gmra.mrb[26].mxu1 %vm177_vm0, %v1855_v45 }
 0x496   :  { %14556 = vmatprep.mubr.msk.f32.mxu1 %vm177_vm0, %v17614_v44 }
 0x497   :  { %14490 = vmatmul.mubr.msk.f32.gmra.mrb[42].mxu0 %vm177_vm0, %v14463_v41 }
 0x498   :  { %14528 = vmatprep.mubr.msk.f32.mxu0 %vm177_vm0, %v17609_v43 }
 0x55e   :  { %v14474_v50 = vpop.f32.mrb[36].mxu0 }
 0x55f   :  { %v2104_v51 = vpop.f32.mrb[37].mxu0 }
 0x562   :  { %v14477_v59 = vpop.f32.mrb[38].mxu0 }
 0x563   :  { %v2114_v61 = vpop.f32.mrb[39].mxu0 }
 0x564   :  { %v14516_v3 = vpop.f32.mrb[24].mxu1 }
 0x565   :  { %v2375_v4 = vpop.f32.mrb[25].mxu1  ;;  %v2399_v29 = vmul.f32 %v14516_v3, %v17870_v8  ;;  %v2411_v31 = vmul.f32 %v14516_v3, %v17865_v7 }
 0x566   :  { %v14488_v11 = vpop.f32.mrb[40].mxu0  ;;  %v2398_v5 = vmul.f32 %v2375_v4, %v17880_v16  ;;  %v2410_v12 = vmul.f32 %v2375_v4, %v17875_v15 }
 0x567   :  { %v2221_v18 = vsub.f32 %v14474_v50, %v14488_v11  ;;  %v2201_v19 = vpop.f32.mrb[41].mxu0 }
 0x568   :  { %v2220_v21 = vsub.f32 %v2104_v51, %v2201_v19  ;;  %v14519_v28 = vpop.f32.mrb[26].mxu1 }
 0x569   :  { %v2395_v32 = vmul.f32 %v2221_v18, %v17865_v7  ;;  %v2407_v33 = vmul.f32 %v2221_v18, %v17870_v8  ;;  %v2385_v2 = vpop.f32.mrb[27].mxu1  ;;  %v2401_v14 = vmul.f32 %v14519_v28, %v17885_v22  ;;  %v2413_v49 = vmul.f32 %v14519_v28, %v17894_v35 }
 0x56a   :  { %v2394_v13 = vmul.f32 %v2220_v21, %v17875_v15  ;;  %v2406_v36 = vmul.f32 %v2220_v21, %v17880_v16  ;;  %v14491_v39 = vpop.f32.mrb[42].mxu0  ;;  %v2400_v51 = vmul.f32 %v2385_v2, %v17908_v38  ;;  %v2412_v3 = vmul.f32 %v2385_v2, %v17903_v37 }
 0x56b   :  { %v2403_v10 = vsub.f32 %v2395_v32, %v2399_v29  ;;  %v2415_v40 = vadd.f32 %v2411_v31, %v2407_v33  ;;  %v2223_v41 = vsub.f32 %v14477_v59, %v14491_v39  ;;  %v2211_v45 = vpop.f32.mrb[43].mxu0 }
 0x56c   :  { %v2402_v47 = vsub.f32 %v2394_v13, %v2398_v5  ;;  %v2414_v48 = vadd.f32 %v2410_v12, %v2406_v36  ;;  %v2222_v50 = vsub.f32 %v2114_v61, %v2211_v45 }
 0x56d   :  { %v2397_v4 = vmul.f32 %v2223_v41, %v17894_v35  ;;  %v2409_v11 = vmul.f32 %v2223_v41, %v17885_v22 }
 0x56e   :  { %v16200_v18 = vpack.c.bf16 %v2403_v10, %v2402_v47  ;;  %v16208_v19 = vpack.c.bf16 %v2415_v40, %v2414_v48  ;;  %v2396_v21 = vmul.f32 %v2222_v50, %v17903_v37  ;;  %v2408_v59 = vmul.f32 %v2222_v50, %v17908_v38  ;;  %v156_v50 = vld [vmem:[%s19490_s16 + $0x8] sm:$0xff] }
 0x56f   :  { %v2405_v29 = vsub.f32 %v2397_v4, %v2401_v14  ;;  %v2417_v31 = vadd.f32 %v2413_v49, %v2409_v11  ;;  %v147_v49 = vld [vmem:[%s19489_s15 + $0x8] sm:$0xff] }
 0x570   :  { %v2404_v32 = vsub.f32 %v2396_v21, %v2400_v51  ;;  %v2416_v33 = vadd.f32 %v2412_v3, %v2408_v59  ;;  %16201 = vmatprep.subr.bf16.mxu0 %v16200_v18  ;;  %16217 = vmatprep.subr.bf16.mxu1 %v16200_v18 }
 0x571   :  { %16203 = vmatpush3.bf16.msra.mxu0 %v16200_v18  ;;  %16219 = vmatpush3.bf16.msra.mxu1 %v16200_v18  ;;  %v149_v18 = vld [vmem:[%s19489_s15 + $0x18] sm:$0xff] }
 0x572   :  { %v16204_v61 = vpack.c.bf16 %v2405_v29, %v2404_v32  ;;  %v16212_v28 = vpack.c.bf16 %v2417_v31, %v2416_v33  ;;  %v157_v32 = vld [vmem:[%s19490_s16 + $0x10] sm:$0xff] }
 0x574   :  { %16205 = vmatprep.subr.bf16.mxu0 %v16204_v61  ;;  %16221 = vmatprep.subr.bf16.mxu1 %v16204_v61 }
 0x575   :  { %16207 = vmatpush3.bf16.msra.mxu0 %v16204_v61  ;;  %16223 = vmatpush3.bf16.msra.mxu1 %v16204_v61 }
 0x576   :  { %16209 = vmatprep.subr.bf16.mxu0 %v16208_v19  ;;  %16225 = vmatprep.subr.bf16.mxu1 %v16208_v19 }
 0x578   :  { %14529 = vmatmul.mubr.msk.f32.vlgmr.msra.gmra.mrb[44].mxu0 %vm177_vm0, %v17647_v52  ;;  %14557 = vmatmul.mubr.msk.f32.vlgmr.msra.gmra.mrb[28].mxu1 %vm177_vm0, %v17652_v53 }
 0x579   :  { %16211 = vmatpush3.bf16.msra.mxu0 %v16208_v19  ;;  %16227 = vmatpush3.bf16.msra.mxu1 %v16208_v19  ;;  %v158_v19 = vld [vmem:[%s19490_s16 + $0x18] sm:$0xff] }
 0x57a   :  { %16213 = vmatprep.subr.bf16.mxu0 %v16212_v28  ;;  %16229 = vmatprep.subr.bf16.mxu1 %v16212_v28 }
 0x57b   :  { %14531 = vmatprep.mubr.msk.f32.mxu0 %vm177_vm0, %v17661_v54  ;;  %14559 = vmatprep.mubr.msk.f32.mxu1 %vm177_vm0, %v17666_v55 }
 0x57c   :  { %14532 = vmatmul.mubr.msk.f32.gmra.mrb[46].mxu0 %vm177_vm0, %v17671_v56  ;;  %14560 = vmatmul.mubr.msk.f32.gmra.mrb[30].mxu1 %vm177_vm0, %v17676_v57 }
 0x57d   :  { %16215 = vmatpush3.bf16.msra.mxu0 %v16212_v28  ;;  %16231 = vmatpush3.bf16.msra.mxu1 %v16212_v28 }
 0x57e   :  { %14542 = vmatprep.mubr.msk.f32.mxu0 %vm177_vm0, %v17614_v44  ;;  %14570 = vmatprep.mubr.msk.f32.mxu1 %vm177_vm0, %v17609_v43 }
 0x57f   :  { %16249 = vmatprep.subr.bf16.mxu1 %v17708_v60  ;;  %16233 = vmatprep.subr.bf16.mxu0 %v17708_v60 }
 0x580   :  { %14543 = vmatmul.mubr.msk.f32.vlgmr.msra.gmra.mrb[48].mxu0 %vm177_vm0, %v17652_v53  ;;  %14571 = vmatmul.mubr.msk.f32.vlgmr.msra.gmra.mrb[28].mxu1 %vm177_vm0, %v17647_v52 }
 0x581   :  { %14545 = vmatprep.mubr.msk.f32.mxu0 %vm177_vm0, %v17666_v55  ;;  %14573 = vmatprep.mubr.msk.f32.mxu1 %vm177_vm0, %v17661_v54 }
 0x582   :  { %16251 = vmatpush3.bf16.msra.mxu1 %v17708_v60  ;;  %16235 = vmatpush3.bf16.msra.mxu0 %v17708_v60 }
 0x583   :  { %16253 = vmatprep.subr.bf16.mxu1 %v17720_v63  ;;  %16237 = vmatprep.subr.bf16.mxu0 %v17720_v63 }
 0x584   :  { %14546 = vmatmul.mubr.msk.f32.gmra.mrb[50].mxu0 %vm177_vm0, %v17676_v57  ;;  %14574 = vmatmul.mubr.msk.f32.gmra.mrb[30].mxu1 %vm177_vm0, %v17671_v56 }
 0x586   :  { %16255 = vmatpush3.bf16.msra.mxu1 %v17720_v63  ;;  %16239 = vmatpush3.bf16.msra.mxu0 %v17720_v63 }
 0x587   :  { %16257 = vmatprep.subr.bf16.mxu1 %v17732_v6  ;;  %16241 = vmatprep.subr.bf16.mxu0 %v17732_v6 }
 0x64b   :  { %v14530_v43 = vpop.f32.mrb[44].mxu0 }
 0x64c   :  { %v2484_v44 = vpop.f32.mrb[45].mxu0 }
 0x64f   :  { %v14533_v52 = vpop.f32.mrb[46].mxu0 }
 0x650   :  { %v2494_v53 = vpop.f32.mrb[47].mxu0 }
 0x653   :  { %v14544_v54 = vpop.f32.mrb[48].mxu0  ;;  %v14572_v55 = vpop.f32.mrb[28].mxu1 }
 0x654   :  { %v2589_v2 = vsub.f32 %v14530_v43, %v14544_v54  ;;  %v2569_v5 = vpop.f32.mrb[49].mxu0  ;;  %v2743_v57 = vpop.f32.mrb[29].mxu1 }
 0x655   :  { %v2588_v12 = vsub.f32 %v2484_v44, %v2569_v5  ;;  %14612 = vmatprep.mubr.msk.f32.mxu1 %vm177_vm0, %v2743_v57  ;;  %v148_v44 = vld [vmem:[%s19489_s15 + $0x10] sm:$0xff] }
 0x656   :  { %14613 = vmatmul.mubr.msk.f32.vlgmr.msra.gmra.mrb[32].mxu1 %vm177_vm0, %v14572_v55 }
 0x657   :  { %v14547_v56 = vpop.f32.mrb[50].mxu0  ;;  %v14575_v13 = vpop.f32.mrb[30].mxu1  ;;  %14584 = vmatprep.mubr.msk.f32.mxu0 %vm177_vm0, %v2588_v12  ;;  %16259 = vmatpush3.bf16.msra.mxu1 %v17732_v6 }
 0x658   :  { %v2591_v36 = vsub.f32 %v14533_v52, %v14547_v56  ;;  %v2579_v39 = vpop.f32.mrb[51].mxu0  ;;  %v2753_v10 = vpop.f32.mrb[31].mxu1  ;;  %14585 = vmatmul.mubr.msk.f32.vlgmr.msra.gmra.mrb[52].mxu0 %vm177_vm0, %v2589_v2  ;;  %16261 = vmatprep.subr.bf16.mxu1 %v17742_v30 }
 0x659   :  { %v2590_v40 = vsub.f32 %v2494_v53, %v2579_v39  ;;  %16243 = vmatpush3.bf16.msra.mxu0 %v17732_v6  ;;  %14615 = vmatprep.mubr.msk.f32.mxu1 %vm177_vm0, %v2753_v10 }
 0x65a   :  { %14616 = vmatmul.mubr.msk.f32.gmra.mrb[34].mxu1 %vm177_vm0, %v14575_v13  ;;  %16245 = vmatprep.subr.bf16.mxu0 %v17742_v30 }
 0x65b   :  { %14587 = vmatprep.mubr.msk.f32.mxu0 %vm177_vm0, %v2590_v40  ;;  %16263 = vmatpush3.bf16.msra.mxu1 %v17742_v30 }
 0x65c   :  { %14626 = vmatprep.mubr.msk.f32.mxu1 %vm177_vm0, %v2588_v12  ;;  %14588 = vmatmul.mubr.msk.f32.gmra.mrb[54].mxu0 %vm177_vm0, %v2591_v36 }
 0x65d   :  { %16247 = vmatpush3.bf16.msra.mxu0 %v17742_v30  ;;  %14598 = vmatprep.mubr.msk.f32.mxu0 %vm177_vm0, %v2743_v57 }
 0x65e   :  { %14627 = vmatmul.mubr.msk.f32.vlgmr.msra.gmra.mrb[32].mxu1 %vm177_vm0, %v2589_v2 }
 0x65f   :  { %14629 = vmatprep.mubr.msk.f32.mxu1 %vm177_vm0, %v2590_v40 }
 0x660   :  { %14599 = vmatmul.mubr.msk.f32.vlgmr.msra.gmra.mrb[56].mxu0 %vm177_vm0, %v14572_v55 }
 0x661   :  { %14601 = vmatprep.mubr.msk.f32.mxu0 %vm177_vm0, %v2753_v10 }
 0x662   :  { %14630 = vmatmul.mubr.msk.f32.gmra.mrb[34].mxu1 %vm177_vm0, %v2591_v36 }
 0x663   :  { %14668 = vmatprep.mubr.msk.f32.mxu1 %vm177_vm0, %v17446_v1  ;;  %v146_v1 = vld [vmem:[%s19489_s15] sm:$0xff] }
 0x664   :  { %14602 = vmatmul.mubr.msk.f32.gmra.mrb[58].mxu0 %vm177_vm0, %v14575_v13 }
 0x665   :  { %14640 = vmatprep.mubr.msk.f32.mxu0 %vm177_vm0, %v17478_v9  ;;  %v155_v9 = vld [vmem:[%s19490_s16] sm:$0xff] }
 0x72b   :  { %v14586_v14 = vpop.f32.mrb[52].mxu0 }
 0x72c   :  { %v2840_v41 = vpop.f32.mrb[53].mxu0 }
 0x72f   :  { %v14589_v45 = vpop.f32.mrb[54].mxu0 }
 0x730   :  { %v2850_v47 = vpop.f32.mrb[55].mxu0 }
 0x731   :  { %v14628_v48 = vpop.f32.mrb[32].mxu1 }
 0x732   :  { %v3111_v51 = vpop.f32.mrb[33].mxu1  ;;  %v3135_v21 = vmul.f32 %v14628_v48, %v156_v50  ;;  %v3147_v59 = vmul.f32 %v14628_v48, %v147_v49 }
 0x733   :  { %v14600_v3 = vpop.f32.mrb[56].mxu0  ;;  %v3134_v33 = vmul.f32 %v3111_v51, %v155_v9  ;;  %v3146_v61 = vmul.f32 %v3111_v51, %v146_v1 }
 0x734   :  { %v2957_v4 = vsub.f32 %v14586_v14, %v14600_v3  ;;  %v2937_v11 = vpop.f32.mrb[57].mxu0 }
 0x735   :  { %v2956_v29 = vsub.f32 %v2840_v41, %v2937_v11  ;;  %v14631_v31 = vpop.f32.mrb[34].mxu1 }
 0x736   :  { %v3131_v28 = vmul.f32 %v2957_v4, %v147_v49  ;;  %v3143_v43 = vmul.f32 %v2957_v4, %v156_v50  ;;  %v3121_v52 = vpop.f32.mrb[35].mxu1  ;;  %v3137_v55 = vmul.f32 %v14631_v31, %v158_v19  ;;  %v3149_v2 = vmul.f32 %v14631_v31, %v149_v18 }
 0x737   :  { %v3130_v53 = vmul.f32 %v2956_v29, %v146_v1  ;;  %v3142_v54 = vmul.f32 %v2956_v29, %v155_v9  ;;  %v14603_v5 = vpop.f32.mrb[58].mxu0  ;;  %v3136_v56 = vmul.f32 %v3121_v52, %v157_v32  ;;  %v3148_v40 = vmul.f32 %v3121_v52, %v148_v44 }
 0x738   :  { %v3139_v57 = vsub.f32 %v3131_v28, %v3135_v21  ;;  %v3151_v12 = vadd.f32 %v3147_v59, %v3143_v43  ;;  %v2959_v13 = vsub.f32 %v14589_v45, %v14603_v5  ;;  %v2947_v36 = vpop.f32.mrb[59].mxu0  ;;  %v18052_v28 = vld [vmem:[%s19536_s6 + $0x18] sm:$0xff]  ;;  %v18059_v43 = vld [vmem:[%s19536_s6] sm:$0xff] }
 0x739   :  { %v3138_v39 = vsub.f32 %v3130_v53, %v3134_v33  ;;  %v3150_v10 = vadd.f32 %v3146_v61, %v3142_v54  ;;  %v2958_v14 = vsub.f32 %v2850_v47, %v2947_v36  ;;  %v18038_v33 = vld [vmem:[%s19536_s6 + $0x10] sm:$0xff]  ;;  %v18045_v61 = vld [vmem:[%s19538_s9 + $0x18] sm:$0xff] }
 0x73a   :  { %v3155_v41 = vmul.f32 %v3139_v57, %v17773_v42  ;;  %v3159_v48 = vmul.f32 %v3151_v12, %v17773_v42  ;;  %v3133_v49 = vmul.f32 %v2959_v13, %v149_v18  ;;  %v3145_v50 = vmul.f32 %v2959_v13, %v158_v19 }
 0x73b   :  { %v3154_v51 = vmul.f32 %v3138_v39, %v17778_v46  ;;  %v3158_v1 = vmul.f32 %v3150_v10, %v17778_v46  ;;  %v3132_v9 = vmul.f32 %v2958_v14, %v148_v44  ;;  %v3144_v3 = vmul.f32 %v2958_v14, %v157_v32  ;;  %v18031_v32 = vld [vmem:[%s19538_s9 + $0x10] sm:$0xff]  ;;  %v18066_v44 = vld [vmem:[%s19538_s9] sm:$0xff] }
 0x73c   :  { %v3141_v4 = vsub.f32 %v3133_v49, %v3137_v55  ;;  %v3153_v11 = vadd.f32 %v3149_v2, %v3145_v50  ;;  %v18124_v49 = vld [vmem:[%s19541_s4] sm:$0xff] }
 0x73d   :  { %v3140_v45 = vsub.f32 %v3132_v9, %v3136_v56  ;;  %v3152_v21 = vadd.f32 %v3148_v40, %v3144_v3  ;;  %v16264_v59 = vpack.c.bf16 %v3155_v41, %v3154_v51  ;;  %v16272_v29 = vpack.c.bf16 %v3159_v48, %v3158_v1  ;;  %v18116_v48 = vld [vmem:[%s19542_s5] sm:$0xff] }
 0x73e   :  { %v3157_v47 = vmul.f32 %v3141_v4, %v17785_v58  ;;  %v3161_v31 = vmul.f32 %v3153_v11, %v17785_v58  ;;  %v18017_v58 = vld [vmem:[%s19538_s9 + $0x8] sm:$0xff] }
 0x73f   :  { %v3156_v42 = vmul.f32 %v3140_v45, %v17790_v62  ;;  %v3160_v18 = vmul.f32 %v3152_v21, %v17790_v62  ;;  %16265 = vmatprep.subr.bf16.mxu0 %v16264_v59  ;;  %16281 = vmatprep.subr.bf16.mxu1 %v16264_v59  ;;  %v18024_v62 = vld [vmem:[%s19536_s6 + $0x8] sm:$0xff] }
 0x740   :  { %16267 = vmatpush3.bf16.msra.mxu0 %v16264_v59  ;;  %16283 = vmatpush3.bf16.msra.mxu1 %v16264_v59 }
 0x741   :  { %v16268_v46 = vpack.c.bf16 %v3157_v47, %v3156_v42  ;;  %v16276_v19 = vpack.c.bf16 %v3161_v31, %v3160_v18 }
 0x743   :  { %16269 = vmatprep.subr.bf16.mxu0 %v16268_v46  ;;  %16285 = vmatprep.subr.bf16.mxu1 %v16268_v46 }
 0x744   :  { %16271 = vmatpush3.bf16.msra.mxu0 %v16268_v46  ;;  %16287 = vmatpush3.bf16.msra.mxu1 %v16268_v46 }
 0x745   :  { %16273 = vmatprep.subr.bf16.mxu0 %v16272_v29  ;;  %16289 = vmatprep.subr.bf16.mxu1 %v16272_v29 }
 0x747   :  { %14641 = vmatmul.mubr.msk.f32.vlgmr.msra.gmra.mrb[60].mxu0 %vm177_vm0, %v18017_v58  ;;  %14669 = vmatmul.mubr.msk.f32.vlgmr.msra.gmra.mrb[36].mxu1 %vm177_vm0, %v18024_v62 }
 0x748   :  { %16275 = vmatpush3.bf16.msra.mxu0 %v16272_v29  ;;  %16291 = vmatpush3.bf16.msra.mxu1 %v16272_v29 }
 0x749   :  { %16277 = vmatprep.subr.bf16.mxu0 %v16276_v19  ;;  %16293 = vmatprep.subr.bf16.mxu1 %v16276_v19 }
 0x74a   :  { %14643 = vmatprep.mubr.msk.f32.mxu0 %vm177_vm0, %v18031_v32  ;;  %14671 = vmatprep.mubr.msk.f32.mxu1 %vm177_vm0, %v18038_v33 }
 0x74b   :  { %14644 = vmatmul.mubr.msk.f32.gmra.mrb[62].mxu0 %vm177_vm0, %v18045_v61  ;;  %14672 = vmatmul.mubr.msk.f32.gmra.mrb[38].mxu1 %vm177_vm0, %v18052_v28 }
 0x74c   :  { %16279 = vmatpush3.bf16.msra.mxu0 %v16276_v19  ;;  %16295 = vmatpush3.bf16.msra.mxu1 %v16276_v19 }
 0x74d   :  { %14654 = vmatprep.mubr.msk.f32.mxu0 %vm177_vm0, %v18059_v43  ;;  %14682 = vmatprep.mubr.msk.f32.mxu1 %vm177_vm0, %v18066_v44 }
 0x74e   :  { %16313 = vmatprep.subr.bf16.mxu1 %v17536_v17  ;;  %16297 = vmatprep.subr.bf16.mxu0 %v17536_v17 }
 0x74f   :  { %14655 = vmatmul.mubr.msk.f32.vlgmr.msra.gmra.mrb[64].mxu0 %vm177_vm0, %v18024_v62  ;;  %14683 = vmatmul.mubr.msk.f32.vlgmr.msra.gmra.mrb[36].mxu1 %vm177_vm0, %v18017_v58 }
 0x750   :  { %14657 = vmatprep.mubr.msk.f32.mxu0 %vm177_vm0, %v18038_v33  ;;  %14685 = vmatprep.mubr.msk.f32.mxu1 %vm177_vm0, %v18031_v32 }
 0x751   :  { %16315 = vmatpush3.bf16.msra.mxu1 %v17536_v17  ;;  %16299 = vmatpush3.bf16.msra.mxu0 %v17536_v17 }
 0x752   :  { %16317 = vmatprep.subr.bf16.mxu1 %v17548_v20  ;;  %16301 = vmatprep.subr.bf16.mxu0 %v17548_v20 }
 0x753   :  { %14658 = vmatmul.mubr.msk.f32.gmra.mrb[66].mxu0 %vm177_vm0, %v18052_v28  ;;  %14686 = vmatmul.mubr.msk.f32.gmra.mrb[38].mxu1 %vm177_vm0, %v18045_v61 }
 0x755   :  { %16319 = vmatpush3.bf16.msra.mxu1 %v17548_v20  ;;  %16303 = vmatpush3.bf16.msra.mxu0 %v17548_v20 }
 0x756   :  { %16321 = vmatprep.subr.bf16.mxu1 %v17560_v23  ;;  %16305 = vmatprep.subr.bf16.mxu0 %v17560_v23 }
 0x81a   :  { %v14642_v52 = vpop.f32.mrb[60].mxu0 }
 0x81b   :  { %v3228_v53 = vpop.f32.mrb[61].mxu0 }
 0x81e   :  { %v14645_v54 = vpop.f32.mrb[62].mxu0 }
 0x81f   :  { %v3238_v55 = vpop.f32.mrb[63].mxu0 }
 0x822   :  { %v14656_v2 = vpop.f32.mrb[64].mxu0  ;;  %v14684_v5 = vpop.f32.mrb[36].mxu1 }
 0x823   :  { %v3333_v57 = vsub.f32 %v14642_v52, %v14656_v2  ;;  %v3313_v12 = vpop.f32.mrb[65].mxu0  ;;  %v3487_v56 = vpop.f32.mrb[37].mxu1 }
 0x824   :  { %v3332_v13 = vsub.f32 %v3228_v53, %v3313_v12  ;;  %14724 = vmatprep.mubr.msk.f32.mxu1 %vm177_vm0, %v3487_v56 }
 0x825   :  { %14725 = vmatmul.mubr.msk.f32.vlgmr.msra.gmra.mrb[40].mxu1 %vm177_vm0, %v14684_v5 }
 0x826   :  { %v14659_v36 = vpop.f32.mrb[66].mxu0  ;;  %v14687_v39 = vpop.f32.mrb[38].mxu1  ;;  %14696 = vmatprep.mubr.msk.f32.mxu0 %vm177_vm0, %v3332_v13  ;;  %16323 = vmatpush3.bf16.msra.mxu1 %v17560_v23 }
 0x827   :  { %v3335_v10 = vsub.f32 %v14645_v54, %v14659_v36  ;;  %v3323_v40 = vpop.f32.mrb[67].mxu0  ;;  %v3497_v14 = vpop.f32.mrb[39].mxu1  ;;  %14697 = vmatmul.mubr.msk.f32.vlgmr.msra.gmra.mrb[68].mxu0 %vm177_vm0, %v3333_v57  ;;  %16325 = vmatprep.subr.bf16.mxu1 %v17580_v34 }
 0x828   :  { %v3334_v41 = vsub.f32 %v3238_v55, %v3323_v40  ;;  %16307 = vmatpush3.bf16.msra.mxu0 %v17560_v23  ;;  %14727 = vmatprep.mubr.msk.f32.mxu1 %vm177_vm0, %v3497_v14 }
 0x829   :  { %14728 = vmatmul.mubr.msk.f32.gmra.mrb[42].mxu1 %vm177_vm0, %v14687_v39  ;;  %16309 = vmatprep.subr.bf16.mxu0 %v17580_v34 }
 0x82a   :  { %14699 = vmatprep.mubr.msk.f32.mxu0 %vm177_vm0, %v3334_v41  ;;  %16327 = vmatpush3.bf16.msra.mxu1 %v17580_v34 }
 0x82b   :  { %14738 = vmatprep.mubr.msk.f32.mxu1 %vm177_vm0, %v3332_v13  ;;  %14700 = vmatmul.mubr.msk.f32.gmra.mrb[70].mxu0 %vm177_vm0, %v3335_v10 }
 0x82c   :  { %16311 = vmatpush3.bf16.msra.mxu0 %v17580_v34  ;;  %14710 = vmatprep.mubr.msk.f32.mxu0 %vm177_vm0, %v3487_v56 }
 0x82d   :  { %14739 = vmatmul.mubr.msk.f32.vlgmr.msra.gmra.mrb[40].mxu1 %vm177_vm0, %v3333_v57 }
 0x82e   :  { %14741 = vmatprep.mubr.msk.f32.mxu1 %vm177_vm0, %v3334_v41 }
 0x82f   :  { %14711 = vmatmul.mubr.msk.f32.vlgmr.msra.gmra.mrb[72].mxu0 %vm177_vm0, %v14684_v5 }
 0x830   :  { %14713 = vmatprep.mubr.msk.f32.mxu0 %vm177_vm0, %v3497_v14 }
 0x831   :  { %14742 = vmatmul.mubr.msk.f32.gmra.mrb[42].mxu1 %vm177_vm0, %v3335_v10 }
 0x832   :  { %14780 = vmatprep.mubr.msk.f32.mxu1 %vm177_vm0, %v18116_v48 }
 0x833   :  { %14714 = vmatmul.mubr.msk.f32.gmra.mrb[74].mxu0 %vm177_vm0, %v14687_v39 }
 0x834   :  { %14752 = vmatprep.mubr.msk.f32.mxu0 %vm177_vm0, %v18124_v49 }
 0x8fa   :  { %v14698_v50 = vpop.f32.mrb[68].mxu0 }
 0x8fb   :  { %v3584_v51 = vpop.f32.mrb[69].mxu0 }
 0x8fe   :  { %v14701_v1 = vpop.f32.mrb[70].mxu0 }
 0x8ff   :  { %v3594_v9 = vpop.f32.mrb[71].mxu0 }
 0x900   :  { %v14740_v3 = vpop.f32.mrb[40].mxu1 }
 0x901   :  { %v3855_v4 = vpop.f32.mrb[41].mxu1  ;;  %v3879_v47 = vmul.f32 %v14740_v3, %v17870_v8  ;;  %v3891_v31 = vmul.f32 %v14740_v3, %v17865_v7 }
 0x902   :  { %v14712_v11 = vpop.f32.mrb[72].mxu0  ;;  %v3878_v19 = vmul.f32 %v3855_v4, %v17880_v16  ;;  %v3890_v52 = vmul.f32 %v3855_v4, %v17875_v15 }
 0x903   :  { %v3701_v45 = vsub.f32 %v14698_v50, %v14712_v11  ;;  %v3681_v21 = vpop.f32.mrb[73].mxu0 }
 0x904   :  { %v3700_v59 = vsub.f32 %v3584_v51, %v3681_v21  ;;  %v14743_v29 = vpop.f32.mrb[42].mxu1  ;;  %v18182_v21 = vld [vmem:[%s19542_s5 + $0x18] sm:$0xff] }
 0x905   :  { %v3875_v42 = vmul.f32 %v3701_v45, %v17865_v7  ;;  %v3887_v18 = vmul.f32 %v3701_v45, %v17870_v8  ;;  %v3865_v46 = vpop.f32.mrb[43].mxu1  ;;  %v3881_v57 = vmul.f32 %v14743_v29, %v17885_v22  ;;  %v3893_v8 = vmul.f32 %v14743_v29, %v17894_v35  ;;  %v18175_v45 = vld [vmem:[%s19541_s4 + $0x18] sm:$0xff] }
 0x906   :  { %v3874_v53 = vmul.f32 %v3700_v59, %v17875_v15  ;;  %v3886_v54 = vmul.f32 %v3700_v59, %v17880_v16  ;;  %v14715_v55 = vpop.f32.mrb[74].mxu0  ;;  %v3880_v39 = vmul.f32 %v3865_v46, %v17908_v38  ;;  %v3892_v10 = vmul.f32 %v3865_v46, %v17903_v37 }
 0x907   :  { %v3883_v2 = vsub.f32 %v3875_v42, %v3879_v47  ;;  %v3895_v5 = vadd.f32 %v3891_v31, %v3887_v18  ;;  %v3703_v12 = vsub.f32 %v14701_v1, %v14715_v55  ;;  %v3691_v56 = vpop.f32.mrb[75].mxu0 }
 0x908   :  { %v3882_v13 = vsub.f32 %v3874_v53, %v3878_v19  ;;  %v3894_v7 = vadd.f32 %v3890_v52, %v3886_v54  ;;  %v3702_v36 = vsub.f32 %v3594_v9, %v3691_v56 }
 0x909   :  { %v3877_v15 = vmul.f32 %v3703_v12, %v17894_v35  ;;  %v3889_v16 = vmul.f32 %v3703_v12, %v17885_v22  ;;  %v18147_v22 = vld [vmem:[%s19541_s4 + $0x8] sm:$0xff] }
 0x90a   :  { %v16328_v40 = vpack.c.bf16 %v3883_v2, %v3882_v13  ;;  %v16336_v14 = vpack.c.bf16 %v3895_v5, %v3894_v7  ;;  %v3876_v41 = vmul.f32 %v3702_v36, %v17903_v37  ;;  %v3888_v50 = vmul.f32 %v3702_v36, %v17908_v38  ;;  %v18154_v35 = vld [vmem:[%s19542_s5 + $0x8] sm:$0xff]  ;;  %v18161_v37 = vld [vmem:[%s19541_s4 + $0x10] sm:$0xff] }
 0x90b   :  { %v3885_v51 = vsub.f32 %v3877_v15, %v3881_v57  ;;  %v3897_v1 = vadd.f32 %v3893_v8, %v3889_v16  ;;  %v18168_v38 = vld [vmem:[%s19542_s5 + $0x10] sm:$0xff]  ;;  %v12613_v16 = vld [vmem:[%s19489_s15 + $0x20] sm:$0xff] }
 0x90c   :  { %v3884_v3 = vsub.f32 %v3876_v41, %v3880_v39  ;;  %v3896_v4 = vadd.f32 %v3892_v10, %v3888_v50  ;;  %16329 = vmatprep.subr.bf16.mxu0 %v16328_v40  ;;  %16345 = vmatprep.subr.bf16.mxu1 %v16328_v40  ;;  %v12614_v39 = vld [vmem:[%s19489_s15 + $0x28] sm:$0xff] }
 0x90d   :  { %16331 = vmatpush3.bf16.msra.mxu0 %v16328_v40  ;;  %16347 = vmatpush3.bf16.msra.mxu1 %v16328_v40  ;;  %v12618_v10 = vld [vmem:[%s19490_s16 + $0x28] sm:$0xff]  ;;  %v12617_v40 = vld [vmem:[%s19490_s16 + $0x20] sm:$0xff] }
 0x90e   :  { %v16332_v9 = vpack.c.bf16 %v3885_v51, %v3884_v3  ;;  %v16340_v11 = vpack.c.bf16 %v3897_v1, %v3896_v4  ;;  %v12616_v51 = vld [vmem:[%s19489_s15 + $0x38] sm:$0xff] }
 0x90f   :  { %v12620_v1 = vld [vmem:[%s19490_s16 + $0x38] sm:$0xff] }
 0x910   :  { %16333 = vmatprep.subr.bf16.mxu0 %v16332_v9  ;;  %16349 = vmatprep.subr.bf16.mxu1 %v16332_v9 }
 0x911   :  { %16335 = vmatpush3.bf16.msra.mxu0 %v16332_v9  ;;  %16351 = vmatpush3.bf16.msra.mxu1 %v16332_v9 }
 0x912   :  { %16337 = vmatprep.subr.bf16.mxu0 %v16336_v14  ;;  %16353 = vmatprep.subr.bf16.mxu1 %v16336_v14 }
 0x914   :  { %14753 = vmatmul.mubr.msk.f32.vlgmr.msra.gmra.mrb[76].mxu0 %vm177_vm0, %v18147_v22  ;;  %14781 = vmatmul.mubr.msk.f32.vlgmr.msra.gmra.mrb[44].mxu1 %vm177_vm0, %v18154_v35 }
 0x915   :  { %16339 = vmatpush3.bf16.msra.mxu0 %v16336_v14  ;;  %16355 = vmatpush3.bf16.msra.mxu1 %v16336_v14 }
 0x916   :  { %16341 = vmatprep.subr.bf16.mxu0 %v16340_v11  ;;  %16357 = vmatprep.subr.bf16.mxu1 %v16340_v11 }
 0x917   :  { %14755 = vmatprep.mubr.msk.f32.mxu0 %vm177_vm0, %v18161_v37  ;;  %14783 = vmatprep.mubr.msk.f32.mxu1 %vm177_vm0, %v18168_v38 }
 0x918   :  { %14756 = vmatmul.mubr.msk.f32.gmra.mrb[78].mxu0 %vm177_vm0, %v18175_v45  ;;  %14784 = vmatmul.mubr.msk.f32.gmra.mrb[46].mxu1 %vm177_vm0, %v18182_v21 }
 0x919   :  { %16343 = vmatpush3.bf16.msra.mxu0 %v16340_v11  ;;  %16359 = vmatpush3.bf16.msra.mxu1 %v16340_v11 }
 0x91a   :  { %14766 = vmatprep.mubr.msk.f32.mxu0 %vm177_vm0, %v18116_v48  ;;  %14794 = vmatprep.mubr.msk.f32.mxu1 %vm177_vm0, %v18124_v49 }
 0x91b   :  { %16377 = vmatprep.subr.bf16.mxu1 %v17708_v60  ;;  %16361 = vmatprep.subr.bf16.mxu0 %v17708_v60 }
 0x91c   :  { %14767 = vmatmul.mubr.msk.f32.vlgmr.msra.gmra.mrb[80].mxu0 %vm177_vm0, %v18154_v35  ;;  %14795 = vmatmul.mubr.msk.f32.vlgmr.msra.gmra.mrb[44].mxu1 %vm177_vm0, %v18147_v22 }
 0x91d   :  { %14769 = vmatprep.mubr.msk.f32.mxu0 %vm177_vm0, %v18168_v38  ;;  %14797 = vmatprep.mubr.msk.f32.mxu1 %vm177_vm0, %v18161_v37 }
 0x91e   :  { %16379 = vmatpush3.bf16.msra.mxu1 %v17708_v60  ;;  %16363 = vmatpush3.bf16.msra.mxu0 %v17708_v60 }
 0x91f   :  { %16381 = vmatprep.subr.bf16.mxu1 %v17720_v63  ;;  %16365 = vmatprep.subr.bf16.mxu0 %v17720_v63 }
 0x920   :  { %14770 = vmatmul.mubr.msk.f32.gmra.mrb[82].mxu0 %vm177_vm0, %v18182_v21  ;;  %14798 = vmatmul.mubr.msk.f32.gmra.mrb[46].mxu1 %vm177_vm0, %v18175_v45 }
 0x922   :  { %16383 = vmatpush3.bf16.msra.mxu1 %v17720_v63  ;;  %16367 = vmatpush3.bf16.msra.mxu0 %v17720_v63 }
 0x923   :  { %16385 = vmatprep.subr.bf16.mxu1 %v17732_v6  ;;  %16369 = vmatprep.subr.bf16.mxu0 %v17732_v6 }
 0x9e7   :  { %v14754_v59 = vpop.f32.mrb[76].mxu0 }
 0x9e8   :  { %v3964_v29 = vpop.f32.mrb[77].mxu0 }
 0x9eb   :  { %v14757_v47 = vpop.f32.mrb[78].mxu0 }
 0x9ec   :  { %v3974_v31 = vpop.f32.mrb[79].mxu0 }
 0x9ef   :  { %v14768_v42 = vpop.f32.mrb[80].mxu0  ;;  %v14796_v18 = vpop.f32.mrb[44].mxu1 }
 0x9f0   :  { %v4069_v46 = vsub.f32 %v14754_v59, %v14768_v42  ;;  %v4049_v19 = vpop.f32.mrb[81].mxu0  ;;  %v4223_v52 = vpop.f32.mrb[45].mxu1  ;;  %v12619_v59 = vld [vmem:[%s19490_s16 + $0x30] sm:$0xff] }
 0x9f1   :  { %v4068_v53 = vsub.f32 %v3964_v29, %v4049_v19  ;;  %14836 = vmatprep.mubr.msk.f32.mxu1 %vm177_vm0, %v4223_v52 }
 0x9f2   :  { %14837 = vmatmul.mubr.msk.f32.vlgmr.msra.gmra.mrb[48].mxu1 %vm177_vm0, %v14796_v18 }
 0x9f3   :  { %v14771_v54 = vpop.f32.mrb[82].mxu0  ;;  %v14799_v55 = vpop.f32.mrb[46].mxu1  ;;  %14808 = vmatprep.mubr.msk.f32.mxu0 %vm177_vm0, %v4068_v53  ;;  %16387 = vmatpush3.bf16.msra.mxu1 %v17732_v6 }
 0x9f4   :  { %v4071_v2 = vsub.f32 %v14757_v47, %v14771_v54  ;;  %v4059_v5 = vpop.f32.mrb[83].mxu0  ;;  %v4233_v57 = vpop.f32.mrb[47].mxu1  ;;  %14809 = vmatmul.mubr.msk.f32.vlgmr.msra.gmra.mrb[84].mxu0 %vm177_vm0, %v4069_v46  ;;  %16389 = vmatprep.subr.bf16.mxu1 %v17742_v30 }
 0x9f5   :  { %v4070_v12 = vsub.f32 %v3974_v31, %v4059_v5  ;;  %16371 = vmatpush3.bf16.msra.mxu0 %v17732_v6  ;;  %14839 = vmatprep.mubr.msk.f32.mxu1 %vm177_vm0, %v4233_v57 }
 0x9f6   :  { %14840 = vmatmul.mubr.msk.f32.gmra.mrb[50].mxu1 %vm177_vm0, %v14799_v55  ;;  %16373 = vmatprep.subr.bf16.mxu0 %v17742_v30 }
 0x9f7   :  { %14811 = vmatprep.mubr.msk.f32.mxu0 %vm177_vm0, %v4070_v12  ;;  %16391 = vmatpush3.bf16.msra.mxu1 %v17742_v30 }
 0x9f8   :  { %14850 = vmatprep.mubr.msk.f32.mxu1 %vm177_vm0, %v4068_v53  ;;  %14812 = vmatmul.mubr.msk.f32.gmra.mrb[86].mxu0 %vm177_vm0, %v4071_v2 }
 0x9f9   :  { %16375 = vmatpush3.bf16.msra.mxu0 %v17742_v30  ;;  %14822 = vmatprep.mubr.msk.f32.mxu0 %vm177_vm0, %v4223_v52 }
 0x9fa   :  { %14851 = vmatmul.mubr.msk.f32.vlgmr.msra.gmra.mrb[48].mxu1 %vm177_vm0, %v4069_v46 }
 0x9fb   :  { %14853 = vmatprep.mubr.msk.f32.mxu1 %vm177_vm0, %v4070_v12 }
 0x9fc   :  { %14823 = vmatmul.mubr.msk.f32.vlgmr.msra.gmra.mrb[88].mxu0 %vm177_vm0, %v14796_v18  ;;  %v12615_v18 = vld [vmem:[%s19489_s15 + $0x30] sm:$0xff] }
 0x9fd   :  { %14825 = vmatprep.mubr.msk.f32.mxu0 %vm177_vm0, %v4233_v57 }
 0x9fe   :  { %14854 = vmatmul.mubr.msk.f32.gmra.mrb[50].mxu1 %vm177_vm0, %v4071_v2 }
 0x9ff   :  { %14892 = vmatprep.mubr.msk.f32.mxu1 %vm177_vm0, %v18059_v43 }
 0xa00   :  { %14826 = vmatmul.mubr.msk.f32.gmra.mrb[90].mxu0 %vm177_vm0, %v14799_v55 }
 0xa01   :  { %14864 = vmatprep.mubr.msk.f32.mxu0 %vm177_vm0, %v18066_v44 }
 0xac7   :  { %v14810_v56 = vpop.f32.mrb[84].mxu0 }
 0xac8   :  { %v4320_v13 = vpop.f32.mrb[85].mxu0 }
 0xacb   :  { %v14813_v7 = vpop.f32.mrb[86].mxu0 }
 0xacc   :  { %v4330_v8 = vpop.f32.mrb[87].mxu0 }
 0xacd   :  { %v14852_v36 = vpop.f32.mrb[48].mxu1 }
 0xace   :  { %v4591_v15 = vpop.f32.mrb[49].mxu1  ;;  %v4615_v3 = vmul.f32 %v14852_v36, %v12618_v10  ;;  %v4627_v4 = vmul.f32 %v14852_v36, %v12614_v39 }
 0xacf   :  { %v14824_v14 = vpop.f32.mrb[88].mxu0  ;;  %v4614_v29 = vmul.f32 %v12617_v40, %v4591_v15  ;;  %v4626_v47 = vmul.f32 %v12613_v16, %v4591_v15 }
 0xad0   :  { %v4437_v41 = vsub.f32 %v14810_v56, %v14824_v14  ;;  %v4417_v50 = vpop.f32.mrb[89].mxu0 }
 0xad1   :  { %v4436_v9 = vsub.f32 %v4320_v13, %v4417_v50  ;;  %v14855_v11 = vpop.f32.mrb[50].mxu1 }
 0xad2   :  { %v4611_v31 = vmul.f32 %v12614_v39, %v4437_v41  ;;  %v4623_v42 = vmul.f32 %v12618_v10, %v4437_v41  ;;  %v4601_v46 = vpop.f32.mrb[51].mxu1  ;;  %v4617_v53 = vmul.f32 %v14855_v11, %v12620_v1  ;;  %v4629_v54 = vmul.f32 %v14855_v11, %v12616_v51  ;;  %v18265_v10 = vld [vmem:[%s19486_s17 + $0x8] sm:$0xff] }
 0xad3   :  { %v4610_v19 = vmul.f32 %v12613_v16, %v4436_v9  ;;  %v4622_v52 = vmul.f32 %v12617_v40, %v4436_v9  ;;  %v14827_v55 = vpop.f32.mrb[90].mxu0  ;;  %v4616_v57 = vmul.f32 %v12619_v59, %v4601_v46  ;;  %v4628_v15 = vmul.f32 %v12615_v18, %v4601_v46 }
 0xad4   :  { %v4619_v2 = vsub.f32 %v4611_v31, %v4615_v3  ;;  %v4631_v5 = vadd.f32 %v4627_v4, %v4623_v42  ;;  %v4439_v12 = vsub.f32 %v14813_v7, %v14827_v55  ;;  %v4427_v56 = vpop.f32.mrb[91].mxu0  ;;  %v18272_v7 = vld [vmem:[%s19486_s17] sm:$0xff] }
 0xad5   :  { %v4618_v13 = vsub.f32 %v4610_v19, %v4614_v29  ;;  %v4630_v36 = vadd.f32 %v4626_v47, %v4622_v52  ;;  %v4438_v39 = vsub.f32 %v4330_v8, %v4427_v56 }
 0xad6   :  { %v4635_v16 = vmul.f32 %v18265_v10, %v4619_v2  ;;  %v4639_v40 = vmul.f32 %v18265_v10, %v4631_v5  ;;  %v4613_v14 = vmul.f32 %v12616_v51, %v4439_v12  ;;  %v4625_v41 = vmul.f32 %v12620_v1, %v4439_v12  ;;  %v18279_v51 = vld [vmem:[%s19486_s17 + $0x18] sm:$0xff] }
 0xad7   :  { %v4634_v50 = vmul.f32 %v18272_v7, %v4618_v13  ;;  %v4638_v8 = vmul.f32 %v18272_v7, %v4630_v36  ;;  %v4612_v3 = vmul.f32 %v12615_v18, %v4438_v39  ;;  %v4624_v4 = vmul.f32 %v12619_v59, %v4438_v39  ;;  %v18286_v18 = vld [vmem:[%s19486_s17 + $0x10] sm:$0xff] }
 0xad8   :  { %v4621_v9 = vsub.f32 %v4613_v14, %v4617_v53  ;;  %v4633_v11 = vadd.f32 %v4629_v54, %v4625_v41  ;;  %19547 = vst [vmem:[#allocation3_spill] sm:$0xff] %v18286_v18 }
 0xad9   :  { %v4620_v29 = vsub.f32 %v4612_v3, %v4616_v57  ;;  %v4632_v47 = vadd.f32 %v4628_v15, %v4624_v4  ;;  %v16392_v31 = vpack.c.bf16 %v4635_v16, %v4634_v50  ;;  %v16400_v42 = vpack.c.bf16 %v4639_v40, %v4638_v8  ;;  %v139_v4 = vld [vmem:[%s19491_s13 + $0x8] sm:$0xff] }
 0xada   :  { %v4637_v1 = vmul.f32 %v18279_v51, %v4621_v9  ;;  %v4641_v46 = vmul.f32 %v18279_v51, %v4633_v11  ;;  %v143_v9 = vld [vmem:[%s19492_s14 + $0x8] sm:$0xff] }
 0xadb   :  { %v4636_v59 = vmul.f32 %v18286_v18, %v4620_v29  ;;  %v4640_v19 = vmul.f32 %v18286_v18, %v4632_v47  ;;  %16393 = vmatprep.subr.bf16.mxu0 %v16392_v31  ;;  %16409 = vmatprep.subr.bf16.mxu1 %v16392_v31  ;;  %v138_v29 = vld [vmem:[%s19491_s13] sm:$0xff] }
 0xadc   :  { %16395 = vmatpush3.bf16.msra.mxu0 %v16392_v31  ;;  %16411 = vmatpush3.bf16.msra.mxu1 %v16392_v31  ;;  %v142_v47 = vld [vmem:[%s19492_s14] sm:$0xff] }
 0xadd   :  { %v16396_v52 = vpack.c.bf16 %v4637_v1, %v4636_v59  ;;  %v16404_v53 = vpack.c.bf16 %v4641_v46, %v4640_v19  ;;  %v145_v46 = vld [vmem:[%s19492_s14 + $0x18] sm:$0xff] }
 0xadf   :  { %16397 = vmatprep.subr.bf16.mxu0 %v16396_v52  ;;  %16413 = vmatprep.subr.bf16.mxu1 %v16396_v52 }
 0xae0   :  { %16399 = vmatpush3.bf16.msra.mxu0 %v16396_v52  ;;  %16415 = vmatpush3.bf16.msra.mxu1 %v16396_v52 }
 0xae1   :  { %16401 = vmatprep.subr.bf16.mxu0 %v16400_v42  ;;  %16417 = vmatprep.subr.bf16.mxu1 %v16400_v42 }
 0xae3   :  { %14865 = vmatmul.mubr.msk.f32.vlgmr.msra.gmra.mrb[92].mxu0 %vm177_vm0, %v18017_v58  ;;  %14893 = vmatmul.mubr.msk.f32.vlgmr.msra.gmra.mrb[52].mxu1 %vm177_vm0, %v18024_v62 }
 0xae4   :  { %16403 = vmatpush3.bf16.msra.mxu0 %v16400_v42  ;;  %16419 = vmatpush3.bf16.msra.mxu1 %v16400_v42 }
 0xae5   :  { %16405 = vmatprep.subr.bf16.mxu0 %v16404_v53  ;;  %16421 = vmatprep.subr.bf16.mxu1 %v16404_v53 }
 0xae6   :  { %14867 = vmatprep.mubr.msk.f32.mxu0 %vm177_vm0, %v18031_v32  ;;  %14895 = vmatprep.mubr.msk.f32.mxu1 %vm177_vm0, %v18038_v33 }
 0xae7   :  { %14868 = vmatmul.mubr.msk.f32.gmra.mrb[94].mxu0 %vm177_vm0, %v18045_v61  ;;  %14896 = vmatmul.mubr.msk.f32.gmra.mrb[54].mxu1 %vm177_vm0, %v18052_v28 }
 0xae8   :  { %16407 = vmatpush3.bf16.msra.mxu0 %v16404_v53  ;;  %16423 = vmatpush3.bf16.msra.mxu1 %v16404_v53 }
 0xae9   :  { %14878 = vmatprep.mubr.msk.f32.mxu0 %vm177_vm0, %v18059_v43  ;;  %14906 = vmatprep.mubr.msk.f32.mxu1 %vm177_vm0, %v18066_v44 }
 0xaea   :  { %16441 = vmatprep.subr.bf16.mxu1 %v17536_v17  ;;  %16425 = vmatprep.subr.bf16.mxu0 %v17536_v17 }
 0xaeb   :  { %14879 = vmatmul.mubr.msk.f32.vlgmr.msra.gmra.mrb[96].mxu0 %vm177_vm0, %v18024_v62  ;;  %14907 = vmatmul.mubr.msk.f32.vlgmr.msra.gmra.mrb[52].mxu1 %vm177_vm0, %v18017_v58 }
 0xaec   :  { %14881 = vmatprep.mubr.msk.f32.mxu0 %vm177_vm0, %v18038_v33  ;;  %14909 = vmatprep.mubr.msk.f32.mxu1 %vm177_vm0, %v18031_v32 }
 0xaed   :  { %16443 = vmatpush3.bf16.msra.mxu1 %v17536_v17  ;;  %16427 = vmatpush3.bf16.msra.mxu0 %v17536_v17 }
 0xaee   :  { %16445 = vmatprep.subr.bf16.mxu1 %v17548_v20  ;;  %16429 = vmatprep.subr.bf16.mxu0 %v17548_v20 }
 0xaef   :  { %14882 = vmatmul.mubr.msk.f32.gmra.mrb[98].mxu0 %vm177_vm0, %v18052_v28  ;;  %14910 = vmatmul.mubr.msk.f32.gmra.mrb[54].mxu1 %vm177_vm0, %v18045_v61 }
 0xaf1   :  { %16447 = vmatpush3.bf16.msra.mxu1 %v17548_v20  ;;  %16431 = vmatpush3.bf16.msra.mxu0 %v17548_v20 }
 0xaf2   :  { %16449 = vmatprep.subr.bf16.mxu1 %v17560_v23  ;;  %16433 = vmatprep.subr.bf16.mxu0 %v17560_v23 }
 0xbb6   :  { %v14866_v62 = vpop.f32.mrb[92].mxu0 }
 0xbb7   :  { %v4708_v33 = vpop.f32.mrb[93].mxu0 }
 0xbba   :  { %v14869_v43 = vpop.f32.mrb[94].mxu0 }
 0xbbb   :  { %v4718_v54 = vpop.f32.mrb[95].mxu0 }
 0xbbe   :  { %v14880_v55 = vpop.f32.mrb[96].mxu0  ;;  %v14908_v2 = vpop.f32.mrb[52].mxu1 }
 0xbbf   :  { %v4813_v5 = vsub.f32 %v14866_v62, %v14880_v55  ;;  %v4793_v57 = vpop.f32.mrb[97].mxu0  ;;  %v4967_v28 = vpop.f32.mrb[53].mxu1 }
 0xbc0   :  { %v4812_v12 = vsub.f32 %v4708_v33, %v4793_v57  ;;  %14948 = vmatprep.mubr.msk.f32.mxu1 %vm177_vm0, %v4967_v28  ;;  %v141_v33 = vld [vmem:[%s19491_s13 + $0x18] sm:$0xff]  ;;  %v140_v57 = vld [vmem:[%s19491_s13 + $0x10] sm:$0xff] }
 0xbc1   :  { %14949 = vmatmul.mubr.msk.f32.vlgmr.msra.gmra.mrb[56].mxu1 %vm177_vm0, %v14908_v2 }
 0xbc2   :  { %v14883_v56 = vpop.f32.mrb[98].mxu0  ;;  %v14911_v13 = vpop.f32.mrb[54].mxu1  ;;  %14920 = vmatprep.mubr.msk.f32.mxu0 %vm177_vm0, %v4812_v12  ;;  %16451 = vmatpush3.bf16.msra.mxu1 %v17560_v23 }
 0xbc3   :  { %v4815_v36 = vsub.f32 %v14869_v43, %v14883_v56  ;;  %v4803_v15 = vpop.f32.mrb[99].mxu0  ;;  %v4977_v39 = vpop.f32.mrb[55].mxu1  ;;  %14921 = vmatmul.mubr.msk.f32.vlgmr.msra.gmra.mrb[100].mxu0 %vm177_vm0, %v4813_v5  ;;  %16453 = vmatprep.subr.bf16.mxu1 %v17580_v34 }
 0xbc4   :  { %v4814_v16 = vsub.f32 %v4718_v54, %v4803_v15  ;;  %16435 = vmatpush3.bf16.msra.mxu0 %v17560_v23  ;;  %14951 = vmatprep.mubr.msk.f32.mxu1 %vm177_vm0, %v4977_v39 }
 0xbc5   :  { %14952 = vmatmul.mubr.msk.f32.gmra.mrb[58].mxu1 %vm177_vm0, %v14911_v13  ;;  %16437 = vmatprep.subr.bf16.mxu0 %v17580_v34 }
 0xbc6   :  { %14923 = vmatprep.mubr.msk.f32.mxu0 %vm177_vm0, %v4814_v16  ;;  %16455 = vmatpush3.bf16.msra.mxu1 %v17580_v34 }
 0xbc7   :  { %14962 = vmatprep.mubr.msk.f32.mxu1 %vm177_vm0, %v4812_v12  ;;  %14924 = vmatmul.mubr.msk.f32.gmra.mrb[102].mxu0 %vm177_vm0, %v4815_v36 }
 0xbc8   :  { %16439 = vmatpush3.bf16.msra.mxu0 %v17580_v34  ;;  %14934 = vmatprep.mubr.msk.f32.mxu0 %vm177_vm0, %v4967_v28  ;;  %v144_v28 = vld [vmem:[%s19492_s14 + $0x10] sm:$0xff] }
 0xbc9   :  { %14963 = vmatmul.mubr.msk.f32.vlgmr.msra.gmra.mrb[56].mxu1 %vm177_vm0, %v4813_v5 }
 0xbca   :  { %14965 = vmatprep.mubr.msk.f32.mxu1 %vm177_vm0, %v4814_v16 }
 0xbcb   :  { %14935 = vmatmul.mubr.msk.f32.vlgmr.msra.gmra.mrb[104].mxu0 %vm177_vm0, %v14908_v2 }
 0xbcc   :  { %14937 = vmatprep.mubr.msk.f32.mxu0 %vm177_vm0, %v4977_v39 }
 0xbcd   :  { %14966 = vmatmul.mubr.msk.f32.gmra.mrb[58].mxu1 %vm177_vm0, %v4815_v36 }
 0xbce   :  { %15004 = vmatprep.mubr.msk.f32.mxu1 %vm177_vm0, %v18116_v48 }
 0xbcf   :  { %14938 = vmatmul.mubr.msk.f32.gmra.mrb[106].mxu0 %vm177_vm0, %v14911_v13 }
 0xbd0   :  { %14976 = vmatprep.mubr.msk.f32.mxu0 %vm177_vm0, %v18124_v49 }
 0xc96   :  { %v14922_v40 = vpop.f32.mrb[100].mxu0 }
 0xc97   :  { %v5064_v14 = vpop.f32.mrb[101].mxu0 }
 0xc9a   :  { %v14925_v41 = vpop.f32.mrb[102].mxu0 }
 0xc9b   :  { %v5074_v50 = vpop.f32.mrb[103].mxu0 }
 0xc9c   :  { %v14964_v8 = vpop.f32.mrb[56].mxu1 }
 0xc9d   :  { %v5335_v3 = vpop.f32.mrb[57].mxu1  ;;  %v5359_v19 = vmul.f32 %v14964_v8, %v143_v9  ;;  %v5371_v52 = vmul.f32 %v14964_v8, %v139_v4 }
 0xc9e   :  { %v14936_v11 = vpop.f32.mrb[104].mxu0  ;;  %v5358_v54 = vmul.f32 %v5335_v3, %v142_v47  ;;  %v5370_v55 = vmul.f32 %v5335_v3, %v138_v29 }
 0xc9f   :  { %v5181_v31 = vsub.f32 %v14922_v40, %v14936_v11  ;;  %v5161_v42 = vpop.f32.mrb[105].mxu0 }
 0xca0   :  { %v5180_v1 = vsub.f32 %v5064_v14, %v5161_v42  ;;  %v14967_v59 = vpop.f32.mrb[58].mxu1 }
 0xca1   :  { %v5355_v53 = vmul.f32 %v5181_v31, %v139_v4  ;;  %v5367_v62 = vmul.f32 %v5181_v31, %v143_v9  ;;  %v5345_v43 = vpop.f32.mrb[59].mxu1  ;;  %v5361_v36 = vmul.f32 %v14967_v59, %v145_v46  ;;  %v5373_v14 = vmul.f32 %v14967_v59, %v141_v33  ;;  %v12881_v59 = vld [vmem:[%s19537_s0 + $0x20] sm:$0xff] }
 0xca2   :  { %v5354_v2 = vmul.f32 %v5180_v1, %v138_v29  ;;  %v5366_v5 = vmul.f32 %v5180_v1, %v142_v47  ;;  %v14939_v12 = vpop.f32.mrb[106].mxu0  ;;  %v5360_v3 = vmul.f32 %v5345_v43, %v144_v28  ;;  %v5372_v4 = vmul.f32 %v5345_v43, %v140_v57 }
 0xca3   :  { %v5363_v56 = vsub.f32 %v5355_v53, %v5359_v19  ;;  %v5375_v13 = vadd.f32 %v5371_v52, %v5367_v62  ;;  %v5183_v15 = vsub.f32 %v14925_v41, %v14939_v12  ;;  %v5171_v39 = vpop.f32.mrb[107].mxu0  ;;  %v12882_v53 = vld [vmem:[%s19537_s0 + $0x28] sm:$0xff] }
 0xca4   :  { %v5362_v16 = vsub.f32 %v5354_v2, %v5358_v54  ;;  %v5374_v40 = vadd.f32 %v5370_v55, %v5366_v5  ;;  %v5182_v8 = vsub.f32 %v5074_v50, %v5171_v39  ;;  %v12883_v55 = vld [vmem:[%s19537_s0 + $0x30] sm:$0xff]  ;;  %v12884_v2 = vld [vmem:[%s19537_s0 + $0x38] sm:$0xff]  ;;  %v18438_v5 = vpack.c.bf16 %v12882_v53, %v12881_v59 }
 0xca5   :  { %v5357_v9 = vmul.f32 %v5183_v15, %v141_v33  ;;  %v5369_v11 = vmul.f32 %v5183_v15, %v145_v46  ;;  %v120_v59 = vld [vmem:[%s19494_s19 + $0x10] sm:$0xff]  ;;  %v121_v53 = vld [vmem:[%s19494_s19 + $0x18] sm:$0xff] }
 0xca6   :  { %v16456_v29 = vpack.c.bf16 %v5363_v56, %v5362_v16  ;;  %v16464_v47 = vpack.c.bf16 %v5375_v13, %v5374_v40  ;;  %v5356_v31 = vmul.f32 %v5182_v8, %v140_v57  ;;  %v5368_v42 = vmul.f32 %v5182_v8, %v144_v28 }
 0xca7   :  { %v5365_v1 = vsub.f32 %v5357_v9, %v5361_v36  ;;  %v5377_v0 = vadd.f32 %v5373_v14, %v5369_v11  ;;  %v18444_v57 = vpack.c.bf16 %v12884_v2, %v12883_v55 }
 0xca8   :  { %v5364_v18 = vsub.f32 %v5356_v31, %v5360_v3  ;;  %v5376_v19 = vadd.f32 %v5372_v4, %v5368_v42  ;;  %16457 = vmatprep.subr.bf16.mxu0 %v16456_v29  ;;  %16473 = vmatprep.subr.bf16.mxu1 %v16456_v29 }
 0xca9   :  { %16459 = vmatpush3.bf16.msra.mxu0 %v16456_v29  ;;  %16475 = vmatpush3.bf16.msra.mxu1 %v16456_v29 }
 0xcaa   :  { %v16460_v41 = vpack.c.bf16 %v5365_v1, %v5364_v18  ;;  %v16468_v52 = vpack.c.bf16 %v5377_v0, %v5376_v19 }
 0xcac   :  { %16461 = vmatprep.subr.bf16.mxu0 %v16460_v41  ;;  %16477 = vmatprep.subr.bf16.mxu1 %v16460_v41 }
 0xcad   :  { %16463 = vmatpush3.bf16.msra.mxu0 %v16460_v41  ;;  %16479 = vmatpush3.bf16.msra.mxu1 %v16460_v41 }
 0xcae   :  { %16465 = vmatprep.subr.bf16.mxu0 %v16464_v47  ;;  %16481 = vmatprep.subr.bf16.mxu1 %v16464_v47 }
 0xcb0   :  { %14977 = vmatmul.mubr.msk.f32.vlgmr.msra.gmra.mrb[108].mxu0 %vm177_vm0, %v18147_v22  ;;  %15005 = vmatmul.mubr.msk.f32.vlgmr.msra.gmra.mrb[60].mxu1 %vm177_vm0, %v18154_v35 }
 0xcb1   :  { %16467 = vmatpush3.bf16.msra.mxu0 %v16464_v47  ;;  %16483 = vmatpush3.bf16.msra.mxu1 %v16464_v47 }
 0xcb2   :  { %16469 = vmatprep.subr.bf16.mxu0 %v16468_v52  ;;  %16485 = vmatprep.subr.bf16.mxu1 %v16468_v52 }
 0xcb3   :  { %14979 = vmatprep.mubr.msk.f32.mxu0 %vm177_vm0, %v18161_v37  ;;  %15007 = vmatprep.mubr.msk.f32.mxu1 %vm177_vm0, %v18168_v38 }
 0xcb4   :  { %14980 = vmatmul.mubr.msk.f32.gmra.mrb[110].mxu0 %vm177_vm0, %v18175_v45  ;;  %15008 = vmatmul.mubr.msk.f32.gmra.mrb[62].mxu1 %vm177_vm0, %v18182_v21 }
 0xcb5   :  { %16471 = vmatpush3.bf16.msra.mxu0 %v16468_v52  ;;  %16487 = vmatpush3.bf16.msra.mxu1 %v16468_v52 }
 0xcb6   :  { %14990 = vmatprep.mubr.msk.f32.mxu0 %vm177_vm0, %v18116_v48  ;;  %15018 = vmatprep.mubr.msk.f32.mxu1 %vm177_vm0, %v18124_v49 }
 0xcb7   :  { %16505 = vmatprep.subr.bf16.mxu1 %v17708_v60  ;;  %16489 = vmatprep.subr.bf16.mxu0 %v17708_v60 }
 0xcb8   :  { %14991 = vmatmul.mubr.msk.f32.vlgmr.msra.gmra.mrb[112].mxu0 %vm177_vm0, %v18154_v35  ;;  %15019 = vmatmul.mubr.msk.f32.vlgmr.msra.gmra.mrb[60].mxu1 %vm177_vm0, %v18147_v22 }
 0xcb9   :  { %14993 = vmatprep.mubr.msk.f32.mxu0 %vm177_vm0, %v18168_v38  ;;  %15021 = vmatprep.mubr.msk.f32.mxu1 %vm177_vm0, %v18161_v37 }
 0xcba   :  { %16507 = vmatpush3.bf16.msra.mxu1 %v17708_v60  ;;  %16491 = vmatpush3.bf16.msra.mxu0 %v17708_v60 }
 0xcbb   :  { %16509 = vmatprep.subr.bf16.mxu1 %v17720_v63  ;;  %16493 = vmatprep.subr.bf16.mxu0 %v17720_v63 }
 0xcbc   :  { %14994 = vmatmul.mubr.msk.f32.gmra.mrb[114].mxu0 %vm177_vm0, %v18182_v21  ;;  %15022 = vmatmul.mubr.msk.f32.gmra.mrb[62].mxu1 %vm177_vm0, %v18175_v45 }
 0xcbe   :  { %16511 = vmatpush3.bf16.msra.mxu1 %v17720_v63  ;;  %16495 = vmatpush3.bf16.msra.mxu0 %v17720_v63 }
 0xcbf   :  { %16513 = vmatprep.subr.bf16.mxu1 %v17732_v6  ;;  %16497 = vmatprep.subr.bf16.mxu0 %v17732_v6 }
 0xd83   :  { %v14978_v0 = vpop.f32.mrb[108].mxu0 }
 0xd84   :  { %v5444_v48 = vpop.f32.mrb[109].mxu0 }
 0xd87   :  { %v14981_v49 = vpop.f32.mrb[110].mxu0 }
 0xd88   :  { %v5454_v22 = vpop.f32.mrb[111].mxu0 }
 0xd8b   :  { %v14992_v35 = vpop.f32.mrb[112].mxu0  ;;  %v15020_v37 = vpop.f32.mrb[60].mxu1 }
 0xd8c   :  { %v5549_v38 = vsub.f32 %v14978_v0, %v14992_v35  ;;  %v5529_v18 = vpop.f32.mrb[113].mxu0  ;;  %v5703_v21 = vpop.f32.mrb[61].mxu1 }
 0xd8d   :  { %v5548_v50 = vsub.f32 %v5444_v48, %v5529_v18  ;;  %15060 = vmatprep.mubr.msk.f32.mxu1 %vm177_vm0, %v5703_v21 }
 0xd8e   :  { %15061 = vmatmul.mubr.msk.f32.vlgmr.msra.gmra.mrb[64].mxu1 %vm177_vm0, %v15020_v37 }
 0xd8f   :  { %v14995_v45 = vpop.f32.mrb[114].mxu0  ;;  %v15023_v46 = vpop.f32.mrb[62].mxu1  ;;  %15032 = vmatprep.mubr.msk.f32.mxu0 %vm177_vm0, %v5548_v50  ;;  %16515 = vmatpush3.bf16.msra.mxu1 %v17732_v6 }
 0xd90   :  { %v5551_v62 = vsub.f32 %v14981_v49, %v14995_v45  ;;  %v5539_v33 = vpop.f32.mrb[115].mxu0  ;;  %v5713_v43 = vpop.f32.mrb[63].mxu1  ;;  %15033 = vmatmul.mubr.msk.f32.vlgmr.msra.gmra.mrb[116].mxu0 %vm177_vm0, %v5549_v38  ;;  %16517 = vmatprep.subr.bf16.mxu1 %v17742_v30  ;;  %v119_v45 = vld [vmem:[%s19494_s19 + $0x8] sm:$0xff] }
 0xd91   :  { %v5550_v54 = vsub.f32 %v5454_v22, %v5539_v33  ;;  %16499 = vmatpush3.bf16.msra.mxu0 %v17732_v6  ;;  %15063 = vmatprep.mubr.msk.f32.mxu1 %vm177_vm0, %v5713_v43 }
 0xd92   :  { %15064 = vmatmul.mubr.msk.f32.gmra.mrb[66].mxu1 %vm177_vm0, %v15023_v46  ;;  %16501 = vmatprep.subr.bf16.mxu0 %v17742_v30 }
 0xd93   :  { %15035 = vmatprep.mubr.msk.f32.mxu0 %vm177_vm0, %v5550_v54  ;;  %16519 = vmatpush3.bf16.msra.mxu1 %v17742_v30 }
 0xd94   :  { %15074 = vmatprep.mubr.msk.f32.mxu1 %vm177_vm0, %v5548_v50  ;;  %15036 = vmatmul.mubr.msk.f32.gmra.mrb[118].mxu0 %vm177_vm0, %v5551_v62 }
 0xd95   :  { %16503 = vmatpush3.bf16.msra.mxu0 %v17742_v30  ;;  %15046 = vmatprep.mubr.msk.f32.mxu0 %vm177_vm0, %v5703_v21 }
 0xd96   :  { %15075 = vmatmul.mubr.msk.f32.vlgmr.msra.gmra.mrb[64].mxu1 %vm177_vm0, %v5549_v38  ;;  %16537 = vmatprep.subr.bf16.mxu1 %v18438_v5 }
 0xd97   :  { %15077 = vmatprep.mubr.msk.f32.mxu1 %vm177_vm0, %v5550_v54  ;;  %16539 = vmatpush3.bf16.msra.mxu1 %v18438_v5 }
 0xd98   :  { %15047 = vmatmul.mubr.msk.f32.vlgmr.msra.gmra.mrb[120].mxu0 %vm177_vm0, %v15020_v37  ;;  %16541 = vmatprep.subr.bf16.mxu1 %v18444_v57 }
 0xd99   :  { %15049 = vmatprep.mubr.msk.f32.mxu0 %vm177_vm0, %v5713_v43 }
 0xd9a   :  { %15078 = vmatmul.mubr.msk.f32.gmra.mrb[66].mxu1 %vm177_vm0, %v5551_v62  ;;  %v18518_v62 = vpack.c.bf16 %v121_v53, %v120_v59  ;;  %v17245_v53 = vld [vmem:[%s19543_s2] sm:$0xff] }
 0xd9b   :  { %16543 = vmatpush3.bf16.msra.mxu1 %v18444_v57  ;;  %15110 = vmatprep.mubr.msk.f32.mxu1 %vm177_vm0, %v18066_v44  ;;  %v116_v44 = vld [vmem:[%s19493_s18] sm:$0xff] }
 0xd9c   :  { %15050 = vmatmul.mubr.msk.f32.gmra.mrb[122].mxu0 %vm177_vm0, %v15023_v46  ;;  %16553 = vmatprep.subr.bf16.mxu1 %v17536_v17  ;;  %19549 = vst [vmem:[#allocation5_spill] sm:$0xff] %v18518_v62 }
 0xd9d   :  { %15088 = vmatprep.mubr.msk.f32.mxu0 %vm177_vm0, %v116_v44 }
 0xd9e   :  { %15111 = vmatmul.mubr.msk.f32.vlgmr.msra.gmra.mrb[68].mxu1 %vm177_vm0, %v18017_v58 }
 0xd9f   :  { %15113 = vmatprep.mubr.msk.f32.mxu1 %vm177_vm0, %v18031_v32  ;;  %16555 = vmatpush3.bf16.msra.mxu1 %v17536_v17 }
 0xda0   :  { %16557 = vmatprep.subr.bf16.mxu1 %v17548_v20 }
 0xda2   :  { %15114 = vmatmul.mubr.msk.f32.gmra.mrb[70].mxu1 %vm177_vm0, %v18045_v61 }
 0xda3   :  { %16559 = vmatpush3.bf16.msra.mxu1 %v17548_v20 }
 0xda4   :  { %16561 = vmatprep.subr.bf16.mxu1 %v17560_v23 }
 0xe63   :  { %v15034_v58 = vpop.f32.mrb[116].mxu0 }
 0xe64   :  { %v5800_v28 = vpop.f32.mrb[117].mxu0 }
 0xe67   :  { %v15037_v32 = vpop.f32.mrb[118].mxu0 }
 0xe68   :  { %v5810_v12 = vpop.f32.mrb[119].mxu0 }
 0xe69   :  { %v15076_v56 = vpop.f32.mrb[64].mxu1 }
 0xe6a   :  { %v6071_v13 = vpop.f32.mrb[65].mxu1  ;;  %v6095_v40 = vmul.f32 %v15076_v56, %v15076_v56  ;;  %v18577_v56 = vld [vmem:[%s19538_s9 + $0x8] sm:$0xff] }
 0xe6b   :  { %v15048_v36 = vpop.f32.mrb[120].mxu0  ;;  %v6094_v3 = vmul.f32 %v6071_v13, %v6071_v13  ;;  %v18584_v13 = vld [vmem:[%s19538_s9 + $0x10] sm:$0xff] }
 0xe6c   :  { %v5917_v15 = vsub.f32 %v15034_v58, %v15048_v36  ;;  %v5897_v39 = vpop.f32.mrb[121].mxu0  ;;  %v18537_v58 = vld [vmem:[%s19536_s6] sm:$0xff]  ;;  %v18593_v36 = vld [vmem:[%s19538_s9 + $0x18] sm:$0xff] }
 0xe6d   :  { %v5916_v61 = vsub.f32 %v5800_v28, %v5897_v39  ;;  %v15079_v16 = vpop.f32.mrb[66].mxu1  ;;  %v19550_v28 = vmov 0.0  }
 0xe6e   :  { %v6091_v14 = vmul.f32 %v5917_v15, %v5917_v15  ;;  %v6081_v8 = vpop.f32.mrb[67].mxu1  ;;  %v6097_v19 = vmul.f32 %v15079_v16, %v15079_v16  ;;  %v164_v15 = vlaneseq }
 0xe6f   :  { %v6090_v4 = vmul.f32 %v5916_v61, %v5916_v61  ;;  %v15051_v9 = vpop.f32.mrb[122].mxu0  ;;  %v6096_v48 = vmul.f32 %v6081_v8, %v6081_v8 }
 0xe70   :  { %v6099_v11 = vadd.f32 %v6095_v40, %v6091_v14  ;;  %v5919_v29 = vsub.f32 %v15037_v32, %v15051_v9  ;;  %v5907_v47 = vpop.f32.mrb[123].mxu0  ;;  %v18547_v32 = vld [vmem:[%s19536_s6 + $0x8] sm:$0xff]  ;;  %v165_v39 = vshrl.u32 %v164_v15, 7  ;;  %v168_v16 = vand.u32 127, %v164_v15  ;;  %v17247_v15 = vld [vmem:[%s19543_s2 + $0x18] sm:$0xff] }
 0xe71   :  { %v6098_v31 = vadd.f32 %v6094_v3, %v6090_v4  ;;  %v5918_v42 = vsub.f32 %v5810_v12, %v5907_v47  ;;  %v15112_v1 = vpop.f32.mrb[68].mxu1  ;;  %v18570_v12 = vld [vmem:[%s19538_s9] sm:$0xff] }
 0xe72   :  { %v6093_v41 = vmul.f32 %v5919_v29, %v5919_v29  ;;  %v18476_v52 = vsub.f32 %v15112_v1, %v17564_v24  ;;  %v6347_v0 = vpop.f32.mrb[69].mxu1  ;;  %v166_v61 = vadd.s32 8, %v165_v39  ;;  %vm169_vm2 = vcmp.eq.s32.totalorder %v165_v39, %v168_v16 }
 0xe73   :  { %v6092_v49 = vmul.f32 %v5918_v42, %v5918_v42  ;;  %v18479_v22 = vsub.f32 %v6347_v0, %v17566_v25  ;;  %v16520_v35 = vpack.c.bf16 %v6099_v11, %v6098_v31  ;;  %v18603_v14 = vsel %vm169_vm2, 1.0, %v19550_v28  ;;  %v18640_v0 = vld [vmem:[%s19542_s5] sm:$0xff] }
 0xe74   :  { %v6101_v37 = vadd.f32 %v6097_v19, %v6093_v41  ;;  %vm170_vm1 = vcmp.eq.s32.totalorder %v166_v61, %v168_v16  ;;  %19552 = vst [vmem:[#allocation7_spill] sm:$0xff] %v18603_v14  ;;  %v18627_v41 = vld [vmem:[%s19541_s4] sm:$0xff]  ;;  %v17248_v61 = vld [vmem:[%s19544_s26 + $0x18] sm:$0xff] }
 0xe75   :  { %v6100_v38 = vadd.f32 %v6096_v48, %v6092_v49  ;;  %16521 = vmatprep.subr.bf16.mxu0 %v16520_v35  ;;  %v15115_v18 = vpop.f32.mrb[70].mxu1  ;;  %15146 = vmatprep.mubr.msk.f32.mxu1 %vm177_vm0, %v18479_v22  ;;  %v18600_v40 = vsel %vm170_vm1, 1.0, %v19550_v28 }
 0xe76   :  { %v18484_v21 = vsub.f32 %v15115_v18, %v17568_v26  ;;  %16523 = vmatpush3.bf16.msra.mxu0 %v16520_v35  ;;  %v6357_v24 = vpop.f32.mrb[71].mxu1  ;;  %15147 = vmatmul.mubr.msk.f32.vlgmr.msra.gmra.mrb[72].mxu1 %vm177_vm0, %v18476_v52  ;;  %v117_v26 = vld [vmem:[%s19493_s18 + $0x8] sm:$0xff]  ;;  %19551 = vst [vmem:[#allocation6_spill] sm:$0xff] %v18600_v40 }
 0xe77   :  { %v18489_v50 = vsub.f32 %v6357_v24, %v17570_v27  ;;  %v16524_v25 = vpack.c.bf16 %v6101_v37, %v6100_v38  ;;  %16563 = vmatpush3.bf16.msra.mxu1 %v17560_v23  ;;  %v118_v27 = vld [vmem:[%s19494_s19] sm:$0xff]  ;;  %v17243_v24 = vld [vmem:[%s19543_s2 + $0x8] sm:$0xff] }
 0xe78   :  { %16565 = vmatprep.subr.bf16.mxu1 %v17580_v34  ;;  %v18508_v46 = vpack.c.bf16 %v119_v45, %v118_v27 }
 0xe79   :  { %16525 = vmatprep.subr.bf16.mxu0 %v16524_v25  ;;  %15149 = vmatprep.mubr.msk.f32.mxu1 %vm177_vm0, %v18489_v50 }
 0xe7a   :  { %16527 = vmatpush3.bf16.msra.mxu0 %v16524_v25  ;;  %15150 = vmatmul.mubr.msk.f32.gmra.mrb[74].mxu1 %vm177_vm0, %v18484_v21  ;;  %19548 = vst [vmem:[#allocation4_spill] sm:$0xff] %v18508_v46  ;;  %v17244_v25 = vld [vmem:[%s19544_s26 + $0x8] sm:$0xff] }
 0xe7b   :  { %16567 = vmatpush3.bf16.msra.mxu1 %v17580_v34  ;;  %16529 = vmatprep.subr.bf16.mxu0 %v18508_v46 }
 0xe7d   :  { %15089 = vmatmul.mubr.msk.f32.vlgmr.msra.gmra.mrb[124].mxu0 %vm177_vm0, %v117_v26 }
 0xe7e   :  { %16531 = vmatpush3.bf16.msra.mxu0 %v18508_v46 }
 0xe7f   :  { %16533 = vmatprep.subr.bf16.mxu0 %v18518_v62 }
 0xe82   :  { %16535 = vmatpush3.bf16.msra.mxu0 %v18518_v62 }
 0xe83   :  { %16545 = vmatprep.subr.bf16.mxu0 %v18438_v5 }
 0xf49   :  { %v18523_v33 = vpop.f32.mrb[72].mxu1 }
 0xf4a   :  { %v18525_v43 = vpop.f32.mrb[73].mxu1 }
 0xf4d   :  { %v18527_v54 = vpop.f32.mrb[74].mxu1 }
 0xf4e   :  { %v18529_v55 = vpop.f32.mrb[75].mxu1 }
 0xf50   :  { %v15090_v2 = vpop.f32.mrb[124].mxu0 }
 0xf51   :  { %v6174_v44 = vpop.f32.mrb[125].mxu0 }
 0xf52   :  { %15099 = vmatprep.mubr.msk.f32.mxu0 %vm177_vm0, %v6174_v44 }
 0xf53   :  { %15100 = vmatmul.mubr.msk.f32.vlgmr.msra.gmra.mrb[126].mxu0 %vm177_vm0, %v15090_v2 }
 0xf54   :  { %16547 = vmatpush3.bf16.msra.mxu0 %v18438_v5  ;;  %15124 = vmatprep.mubr.msk.f32.mxu0 %vm177_vm0, %v18537_v58  ;;  %v18555_v5 = vld [vmem:[%s19536_s6 + $0x10] sm:$0xff] }
 0xf55   :  { %16549 = vmatprep.subr.bf16.mxu0 %v18444_v57 }
 0xf58   :  { %16551 = vmatpush3.bf16.msra.mxu0 %v18444_v57  ;;  %v18563_v57 = vld [vmem:[%s19536_s6 + $0x18] sm:$0xff] }
 0xf59   :  { %15130 = vmatprep.subr.mxu0 %v19550_v28 }
 0xf5b   :  { %15125 = vmatmul.mubr.msk.f32.vlgmr.msra.gmra.mrb[128].mxu0 %vm177_vm0, %v18547_v32 }
 0xf5c   :  { %15131 = vmatpush3.msra.mxu0 %v19550_v28  ;;  %15127 = vmatprep.mubr.msk.f32.mxu0 %vm177_vm0, %v18555_v5 }
 0xf5d   :  { %16569 = vmatprep.subr.bf16.mxu0 %v17536_v17 }
 0xf5f   :  { %15128 = vmatmul.mubr.msk.f32.gmra.mrb[130].mxu0 %vm177_vm0, %v18563_v57 }
 0xf60   :  { %15132 = vmatprep.mubr.msk.f32.mxu0 %vm177_vm0, %v18570_v12 }
 0xf63   :  { %15133 = vmatmul.mubr.msk.f32.vlgmr.msra.gmra.mrb[128].mxu0 %vm177_vm0, %v18577_v56 }
 0xf64   :  { %15135 = vmatprep.mubr.msk.f32.mxu0 %vm177_vm0, %v18584_v13  ;;  %16571 = vmatpush3.bf16.msra.mxu0 %v17536_v17 }
 0xf65   :  { %16573 = vmatprep.subr.bf16.mxu0 %v17548_v20 }
 0xf67   :  { %15136 = vmatmul.mubr.msk.f32.gmra.mrb[130].mxu0 %vm177_vm0, %v18593_v36 }
 0xf68   :  { %16575 = vmatpush3.bf16.msra.mxu0 %v17548_v20 }
 0xf69   :  { %16577 = vmatprep.subr.bf16.mxu0 %v17560_v23 }
0x1026   :  { %v15101_v8 = vpop.f32.mrb[126].mxu0 }
0x1027   :  { %v6265_v3 = vmul.f32 %v15101_v8, %v18600_v40  ;;  %v6255_v4 = vpop.f32.mrb[127].mxu0 }
0x1028   :  { %v6264_v9 = vmul.f32 %v6255_v4, %v18603_v14 }
0x1029   :  { %v6268_v11 = vsel %vm6266_vm3, %v6265_v3, 0.0 }
0x102a   :  { %v6267_v29 = vsel %vm6266_vm3, %v6264_v9, 0.0  ;;  %v17249_v9 = vld [vmem:[%s19543_s2 + $0x10] sm:$0xff] }
0x102b   :  { %v18609_v47 = vadd.f32 %v6268_v11, %v6267_v29  ;;  %v17250_v29 = vld [vmem:[%s19544_s26 + $0x10] sm:$0xff] }
0x102d   :  { %19553 = vst [vmem:[#allocation8_spill] sm:$0xff] %v18609_v47 }
0x1036   :  { %v15134_v31 = vpop.f32.mrb[128].mxu0 }
0x1037   :  { %v6521_v42 = vpop.f32.mrb[129].mxu0 }
0x1038   :  { %15160 = vmatprep.mubr.msk.f32.mxu1 %vm177_vm0, %v6521_v42  ;;  %15174 = vmatprep.mubr.msk.f32.mxu0 %vm177_vm0, %v6521_v42 }
0x1039   :  { %15161 = vmatmul.mubr.msk.f32.vlgmr.msra.gmra.mrb[76].mxu1 %vm177_vm0, %v15134_v31  ;;  %15175 = vmatmul.mubr.msk.f32.vlgmr.msra.gmra.mrb[132].mxu0 %vm177_vm0, %v15134_v31 }
0x103a   :  { %v15137_v1 = vpop.f32.mrb[130].mxu0  ;;  %16579 = vmatpush3.bf16.msra.mxu0 %v17560_v23 }
0x103b   :  { %v6531_v19 = vpop.f32.mrb[131].mxu0  ;;  %16581 = vmatprep.subr.bf16.mxu0 %v17580_v34 }
0x103c   :  { %15163 = vmatprep.mubr.msk.f32.mxu1 %vm177_vm0, %v6531_v19  ;;  %15177 = vmatprep.mubr.msk.f32.mxu0 %vm177_vm0, %v6531_v19 }
0x103d   :  { %15164 = vmatmul.mubr.msk.f32.gmra.mrb[78].mxu1 %vm177_vm0, %v15137_v1  ;;  %15178 = vmatmul.mubr.msk.f32.gmra.mrb[134].mxu0 %vm177_vm0, %v15137_v1 }
0x103e   :  { %16583 = vmatpush3.bf16.msra.mxu0 %v17580_v34  ;;  %15188 = vmatprep.mubr.msk.f32.mxu0 %vm177_vm0, %v18479_v22 }
0x103f   :  { %15202 = vmatprep.mubr.msk.f32.mxu1 %vm177_vm0, %v18627_v41 }
0x1041   :  { %15189 = vmatmul.mubr.msk.f32.vlgmr.msra.gmra.mrb[132].mxu0 %vm177_vm0, %v18476_v52 }
0x1042   :  { %15191 = vmatprep.mubr.msk.f32.mxu0 %vm177_vm0, %v18489_v50 }
0x1045   :  { %15192 = vmatmul.mubr.msk.f32.gmra.mrb[134].mxu0 %vm177_vm0, %v18484_v21 }
0x1046   :  { %15230 = vmatprep.mubr.msk.f32.mxu0 %vm177_vm0, %v18640_v0 }
0x110c   :  { %v15162_v48 = vpop.f32.mrb[76].mxu1 }
0x110d   :  { %v6735_v49 = vsub.f32 %v18523_v33, %v15162_v48  ;;  %v6715_v22 = vpop.f32.mrb[77].mxu1 }
0x110e   :  { %v6734_v52 = vsub.f32 %v18525_v43, %v6715_v22  ;;  %v17246_v43 = vld [vmem:[%s19544_s26] sm:$0xff] }
0x110f   :  { %v6909_v50 = vmul.f32 %v17243_v24, %v6735_v49  ;;  %v6921_v26 = vmul.f32 %v17244_v25, %v6735_v49 }
0x1110   :  { %v15165_v35 = vpop.f32.mrb[78].mxu1  ;;  %v6908_v33 = vmul.f32 %v17245_v53, %v6734_v52 }
0x1111   :  { %v6737_v37 = vsub.f32 %v18527_v54, %v15165_v35  ;;  %v6725_v38 = vpop.f32.mrb[79].mxu1  ;;  %v6920_v54 = vmul.f32 %v17246_v43, %v6734_v52 }
0x1112   :  { %v6736_v18 = vsub.f32 %v18529_v55, %v6725_v38 }
0x1113   :  { %v6911_v39 = vmul.f32 %v17247_v15, %v6737_v37  ;;  %v6923_v16 = vmul.f32 %v17248_v61, %v6737_v37 }
0x1114   :  { %v15190_v21 = vpop.f32.mrb[132].mxu0  ;;  %v6910_v11 = vmul.f32 %v17249_v9, %v6736_v18  ;;  %v6922_v31 = vmul.f32 %v17250_v29, %v6736_v18  ;;  %v18675_v18 = vld [vmem:[%s19541_s4 + $0x8] sm:$0xff] }
0x1115   :  { %v6913_v27 = vmul.f32 %v17244_v25, %v15190_v21  ;;  %v6925_v45 = vmul.f32 %v17243_v24, %v15190_v21  ;;  %v6889_v59 = vpop.f32.mrb[133].mxu0  ;;  %v18682_v25 = vld [vmem:[%s19542_s5 + $0x8] sm:$0xff] }
0x1116   :  { %v6912_v55 = vmul.f32 %v17246_v43, %v6889_v59  ;;  %v6924_v2 = vmul.f32 %v17245_v53, %v6889_v59  ;;  %v18710_v59 = vld [vmem:[%s19542_s5 + $0x18] sm:$0xff] }
0x1117   :  { %v6917_v44 = vsub.f32 %v6909_v50, %v6913_v27  ;;  %v6929_v28 = vadd.f32 %v6925_v45, %v6921_v26  ;;  %v18689_v26 = vld [vmem:[%s19541_s4 + $0x10] sm:$0xff]  ;;  %v18703_v45 = vld [vmem:[%s19541_s4 + $0x18] sm:$0xff] }
0x1118   :  { %v6916_v8 = vsub.f32 %v6908_v33, %v6912_v55  ;;  %v6928_v3 = vadd.f32 %v6924_v2, %v6920_v54  ;;  %v15193_v4 = vpop.f32.mrb[134].mxu0  ;;  %v18696_v27 = vld [vmem:[%s19542_s5 + $0x10] sm:$0xff] }
0x1119   :  { %v6915_v42 = vmul.f32 %v17248_v61, %v15193_v4  ;;  %v6927_v1 = vmul.f32 %v17247_v15, %v15193_v4  ;;  %v6899_v19 = vpop.f32.mrb[135].mxu0 }
0x111a   :  { %v16584_v48 = vpack.c.bf16 %v6917_v44, %v6916_v8  ;;  %v16592_v49 = vpack.c.bf16 %v6929_v28, %v6928_v3  ;;  %v6914_v22 = vmul.f32 %v17250_v29, %v6899_v19  ;;  %v6926_v52 = vmul.f32 %v17249_v9, %v6899_v19 }
0x111b   :  { %v6919_v35 = vsub.f32 %v6911_v39, %v6915_v42  ;;  %v6931_v37 = vadd.f32 %v6927_v1, %v6923_v16 }
0x111c   :  { %v6918_v38 = vsub.f32 %v6910_v11, %v6914_v22  ;;  %v6930_v21 = vadd.f32 %v6926_v52, %v6922_v31  ;;  %16585 = vmatprep.subr.bf16.mxu1 %v16584_v48  ;;  %16601 = vmatprep.subr.bf16.mxu0 %v16584_v48 }
0x111d   :  { %16587 = vmatpush3.bf16.msra.mxu1 %v16584_v48  ;;  %16603 = vmatpush3.bf16.msra.mxu0 %v16584_v48 }
0x111e   :  { %v16588_v24 = vpack.c.bf16 %v6919_v35, %v6918_v38  ;;  %v16596_v50 = vpack.c.bf16 %v6931_v37, %v6930_v21 }
0x1120   :  { %16589 = vmatprep.subr.bf16.mxu1 %v16588_v24  ;;  %16605 = vmatprep.subr.bf16.mxu0 %v16588_v24 }
0x1121   :  { %16591 = vmatpush3.bf16.msra.mxu1 %v16588_v24  ;;  %16607 = vmatpush3.bf16.msra.mxu0 %v16588_v24  ;;  %v18771_v24 = vld [vmem:[%s19486_s17 + $0x8] sm:$0xff] }
0x1122   :  { %16593 = vmatprep.subr.bf16.mxu1 %v16592_v49  ;;  %16609 = vmatprep.subr.bf16.mxu0 %v16592_v49 }
0x1124   :  { %15203 = vmatmul.mubr.msk.f32.vlgmr.msra.gmra.mrb[80].mxu1 %vm177_vm0, %v18675_v18  ;;  %15231 = vmatmul.mubr.msk.f32.vlgmr.msra.gmra.mrb[136].mxu0 %vm177_vm0, %v18682_v25 }
0x1125   :  { %16595 = vmatpush3.bf16.msra.mxu1 %v16592_v49  ;;  %16611 = vmatpush3.bf16.msra.mxu0 %v16592_v49 }
0x1126   :  { %16597 = vmatprep.subr.bf16.mxu1 %v16596_v50  ;;  %16613 = vmatprep.subr.bf16.mxu0 %v16596_v50 }
0x1127   :  { %15205 = vmatprep.mubr.msk.f32.mxu1 %vm177_vm0, %v18689_v26  ;;  %15233 = vmatprep.mubr.msk.f32.mxu0 %vm177_vm0, %v18696_v27 }
0x1128   :  { %15206 = vmatmul.mubr.msk.f32.gmra.mrb[82].mxu1 %vm177_vm0, %v18703_v45  ;;  %15234 = vmatmul.mubr.msk.f32.gmra.mrb[138].mxu0 %vm177_vm0, %v18710_v59 }
0x1129   :  { %16599 = vmatpush3.bf16.msra.mxu1 %v16596_v50  ;;  %16615 = vmatpush3.bf16.msra.mxu0 %v16596_v50 }
0x112a   :  { %15216 = vmatprep.mubr.msk.f32.mxu1 %vm177_vm0, %v18640_v0  ;;  %15244 = vmatprep.mubr.msk.f32.mxu0 %vm177_vm0, %v18627_v41 }
0x112b   :  { %16633 = vmatprep.subr.bf16.mxu0 %v17708_v60  ;;  %16617 = vmatprep.subr.bf16.mxu1 %v17708_v60 }
0x112c   :  { %15217 = vmatmul.mubr.msk.f32.vlgmr.msra.gmra.mrb[84].mxu1 %vm177_vm0, %v18682_v25  ;;  %15245 = vmatmul.mubr.msk.f32.vlgmr.msra.gmra.mrb[136].mxu0 %vm177_vm0, %v18675_v18 }
0x112d   :  { %15219 = vmatprep.mubr.msk.f32.mxu1 %vm177_vm0, %v18696_v27  ;;  %15247 = vmatprep.mubr.msk.f32.mxu0 %vm177_vm0, %v18689_v26 }
0x112e   :  { %16635 = vmatpush3.bf16.msra.mxu0 %v17708_v60  ;;  %16619 = vmatpush3.bf16.msra.mxu1 %v17708_v60 }
0x112f   :  { %16637 = vmatprep.subr.bf16.mxu0 %v17720_v63  ;;  %16621 = vmatprep.subr.bf16.mxu1 %v17720_v63 }
0x1130   :  { %15220 = vmatmul.mubr.msk.f32.gmra.mrb[86].mxu1 %vm177_vm0, %v18710_v59  ;;  %15248 = vmatmul.mubr.msk.f32.gmra.mrb[138].mxu0 %vm177_vm0, %v18703_v45 }
0x1132   :  { %16639 = vmatpush3.bf16.msra.mxu0 %v17720_v63  ;;  %16623 = vmatpush3.bf16.msra.mxu1 %v17720_v63 }
0x1133   :  { %16641 = vmatprep.subr.bf16.mxu0 %v17732_v6  ;;  %16625 = vmatprep.subr.bf16.mxu1 %v17732_v6 }
0x11f7   :  { %v15204_v53 = vpop.f32.mrb[80].mxu1 }
0x11f8   :  { %v6998_v33 = vpop.f32.mrb[81].mxu1 }
0x11fb   :  { %v15207_v43 = vpop.f32.mrb[82].mxu1 }
0x11fc   :  { %v7008_v54 = vpop.f32.mrb[83].mxu1 }
0x11ff   :  { %v15218_v55 = vpop.f32.mrb[84].mxu1  ;;  %v15246_v2 = vpop.f32.mrb[136].mxu0 }
0x1200   :  { %v7103_v44 = vsub.f32 %v15204_v53, %v15218_v55  ;;  %v7083_v28 = vpop.f32.mrb[85].mxu1  ;;  %v7257_v15 = vpop.f32.mrb[137].mxu0 }
0x1201   :  { %v7102_v39 = vsub.f32 %v6998_v33, %v7083_v28  ;;  %15286 = vmatprep.mubr.msk.f32.mxu0 %vm177_vm0, %v7257_v15 }
0x1202   :  { %15287 = vmatmul.mubr.msk.f32.vlgmr.msra.gmra.mrb[140].mxu0 %vm177_vm0, %v15246_v2 }
0x1203   :  { %v15221_v61 = vpop.f32.mrb[86].mxu1  ;;  %v15249_v16 = vpop.f32.mrb[138].mxu0  ;;  %15258 = vmatprep.mubr.msk.f32.mxu1 %vm177_vm0, %v7102_v39  ;;  %16643 = vmatpush3.bf16.msra.mxu0 %v17732_v6 }
0x1204   :  { %v7105_v8 = vsub.f32 %v15207_v43, %v15221_v61  ;;  %v7093_v3 = vpop.f32.mrb[87].mxu1  ;;  %v7267_v4 = vpop.f32.mrb[139].mxu0  ;;  %15259 = vmatmul.mubr.msk.f32.vlgmr.msra.gmra.mrb[88].mxu1 %vm177_vm0, %v7103_v44  ;;  %16645 = vmatprep.subr.bf16.mxu0 %v17742_v30  ;;  %v19554_v43 = vld [vmem:[#allocation3_spill] sm:$0xff] }
0x1205   :  { %v7104_v9 = vsub.f32 %v7008_v54, %v7093_v3  ;;  %16627 = vmatpush3.bf16.msra.mxu1 %v17732_v6  ;;  %15289 = vmatprep.mubr.msk.f32.mxu0 %vm177_vm0, %v7267_v4 }
0x1206   :  { %15290 = vmatmul.mubr.msk.f32.gmra.mrb[142].mxu0 %vm177_vm0, %v15249_v16  ;;  %16629 = vmatprep.subr.bf16.mxu1 %v17742_v30 }
0x1207   :  { %15261 = vmatprep.mubr.msk.f32.mxu1 %vm177_vm0, %v7104_v9  ;;  %16647 = vmatpush3.bf16.msra.mxu0 %v17742_v30 }
0x1208   :  { %15300 = vmatprep.mubr.msk.f32.mxu0 %vm177_vm0, %v7102_v39  ;;  %15262 = vmatmul.mubr.msk.f32.gmra.mrb[90].mxu1 %vm177_vm0, %v7105_v8 }
0x1209   :  { %16631 = vmatpush3.bf16.msra.mxu1 %v17742_v30  ;;  %15272 = vmatprep.mubr.msk.f32.mxu1 %vm177_vm0, %v7257_v15 }
0x120a   :  { %15301 = vmatmul.mubr.msk.f32.vlgmr.msra.gmra.mrb[140].mxu0 %vm177_vm0, %v7103_v44 }
0x120b   :  { %15303 = vmatprep.mubr.msk.f32.mxu0 %vm177_vm0, %v7104_v9 }
0x120c   :  { %15273 = vmatmul.mubr.msk.f32.vlgmr.msra.gmra.mrb[92].mxu1 %vm177_vm0, %v15246_v2 }
0x120d   :  { %15275 = vmatprep.mubr.msk.f32.mxu1 %vm177_vm0, %v7267_v4 }
0x120e   :  { %15304 = vmatmul.mubr.msk.f32.gmra.mrb[142].mxu0 %vm177_vm0, %v7105_v8 }
0x120f   :  { %15342 = vmatprep.mubr.msk.f32.mxu0 %vm177_vm0, %v18537_v58 }
0x1210   :  { %15276 = vmatmul.mubr.msk.f32.gmra.mrb[94].mxu1 %vm177_vm0, %v15249_v16 }
0x1211   :  { %15314 = vmatprep.mubr.msk.f32.mxu1 %vm177_vm0, %v18570_v12 }
0x12d7   :  { %v15260_v11 = vpop.f32.mrb[88].mxu1 }
0x12d8   :  { %v7354_v29 = vpop.f32.mrb[89].mxu1 }
0x12db   :  { %v15263_v31 = vpop.f32.mrb[90].mxu1 }
0x12dc   :  { %v7364_v42 = vpop.f32.mrb[91].mxu1 }
0x12dd   :  { %v15302_v1 = vpop.f32.mrb[140].mxu0 }
0x12de   :  { %v7649_v19 = vmul.f32 %v18265_v10, %v15302_v1  ;;  %v7625_v48 = vpop.f32.mrb[141].mxu0  ;;  %v18778_v10 = vld [vmem:[%s19486_s17] sm:$0xff] }
0x12df   :  { %v7648_v49 = vmul.f32 %v18272_v7, %v7625_v48  ;;  %v15274_v22 = vpop.f32.mrb[92].mxu1 }
0x12e0   :  { %v7471_v52 = vsub.f32 %v15260_v11, %v15274_v22  ;;  %v7451_v35 = vpop.f32.mrb[93].mxu1 }
0x12e1   :  { %v16656_v37 = vpack.c.bf16 %v7649_v19, %v7648_v49  ;;  %v7470_v38 = vsub.f32 %v7354_v29, %v7451_v35  ;;  %v15305_v21 = vpop.f32.mrb[142].mxu0 }
0x12e2   :  { %v7645_v50 = vmul.f32 %v18771_v24, %v7471_v52  ;;  %v7651_v53 = vmul.f32 %v18279_v51, %v15305_v21  ;;  %v7635_v33 = vpop.f32.mrb[143].mxu0 }
0x12e3   :  { %v7644_v7 = vmul.f32 %v18778_v10, %v7470_v38  ;;  %v7650_v54 = vmul.f32 %v19554_v43, %v7635_v33  ;;  %v15277_v55 = vpop.f32.mrb[94].mxu1 }
0x12e4   :  { %v7473_v2 = vsub.f32 %v15263_v31, %v15277_v55  ;;  %v7461_v44 = vpop.f32.mrb[95].mxu1 }
0x12e5   :  { %v16648_v28 = vpack.c.bf16 %v7645_v50, %v7644_v7  ;;  %v16660_v15 = vpack.c.bf16 %v7651_v53, %v7650_v54  ;;  %v7472_v39 = vsub.f32 %v7364_v42, %v7461_v44 }
0x12e6   :  { %v7647_v61 = vmul.f32 %v18279_v51, %v7473_v2 }
0x12e7   :  { %v7646_v16 = vmul.f32 %v19554_v43, %v7472_v39  ;;  %16649 = vmatprep.subr.bf16.mxu1 %v16648_v28  ;;  %16665 = vmatprep.subr.bf16.mxu0 %v16648_v28  ;;  %v18857_v39 = vld [vmem:[%s19487_s11 + $0x8] sm:$0xff] }
0x12e8   :  { %16651 = vmatpush3.bf16.msra.mxu1 %v16648_v28  ;;  %16667 = vmatpush3.bf16.msra.mxu0 %v16648_v28  ;;  %v18851_v28 = vld [vmem:[%s19488_s12 + $0x8] sm:$0xff] }
0x12e9   :  { %v16652_v8 = vpack.c.bf16 %v7647_v61, %v7646_v16 }
0x12eb   :  { %16653 = vmatprep.subr.bf16.mxu1 %v16652_v8  ;;  %16669 = vmatprep.subr.bf16.mxu0 %v16652_v8 }
0x12ec   :  { %16655 = vmatpush3.bf16.msra.mxu1 %v16652_v8  ;;  %16671 = vmatpush3.bf16.msra.mxu0 %v16652_v8 }
0x12ed   :  { %16657 = vmatprep.subr.bf16.mxu1 %v16656_v37  ;;  %16673 = vmatprep.subr.bf16.mxu0 %v16656_v37 }
0x12ef   :  { %15315 = vmatmul.mubr.msk.f32.vlgmr.msra.gmra.mrb[96].mxu1 %vm177_vm0, %v18577_v56  ;;  %15343 = vmatmul.mubr.msk.f32.vlgmr.msra.gmra.mrb[144].mxu0 %vm177_vm0, %v18547_v32 }
0x12f0   :  { %16659 = vmatpush3.bf16.msra.mxu1 %v16656_v37  ;;  %16675 = vmatpush3.bf16.msra.mxu0 %v16656_v37 }
0x12f1   :  { %16661 = vmatprep.subr.bf16.mxu1 %v16660_v15  ;;  %16677 = vmatprep.subr.bf16.mxu0 %v16660_v15 }
0x12f2   :  { %15317 = vmatprep.mubr.msk.f32.mxu1 %vm177_vm0, %v18584_v13  ;;  %15345 = vmatprep.mubr.msk.f32.mxu0 %vm177_vm0, %v18555_v5 }
0x12f3   :  { %15318 = vmatmul.mubr.msk.f32.gmra.mrb[98].mxu1 %vm177_vm0, %v18593_v36  ;;  %15346 = vmatmul.mubr.msk.f32.gmra.mrb[146].mxu0 %vm177_vm0, %v18563_v57 }
0x12f4   :  { %16663 = vmatpush3.bf16.msra.mxu1 %v16660_v15  ;;  %16679 = vmatpush3.bf16.msra.mxu0 %v16660_v15 }
0x12f5   :  { %15328 = vmatprep.mubr.msk.f32.mxu1 %vm177_vm0, %v18537_v58  ;;  %15356 = vmatprep.mubr.msk.f32.mxu0 %vm177_vm0, %v18570_v12 }
0x12f6   :  { %16697 = vmatprep.subr.bf16.mxu0 %v17536_v17  ;;  %16681 = vmatprep.subr.bf16.mxu1 %v17536_v17 }
0x12f7   :  { %15329 = vmatmul.mubr.msk.f32.vlgmr.msra.gmra.mrb[100].mxu1 %vm177_vm0, %v18547_v32  ;;  %15357 = vmatmul.mubr.msk.f32.vlgmr.msra.gmra.mrb[144].mxu0 %vm177_vm0, %v18577_v56 }
0x12f8   :  { %15331 = vmatprep.mubr.msk.f32.mxu1 %vm177_vm0, %v18555_v5  ;;  %15359 = vmatprep.mubr.msk.f32.mxu0 %vm177_vm0, %v18584_v13 }
0x12f9   :  { %16699 = vmatpush3.bf16.msra.mxu0 %v17536_v17  ;;  %16683 = vmatpush3.bf16.msra.mxu1 %v17536_v17 }
0x12fa   :  { %16701 = vmatprep.subr.bf16.mxu0 %v17548_v20  ;;  %16685 = vmatprep.subr.bf16.mxu1 %v17548_v20 }
0x12fb   :  { %15332 = vmatmul.mubr.msk.f32.gmra.mrb[102].mxu1 %vm177_vm0, %v18563_v57  ;;  %15360 = vmatmul.mubr.msk.f32.gmra.mrb[146].mxu0 %vm177_vm0, %v18593_v36 }
0x12fd   :  { %16703 = vmatpush3.bf16.msra.mxu0 %v17548_v20  ;;  %16687 = vmatpush3.bf16.msra.mxu1 %v17548_v20 }
0x12fe   :  { %16705 = vmatprep.subr.bf16.mxu0 %v17560_v23  ;;  %16689 = vmatprep.subr.bf16.mxu1 %v17560_v23 }
0x13c2   :  { %v15316_v51 = vpop.f32.mrb[96].mxu1 }
0x13c3   :  { %v7718_v3 = vpop.f32.mrb[97].mxu1 }
0x13c6   :  { %v15319_v4 = vpop.f32.mrb[98].mxu1 }
0x13c7   :  { %v7728_v9 = vpop.f32.mrb[99].mxu1 }
0x13ca   :  { %v15330_v11 = vpop.f32.mrb[100].mxu1  ;;  %v15358_v29 = vpop.f32.mrb[144].mxu0 }
0x13cb   :  { %v7823_v31 = vsub.f32 %v15316_v51, %v15330_v11  ;;  %v7803_v42 = vpop.f32.mrb[101].mxu1  ;;  %v7977_v1 = vpop.f32.mrb[145].mxu0 }
0x13cc   :  { %v7822_v19 = vsub.f32 %v7718_v3, %v7803_v42  ;;  %15398 = vmatprep.mubr.msk.f32.mxu0 %vm177_vm0, %v7977_v1  ;;  %v18865_v3 = vld [vmem:[%s19488_s12] sm:$0xff] }
0x13cd   :  { %15399 = vmatmul.mubr.msk.f32.vlgmr.msra.gmra.mrb[148].mxu0 %vm177_vm0, %v15358_v29 }
0x13ce   :  { %v15333_v48 = vpop.f32.mrb[102].mxu1  ;;  %v15361_v49 = vpop.f32.mrb[146].mxu0  ;;  %15370 = vmatprep.mubr.msk.f32.mxu1 %vm177_vm0, %v7822_v19  ;;  %16707 = vmatpush3.bf16.msra.mxu0 %v17560_v23 }
0x13cf   :  { %v7825_v22 = vsub.f32 %v15319_v4, %v15333_v48  ;;  %v7813_v52 = vpop.f32.mrb[103].mxu1  ;;  %v7987_v35 = vpop.f32.mrb[147].mxu0  ;;  %15371 = vmatmul.mubr.msk.f32.vlgmr.msra.gmra.mrb[104].mxu1 %vm177_vm0, %v7823_v31  ;;  %16709 = vmatprep.subr.bf16.mxu0 %v17580_v34  ;;  %v18879_v48 = vld [vmem:[%s19488_s12 + $0x18] sm:$0xff] }
0x13d0   :  { %v7824_v37 = vsub.f32 %v7728_v9, %v7813_v52  ;;  %16691 = vmatpush3.bf16.msra.mxu1 %v17560_v23  ;;  %15401 = vmatprep.mubr.msk.f32.mxu0 %vm177_vm0, %v7987_v35  ;;  %v18871_v9 = vld [vmem:[%s19487_s11] sm:$0xff] }
0x13d1   :  { %15402 = vmatmul.mubr.msk.f32.gmra.mrb[150].mxu0 %vm177_vm0, %v15361_v49  ;;  %16693 = vmatprep.subr.bf16.mxu1 %v17580_v34 }
0x13d2   :  { %15373 = vmatprep.mubr.msk.f32.mxu1 %vm177_vm0, %v7824_v37  ;;  %16711 = vmatpush3.bf16.msra.mxu0 %v17580_v34 }
0x13d3   :  { %15412 = vmatprep.mubr.msk.f32.mxu0 %vm177_vm0, %v7822_v19  ;;  %15374 = vmatmul.mubr.msk.f32.gmra.mrb[106].mxu1 %vm177_vm0, %v7825_v22 }
0x13d4   :  { %16695 = vmatpush3.bf16.msra.mxu1 %v17580_v34  ;;  %15384 = vmatprep.mubr.msk.f32.mxu1 %vm177_vm0, %v7977_v1 }
0x13d5   :  { %15413 = vmatmul.mubr.msk.f32.vlgmr.msra.gmra.mrb[148].mxu0 %vm177_vm0, %v7823_v31 }
0x13d6   :  { %15415 = vmatprep.mubr.msk.f32.mxu0 %vm177_vm0, %v7824_v37 }
0x13d7   :  { %15385 = vmatmul.mubr.msk.f32.vlgmr.msra.gmra.mrb[108].mxu1 %vm177_vm0, %v15358_v29 }
0x13d8   :  { %15387 = vmatprep.mubr.msk.f32.mxu1 %vm177_vm0, %v7987_v35 }
0x13d9   :  { %15416 = vmatmul.mubr.msk.f32.gmra.mrb[150].mxu0 %vm177_vm0, %v7825_v22 }
0x13da   :  { %15454 = vmatprep.mubr.msk.f32.mxu0 %vm177_vm0, %v18640_v0 }
0x13db   :  { %15388 = vmatmul.mubr.msk.f32.gmra.mrb[110].mxu1 %vm177_vm0, %v15361_v49 }
0x13dc   :  { %15426 = vmatprep.mubr.msk.f32.mxu1 %vm177_vm0, %v18627_v41 }
0x14a2   :  { %v15372_v38 = vpop.f32.mrb[104].mxu1 }
0x14a3   :  { %v8074_v21 = vpop.f32.mrb[105].mxu1 }
0x14a6   :  { %v15375_v50 = vpop.f32.mrb[106].mxu1 }
0x14a7   :  { %v8084_v53 = vpop.f32.mrb[107].mxu1 }
0x14a8   :  { %v15414_v33 = vpop.f32.mrb[148].mxu0 }
0x14a9   :  { %v8345_v7 = vpop.f32.mrb[149].mxu0  ;;  %v8369_v15 = vmul.f32 %v18851_v28, %v15414_v33  ;;  %v8381_v61 = vmul.f32 %v18857_v39, %v15414_v33 }
0x14aa   :  { %v15386_v43 = vpop.f32.mrb[108].mxu1  ;;  %v8368_v4 = vmul.f32 %v18865_v3, %v8345_v7  ;;  %v8380_v11 = vmul.f32 %v18871_v9, %v8345_v7  ;;  %v18891_v7 = vld [vmem:[%s19488_s12 + $0x10] sm:$0xff] }
0x14ab   :  { %v8191_v54 = vsub.f32 %v15372_v38, %v15386_v43  ;;  %v8171_v55 = vpop.f32.mrb[109].mxu1  ;;  %v18885_v38 = vld [vmem:[%s19487_s11 + $0x18] sm:$0xff] }
0x14ac   :  { %v8190_v2 = vsub.f32 %v8074_v21, %v8171_v55  ;;  %v15417_v44 = vpop.f32.mrb[150].mxu0 }
0x14ad   :  { %v8365_v16 = vmul.f32 %v18857_v39, %v8191_v54  ;;  %v8377_v8 = vmul.f32 %v18851_v28, %v8191_v54  ;;  %v8355_v51 = vpop.f32.mrb[151].mxu0  ;;  %v8371_v49 = vmul.f32 %v18879_v48, %v15417_v44  ;;  %v8383_v21 = vmul.f32 %v18885_v38, %v15417_v44 }
0x14ae   :  { %v8364_v29 = vmul.f32 %v18871_v9, %v8190_v2  ;;  %v8376_v31 = vmul.f32 %v18865_v3, %v8190_v2  ;;  %v15389_v42 = vpop.f32.mrb[110].mxu1  ;;  %v8370_v43 = vmul.f32 %v18891_v7, %v8355_v51 }
0x14af   :  { %v8373_v1 = vsub.f32 %v8365_v16, %v8369_v15  ;;  %v8385_v19 = vadd.f32 %v8381_v61, %v8377_v8  ;;  %v8193_v22 = vsub.f32 %v15375_v50, %v15389_v42  ;;  %v8181_v52 = vpop.f32.mrb[111].mxu1  ;;  %v18897_v50 = vld [vmem:[%s19487_s11 + $0x10] sm:$0xff] }
0x14b0   :  { %v8372_v35 = vsub.f32 %v8364_v29, %v8368_v4  ;;  %v8384_v37 = vadd.f32 %v8380_v11, %v8376_v31  ;;  %v8192_v33 = vsub.f32 %v8084_v53, %v8181_v52  ;;  %v8382_v54 = vmul.f32 %v18897_v50, %v8355_v51 }
0x14b1   :  { %v8367_v55 = vmul.f32 %v18885_v38, %v8193_v22  ;;  %v8379_v2 = vmul.f32 %v18879_v48, %v8193_v22 }
0x14b2   :  { %v16712_v44 = vpack.c.bf16 %v8373_v1, %v8372_v35  ;;  %v16720_v53 = vpack.c.bf16 %v8385_v19, %v8384_v37  ;;  %v8366_v15 = vmul.f32 %v18897_v50, %v8192_v33  ;;  %v8378_v61 = vmul.f32 %v18891_v7, %v8192_v33 }
0x14b3   :  { %v8375_v16 = vsub.f32 %v8367_v55, %v8371_v49  ;;  %v8387_v8 = vadd.f32 %v8383_v21, %v8379_v2 }
0x14b4   :  { %v8374_v4 = vsub.f32 %v8366_v15, %v8370_v43  ;;  %v8386_v11 = vadd.f32 %v8382_v54, %v8378_v61  ;;  %16713 = vmatprep.subr.bf16.mxu1 %v16712_v44  ;;  %16729 = vmatprep.subr.bf16.mxu0 %v16712_v44 }
0x14b5   :  { %16715 = vmatpush3.bf16.msra.mxu1 %v16712_v44  ;;  %16731 = vmatpush3.bf16.msra.mxu0 %v16712_v44 }
0x14b6   :  { %v16716_v29 = vpack.c.bf16 %v8375_v16, %v8374_v4  ;;  %v16724_v51 = vpack.c.bf16 %v8387_v8, %v8386_v11 }
0x14b8   :  { %16717 = vmatprep.subr.bf16.mxu1 %v16716_v29  ;;  %16733 = vmatprep.subr.bf16.mxu0 %v16716_v29 }
0x14b9   :  { %16719 = vmatpush3.bf16.msra.mxu1 %v16716_v29  ;;  %16735 = vmatpush3.bf16.msra.mxu0 %v16716_v29 }
0x14ba   :  { %16721 = vmatprep.subr.bf16.mxu1 %v16720_v53  ;;  %16737 = vmatprep.subr.bf16.mxu0 %v16720_v53 }
0x14bc   :  { %15427 = vmatmul.mubr.msk.f32.vlgmr.msra.gmra.mrb[112].mxu1 %vm177_vm0, %v18675_v18  ;;  %15455 = vmatmul.mubr.msk.f32.vlgmr.msra.gmra.mrb[152].mxu0 %vm177_vm0, %v18682_v25 }
0x14bd   :  { %16723 = vmatpush3.bf16.msra.mxu1 %v16720_v53  ;;  %16739 = vmatpush3.bf16.msra.mxu0 %v16720_v53 }
0x14be   :  { %16725 = vmatprep.subr.bf16.mxu1 %v16724_v51  ;;  %16741 = vmatprep.subr.bf16.mxu0 %v16724_v51 }
0x14bf   :  { %15429 = vmatprep.mubr.msk.f32.mxu1 %vm177_vm0, %v18689_v26  ;;  %15457 = vmatprep.mubr.msk.f32.mxu0 %vm177_vm0, %v18696_v27 }
0x14c0   :  { %15430 = vmatmul.mubr.msk.f32.gmra.mrb[114].mxu1 %vm177_vm0, %v18703_v45  ;;  %15458 = vmatmul.mubr.msk.f32.gmra.mrb[154].mxu0 %vm177_vm0, %v18710_v59 }
0x14c1   :  { %16727 = vmatpush3.bf16.msra.mxu1 %v16724_v51  ;;  %16743 = vmatpush3.bf16.msra.mxu0 %v16724_v51 }
0x14c2   :  { %15440 = vmatprep.mubr.msk.f32.mxu1 %vm177_vm0, %v18640_v0  ;;  %15468 = vmatprep.mubr.msk.f32.mxu0 %vm177_vm0, %v18627_v41 }
0x14c3   :  { %16761 = vmatprep.subr.bf16.mxu0 %v17708_v60  ;;  %16745 = vmatprep.subr.bf16.mxu1 %v17708_v60 }
0x14c4   :  { %15441 = vmatmul.mubr.msk.f32.vlgmr.msra.gmra.mrb[116].mxu1 %vm177_vm0, %v18682_v25  ;;  %15469 = vmatmul.mubr.msk.f32.vlgmr.msra.gmra.mrb[152].mxu0 %vm177_vm0, %v18675_v18 }
0x14c5   :  { %15443 = vmatprep.mubr.msk.f32.mxu1 %vm177_vm0, %v18696_v27  ;;  %15471 = vmatprep.mubr.msk.f32.mxu0 %vm177_vm0, %v18689_v26 }
0x14c6   :  { %16763 = vmatpush3.bf16.msra.mxu0 %v17708_v60  ;;  %16747 = vmatpush3.bf16.msra.mxu1 %v17708_v60 }
0x14c7   :  { %16765 = vmatprep.subr.bf16.mxu0 %v17720_v63  ;;  %16749 = vmatprep.subr.bf16.mxu1 %v17720_v63 }
0x14c8   :  { %15444 = vmatmul.mubr.msk.f32.gmra.mrb[118].mxu1 %vm177_vm0, %v18710_v59  ;;  %15472 = vmatmul.mubr.msk.f32.gmra.mrb[154].mxu0 %vm177_vm0, %v18703_v45 }
0x14ca   :  { %16767 = vmatpush3.bf16.msra.mxu0 %v17720_v63  ;;  %16751 = vmatpush3.bf16.msra.mxu1 %v17720_v63 }
0x14cb   :  { %16769 = vmatprep.subr.bf16.mxu0 %v17732_v6  ;;  %16753 = vmatprep.subr.bf16.mxu1 %v17732_v6 }
0x158f   :  { %v15428_v31 = vpop.f32.mrb[112].mxu1 }
0x1590   :  { %v8454_v42 = vpop.f32.mrb[113].mxu1 }
0x1593   :  { %v15431_v1 = vpop.f32.mrb[114].mxu1 }
0x1594   :  { %v8464_v19 = vpop.f32.mrb[115].mxu1 }
0x1597   :  { %v15442_v49 = vpop.f32.mrb[116].mxu1  ;;  %v15470_v22 = vpop.f32.mrb[152].mxu0 }
0x1598   :  { %v8559_v52 = vsub.f32 %v15428_v31, %v15442_v49  ;;  %v8539_v35 = vpop.f32.mrb[117].mxu1  ;;  %v8713_v37 = vpop.f32.mrb[153].mxu0  ;;  %v17267_v31 = vld [vmem:[%s19490_s16 + $0x8] sm:$0xff] }
0x1599   :  { %v8558_v21 = vsub.f32 %v8454_v42, %v8539_v35  ;;  %15510 = vmatprep.mubr.msk.f32.mxu0 %vm177_vm0, %v8713_v37 }
0x159a   :  { %15511 = vmatmul.mubr.msk.f32.vlgmr.msra.gmra.mrb[156].mxu0 %vm177_vm0, %v15470_v22 }
0x159b   :  { %v15445_v33 = vpop.f32.mrb[118].mxu1  ;;  %v15473_v43 = vpop.f32.mrb[154].mxu0  ;;  %15482 = vmatprep.mubr.msk.f32.mxu1 %vm177_vm0, %v8558_v21  ;;  %16771 = vmatpush3.bf16.msra.mxu0 %v17732_v6 }
0x159c   :  { %v8561_v54 = vsub.f32 %v15431_v1, %v15445_v33  ;;  %v8549_v55 = vpop.f32.mrb[119].mxu1  ;;  %v8723_v2 = vpop.f32.mrb[155].mxu0  ;;  %15483 = vmatmul.mubr.msk.f32.vlgmr.msra.gmra.mrb[120].mxu1 %vm177_vm0, %v8559_v52  ;;  %16773 = vmatprep.subr.bf16.mxu0 %v17742_v30  ;;  %v17268_v1 = vld [vmem:[%s19489_s15 + $0x8] sm:$0xff] }
0x159d   :  { %v8560_v44 = vsub.f32 %v8464_v19, %v8549_v55  ;;  %16755 = vmatpush3.bf16.msra.mxu1 %v17732_v6  ;;  %15513 = vmatprep.mubr.msk.f32.mxu0 %vm177_vm0, %v8723_v2 }
0x159e   :  { %15514 = vmatmul.mubr.msk.f32.gmra.mrb[158].mxu0 %vm177_vm0, %v15473_v43  ;;  %16757 = vmatprep.subr.bf16.mxu1 %v17742_v30 }
0x159f   :  { %15485 = vmatprep.mubr.msk.f32.mxu1 %vm177_vm0, %v8560_v44  ;;  %16775 = vmatpush3.bf16.msra.mxu0 %v17742_v30 }
0x15a0   :  { %15524 = vmatprep.mubr.msk.f32.mxu0 %vm177_vm0, %v8558_v21  ;;  %15486 = vmatmul.mubr.msk.f32.gmra.mrb[122].mxu1 %vm177_vm0, %v8561_v54 }
0x15a1   :  { %16759 = vmatpush3.bf16.msra.mxu1 %v17742_v30  ;;  %15496 = vmatprep.mubr.msk.f32.mxu1 %vm177_vm0, %v8713_v37  ;;  %v17270_v37 = vld [vmem:[%s19489_s15] sm:$0xff] }
0x15a2   :  { %15525 = vmatmul.mubr.msk.f32.vlgmr.msra.gmra.mrb[156].mxu0 %vm177_vm0, %v8559_v52  ;;  %v17269_v52 = vld [vmem:[%s19490_s16] sm:$0xff] }
0x15a3   :  { %15527 = vmatprep.mubr.msk.f32.mxu0 %vm177_vm0, %v8560_v44  ;;  %v17271_v44 = vld [vmem:[%s19490_s16 + $0x18] sm:$0xff] }
0x15a4   :  { %15497 = vmatmul.mubr.msk.f32.vlgmr.msra.gmra.mrb[124].mxu1 %vm177_vm0, %v15470_v22 }
0x15a5   :  { %15499 = vmatprep.mubr.msk.f32.mxu1 %vm177_vm0, %v8723_v2 }
0x15a6   :  { %15528 = vmatmul.mubr.msk.f32.gmra.mrb[158].mxu0 %vm177_vm0, %v8561_v54 }
0x15a7   :  { %15566 = vmatprep.mubr.msk.f32.mxu0 %vm177_vm0, %v18537_v58 }
0x15a8   :  { %15500 = vmatmul.mubr.msk.f32.gmra.mrb[126].mxu1 %vm177_vm0, %v15473_v43 }
0x15a9   :  { %15538 = vmatprep.mubr.msk.f32.mxu1 %vm177_vm0, %v18570_v12 }
0x166f   :  { %v15484_v53 = vpop.f32.mrb[120].mxu1 }
0x1670   :  { %v8810_v15 = vpop.f32.mrb[121].mxu1 }
0x1673   :  { %v15487_v61 = vpop.f32.mrb[122].mxu1 }
0x1674   :  { %v8820_v16 = vpop.f32.mrb[123].mxu1 }
0x1675   :  { %v15526_v8 = vpop.f32.mrb[156].mxu0 }
0x1676   :  { %v9081_v4 = vpop.f32.mrb[157].mxu0  ;;  %v9105_v42 = vmul.f32 %v17267_v31, %v15526_v8  ;;  %v9117_v19 = vmul.f32 %v17268_v1, %v15526_v8 }
0x1677   :  { %v15498_v11 = vpop.f32.mrb[124].mxu1  ;;  %v9104_v35 = vmul.f32 %v17269_v52, %v9081_v4  ;;  %v9116_v21 = vmul.f32 %v17270_v37, %v9081_v4  ;;  %v17273_v4 = vld [vmem:[%s19490_s16 + $0x10] sm:$0xff] }
0x1678   :  { %v8927_v29 = vsub.f32 %v15484_v53, %v15498_v11  ;;  %v8907_v51 = vpop.f32.mrb[125].mxu1 }
0x1679   :  { %v8926_v49 = vsub.f32 %v8810_v15, %v8907_v51  ;;  %v15529_v22 = vpop.f32.mrb[158].mxu0  ;;  %v17272_v15 = vld [vmem:[%s19489_s15 + $0x18] sm:$0xff] }
0x167a   :  { %v9101_v33 = vmul.f32 %v17268_v1, %v8927_v29  ;;  %v9113_v43 = vmul.f32 %v17267_v31, %v8927_v29  ;;  %v9091_v54 = vpop.f32.mrb[159].mxu0  ;;  %v9107_v53 = vmul.f32 %v17271_v44, %v15529_v22  ;;  %v9119_v8 = vmul.f32 %v17272_v15, %v15529_v22 }
0x167b   :  { %v9100_v55 = vmul.f32 %v17270_v37, %v8926_v49  ;;  %v9112_v2 = vmul.f32 %v17269_v52, %v8926_v49  ;;  %v15501_v11 = vpop.f32.mrb[126].mxu1  ;;  %v9106_v29 = vmul.f32 %v17273_v4, %v9091_v54  ;;  %v17274_v37 = vld [vmem:[%s19489_s15 + $0x10] sm:$0xff] }
0x167c   :  { %v9109_v51 = vsub.f32 %v9101_v33, %v9105_v42  ;;  %v9121_v14 = vadd.f32 %v9117_v19, %v9113_v43  ;;  %v8929_v31 = vsub.f32 %v15487_v61, %v15501_v11  ;;  %v8917_v1 = vpop.f32.mrb[127].mxu1  ;;  %v9118_v40 = vmul.f32 %v17274_v37, %v9091_v54 }
0x167d   :  { %v9108_v49 = vsub.f32 %v9100_v55, %v9104_v35  ;;  %v9120_v52 = vadd.f32 %v9116_v21, %v9112_v2  ;;  %v8928_v47 = vsub.f32 %v8820_v16, %v8917_v1  ;;  %v18999_v16 = vld [vmem:[%s19486_s17 + $0x18] sm:$0xff] }
0x167e   :  { %v9125_v22 = vmul.f32 %v18771_v24, %v9109_v51  ;;  %v9129_v42 = vmul.f32 %v18771_v24, %v9121_v14  ;;  %v9103_v19 = vmul.f32 %v17272_v15, %v8929_v31  ;;  %v9115_v33 = vmul.f32 %v17271_v44, %v8929_v31  ;;  %v19006_v44 = vld [vmem:[%s19486_s17 + $0x10] sm:$0xff] }
0x167f   :  { %v9124_v43 = vmul.f32 %v18778_v10, %v9108_v49  ;;  %v9128_v62 = vmul.f32 %v18778_v10, %v9120_v52  ;;  %v9102_v61 = vmul.f32 %v17274_v37, %v8928_v47  ;;  %v9114_v11 = vmul.f32 %v17273_v4, %v8928_v47 }
0x1680   :  { %v9111_v35 = vsub.f32 %v9103_v19, %v9107_v53  ;;  %v9123_v21 = vadd.f32 %v9119_v8, %v9115_v33 }
0x1681   :  { %v9110_v55 = vsub.f32 %v9102_v61, %v9106_v29  ;;  %v9122_v2 = vadd.f32 %v9118_v40, %v9114_v11  ;;  %v16776_v46 = vpack.c.bf16 %v9125_v22, %v9124_v43  ;;  %v16784_v30 = vpack.c.bf16 %v9129_v42, %v9128_v62 }
0x1682   :  { %v9127_v14 = vmul.f32 %v18999_v16, %v9111_v35  ;;  %v9131_v54 = vmul.f32 %v18999_v16, %v9123_v21 }
0x1683   :  { %v9126_v47 = vmul.f32 %v19006_v44, %v9110_v55  ;;  %v9130_v40 = vmul.f32 %v19006_v44, %v9122_v2  ;;  %16777 = vmatprep.subr.bf16.mxu1 %v16776_v46  ;;  %16793 = vmatprep.subr.bf16.mxu0 %v16776_v46 }
0x1684   :  { %16779 = vmatpush3.bf16.msra.mxu1 %v16776_v46  ;;  %16795 = vmatpush3.bf16.msra.mxu0 %v16776_v46 }
0x1685   :  { %v16780_v62 = vpack.c.bf16 %v9127_v14, %v9126_v47  ;;  %v16788_v53 = vpack.c.bf16 %v9131_v54, %v9130_v40 }
0x1687   :  { %16781 = vmatprep.subr.bf16.mxu1 %v16780_v62  ;;  %16797 = vmatprep.subr.bf16.mxu0 %v16780_v62 }
0x1688   :  { %16783 = vmatpush3.bf16.msra.mxu1 %v16780_v62  ;;  %16799 = vmatpush3.bf16.msra.mxu0 %v16780_v62 }
0x1689   :  { %16785 = vmatprep.subr.bf16.mxu1 %v16784_v30  ;;  %16801 = vmatprep.subr.bf16.mxu0 %v16784_v30 }
0x168b   :  { %15539 = vmatmul.mubr.msk.f32.vlgmr.msra.gmra.mrb[128].mxu1 %vm177_vm0, %v18577_v56  ;;  %15567 = vmatmul.mubr.msk.f32.vlgmr.msra.gmra.mrb[160].mxu0 %vm177_vm0, %v18547_v32 }
0x168c   :  { %16787 = vmatpush3.bf16.msra.mxu1 %v16784_v30  ;;  %16803 = vmatpush3.bf16.msra.mxu0 %v16784_v30 }
0x168d   :  { %16789 = vmatprep.subr.bf16.mxu1 %v16788_v53  ;;  %16805 = vmatprep.subr.bf16.mxu0 %v16788_v53 }
0x168e   :  { %15541 = vmatprep.mubr.msk.f32.mxu1 %vm177_vm0, %v18584_v13  ;;  %15569 = vmatprep.mubr.msk.f32.mxu0 %vm177_vm0, %v18555_v5 }
0x168f   :  { %15542 = vmatmul.mubr.msk.f32.gmra.mrb[130].mxu1 %vm177_vm0, %v18593_v36  ;;  %15570 = vmatmul.mubr.msk.f32.gmra.mrb[162].mxu0 %vm177_vm0, %v18563_v57 }
0x1690   :  { %16791 = vmatpush3.bf16.msra.mxu1 %v16788_v53  ;;  %16807 = vmatpush3.bf16.msra.mxu0 %v16788_v53 }
0x1691   :  { %15552 = vmatprep.mubr.msk.f32.mxu1 %vm177_vm0, %v18537_v58  ;;  %15580 = vmatprep.mubr.msk.f32.mxu0 %vm177_vm0, %v18570_v12 }
0x1692   :  { %16825 = vmatprep.subr.bf16.mxu0 %v17536_v17  ;;  %16809 = vmatprep.subr.bf16.mxu1 %v17536_v17 }
0x1693   :  { %15553 = vmatmul.mubr.msk.f32.vlgmr.msra.gmra.mrb[132].mxu1 %vm177_vm0, %v18547_v32  ;;  %15581 = vmatmul.mubr.msk.f32.vlgmr.msra.gmra.mrb[160].mxu0 %vm177_vm0, %v18577_v56 }
0x1694   :  { %15555 = vmatprep.mubr.msk.f32.mxu1 %vm177_vm0, %v18555_v5  ;;  %15583 = vmatprep.mubr.msk.f32.mxu0 %vm177_vm0, %v18584_v13 }
0x1695   :  { %16827 = vmatpush3.bf16.msra.mxu0 %v17536_v17  ;;  %16811 = vmatpush3.bf16.msra.mxu1 %v17536_v17 }
0x1696   :  { %16829 = vmatprep.subr.bf16.mxu0 %v17548_v20  ;;  %16813 = vmatprep.subr.bf16.mxu1 %v17548_v20 }
0x1697   :  { %15556 = vmatmul.mubr.msk.f32.gmra.mrb[134].mxu1 %vm177_vm0, %v18563_v57  ;;  %15584 = vmatmul.mubr.msk.f32.gmra.mrb[162].mxu0 %vm177_vm0, %v18593_v36 }
0x1699   :  { %16831 = vmatpush3.bf16.msra.mxu0 %v17548_v20  ;;  %16815 = vmatpush3.bf16.msra.mxu1 %v17548_v20 }
0x169a   :  { %16833 = vmatprep.subr.bf16.mxu0 %v17560_v23  ;;  %16817 = vmatprep.subr.bf16.mxu1 %v17560_v23 }
0x175e   :  { %v15540_v30 = vpop.f32.mrb[128].mxu1 }
0x175f   :  { %v9198_v46 = vpop.f32.mrb[129].mxu1 }
0x1762   :  { %v15543_v58 = vpop.f32.mrb[130].mxu1 }
0x1763   :  { %v9208_v32 = vpop.f32.mrb[131].mxu1 }
0x1766   :  { %v15554_v5 = vpop.f32.mrb[132].mxu1  ;;  %v15582_v12 = vpop.f32.mrb[160].mxu0 }
0x1767   :  { %v9303_v56 = vsub.f32 %v15540_v30, %v15554_v5  ;;  %v9283_v13 = vpop.f32.mrb[133].mxu1  ;;  %v9457_v57 = vpop.f32.mrb[161].mxu0 }
0x1768   :  { %v9302_v15 = vsub.f32 %v9198_v46, %v9283_v13  ;;  %15622 = vmatprep.mubr.msk.f32.mxu0 %vm177_vm0, %v9457_v57 }
0x1769   :  { %15623 = vmatmul.mubr.msk.f32.vlgmr.msra.gmra.mrb[164].mxu0 %vm177_vm0, %v15582_v12 }
0x176a   :  { %v15557_v36 = vpop.f32.mrb[134].mxu1  ;;  %v15585_v8 = vpop.f32.mrb[162].mxu0  ;;  %15594 = vmatprep.mubr.msk.f32.mxu1 %vm177_vm0, %v9302_v15  ;;  %16835 = vmatpush3.bf16.msra.mxu0 %v17560_v23 }
0x176b   :  { %v9305_v51 = vsub.f32 %v15543_v58, %v15557_v36  ;;  %v9293_v4 = vpop.f32.mrb[135].mxu1  ;;  %v9467_v29 = vpop.f32.mrb[163].mxu0  ;;  %15595 = vmatmul.mubr.msk.f32.vlgmr.msra.gmra.mrb[136].mxu1 %vm177_vm0, %v9303_v56  ;;  %16837 = vmatprep.subr.bf16.mxu0 %v17580_v34 }
0x176c   :  { %v9304_v31 = vsub.f32 %v9208_v32, %v9293_v4  ;;  %16819 = vmatpush3.bf16.msra.mxu1 %v17560_v23  ;;  %15625 = vmatprep.mubr.msk.f32.mxu0 %vm177_vm0, %v9467_v29 }
0x176d   :  { %15626 = vmatmul.mubr.msk.f32.gmra.mrb[166].mxu0 %vm177_vm0, %v15585_v8  ;;  %16821 = vmatprep.subr.bf16.mxu1 %v17580_v34 }
0x176e   :  { %15597 = vmatprep.mubr.msk.f32.mxu1 %vm177_vm0, %v9304_v31  ;;  %16839 = vmatpush3.bf16.msra.mxu0 %v17580_v34 }
0x176f   :  { %15636 = vmatprep.mubr.msk.f32.mxu0 %vm177_vm0, %v9302_v15  ;;  %15598 = vmatmul.mubr.msk.f32.gmra.mrb[138].mxu1 %vm177_vm0, %v9305_v51 }
0x1770   :  { %16823 = vmatpush3.bf16.msra.mxu1 %v17580_v34  ;;  %15608 = vmatprep.mubr.msk.f32.mxu1 %vm177_vm0, %v9457_v57 }
0x1771   :  { %15637 = vmatmul.mubr.msk.f32.vlgmr.msra.gmra.mrb[164].mxu0 %vm177_vm0, %v9303_v56 }
0x1772   :  { %15639 = vmatprep.mubr.msk.f32.mxu0 %vm177_vm0, %v9304_v31 }
0x1773   :  { %15609 = vmatmul.mubr.msk.f32.vlgmr.msra.gmra.mrb[140].mxu1 %vm177_vm0, %v15582_v12 }
0x1774   :  { %15611 = vmatprep.mubr.msk.f32.mxu1 %vm177_vm0, %v9467_v29 }
0x1775   :  { %15640 = vmatmul.mubr.msk.f32.gmra.mrb[166].mxu0 %vm177_vm0, %v9305_v51 }
0x1776   :  { %15678 = vmatprep.mubr.msk.f32.mxu0 %vm177_vm0, %v18640_v0 }
0x1777   :  { %15612 = vmatmul.mubr.msk.f32.gmra.mrb[142].mxu1 %vm177_vm0, %v15585_v8 }
0x1778   :  { %15650 = vmatprep.mubr.msk.f32.mxu1 %vm177_vm0, %v18627_v41 }
0x183e   :  { %v15596_v1 = vpop.f32.mrb[136].mxu1 }
0x183f   :  { %v9554_v49 = vpop.f32.mrb[137].mxu1 }
0x1842   :  { %v15599_v52 = vpop.f32.mrb[138].mxu1 }
0x1843   :  { %v9564_v37 = vpop.f32.mrb[139].mxu1 }
0x1844   :  { %v15638_v22 = vpop.f32.mrb[164].mxu0 }
0x1845   :  { %v9825_v42 = vpop.f32.mrb[165].mxu0  ;;  %v9849_v35 = vmul.f32 %v18851_v28, %v15638_v22  ;;  %v9861_v0 = vmul.f32 %v18857_v39, %v15638_v22 }
0x1846   :  { %v15610_v19 = vpop.f32.mrb[140].mxu1  ;;  %v9848_v2 = vmul.f32 %v18865_v3, %v9825_v42  ;;  %v9860_v14 = vmul.f32 %v18871_v9, %v9825_v42 }
0x1847   :  { %v9671_v33 = vsub.f32 %v15596_v1, %v15610_v19  ;;  %v9651_v43 = vpop.f32.mrb[141].mxu1 }
0x1848   :  { %v9670_v61 = vsub.f32 %v9554_v49, %v9651_v43  ;;  %v15641_v11 = vpop.f32.mrb[166].mxu0  ;;  %v19555_v43 = vld [vmem:[#allocation2_spill] sm:$0xff] }
0x1849   :  { %v9845_v21 = vmul.f32 %v18857_v39, %v9671_v33  ;;  %v9857_v55 = vmul.f32 %v18851_v28, %v9671_v33  ;;  %v9835_v41 = vpop.f32.mrb[167].mxu0  ;;  %v9851_v30 = vmul.f32 %v18879_v48, %v15641_v11  ;;  %v9863_v28 = vmul.f32 %v18885_v38, %v15641_v11  ;;  %v19162_v11 = vld [vmem:[%s19536_s6] sm:$0xff] }
0x184a   :  { %v9844_v54 = vmul.f32 %v18871_v9, %v9670_v61  ;;  %v9856_v47 = vmul.f32 %v18865_v3, %v9670_v61  ;;  %v15613_v40 = vpop.f32.mrb[142].mxu1  ;;  %v9850_v12 = vmul.f32 %v18891_v7, %v9835_v41  ;;  %v9862_v56 = vmul.f32 %v18897_v50, %v9835_v41 }
0x184b   :  { %v9853_v62 = vsub.f32 %v9845_v21, %v9849_v35  ;;  %v9865_v53 = vadd.f32 %v9861_v0, %v9857_v55  ;;  %v9673_v46 = vsub.f32 %v15599_v52, %v15613_v40  ;;  %v9661_v58 = vpop.f32.mrb[143].mxu1  ;;  %v19170_v35 = vld [vmem:[%s19538_s9] sm:$0xff] }
0x184c   :  { %v9852_v32 = vsub.f32 %v9844_v54, %v9848_v2  ;;  %v9864_v39 = vadd.f32 %v9860_v14, %v9856_v47  ;;  %v9672_v5 = vsub.f32 %v9564_v37, %v9661_v58 }
0x184d   :  { %v9847_v9 = vmul.f32 %v18885_v38, %v9673_v46  ;;  %v9859_v3 = vmul.f32 %v18879_v48, %v9673_v46  ;;  %v19105_v48 = vld [vmem:[%s19542_s5] sm:$0xff] }
0x184e   :  { %v16840_v13 = vpack.c.bf16 %v9853_v62, %v9852_v32  ;;  %v16848_v57 = vpack.c.bf16 %v9865_v53, %v9864_v39  ;;  %v9846_v15 = vmul.f32 %v18897_v50, %v9672_v5  ;;  %v9858_v36 = vmul.f32 %v18891_v7, %v9672_v5  ;;  %v19112_v38 = vld [vmem:[%s19541_s4] sm:$0xff]  ;;  %v17281_v62 = vld [vmem:[%s19490_s16 + $0x28] sm:$0xff] }
0x184f   :  { %v9855_v8 = vsub.f32 %v9847_v9, %v9851_v30  ;;  %v9867_v51 = vadd.f32 %v9863_v28, %v9859_v3  ;;  %v17282_v30 = vld [vmem:[%s19489_s15 + $0x28] sm:$0xff]  ;;  %v17283_v39 = vld [vmem:[%s19490_s16 + $0x20] sm:$0xff] }
0x1850   :  { %v9854_v4 = vsub.f32 %v9846_v15, %v9850_v12  ;;  %v9866_v29 = vadd.f32 %v9862_v56, %v9858_v36  ;;  %16841 = vmatprep.subr.bf16.mxu1 %v16840_v13  ;;  %16857 = vmatprep.subr.bf16.mxu0 %v16840_v13  ;;  %v17284_v5 = vld [vmem:[%s19489_s15 + $0x20] sm:$0xff]  ;;  %v17285_v15 = vld [vmem:[%s19490_s16 + $0x38] sm:$0xff] }
0x1851   :  { %16843 = vmatpush3.bf16.msra.mxu1 %v16840_v13  ;;  %16859 = vmatpush3.bf16.msra.mxu0 %v16840_v13 }
0x1852   :  { %v16844_v31 = vpack.c.bf16 %v9855_v8, %v9854_v4  ;;  %v16852_v1 = vpack.c.bf16 %v9867_v51, %v9866_v29  ;;  %v17286_v8 = vld [vmem:[%s19489_s15 + $0x38] sm:$0xff] }
0x1854   :  { %16845 = vmatprep.subr.bf16.mxu1 %v16844_v31  ;;  %16861 = vmatprep.subr.bf16.mxu0 %v16844_v31 }
0x1855   :  { %16847 = vmatpush3.bf16.msra.mxu1 %v16844_v31  ;;  %16863 = vmatpush3.bf16.msra.mxu0 %v16844_v31 }
0x1856   :  { %16849 = vmatprep.subr.bf16.mxu1 %v16848_v57  ;;  %16865 = vmatprep.subr.bf16.mxu0 %v16848_v57 }
0x1858   :  { %15651 = vmatmul.mubr.msk.f32.vlgmr.msra.gmra.mrb[144].mxu1 %vm177_vm0, %v18675_v18  ;;  %15679 = vmatmul.mubr.msk.f32.vlgmr.msra.gmra.mrb[168].mxu0 %vm177_vm0, %v18682_v25 }
0x1859   :  { %16851 = vmatpush3.bf16.msra.mxu1 %v16848_v57  ;;  %16867 = vmatpush3.bf16.msra.mxu0 %v16848_v57 }
0x185a   :  { %16853 = vmatprep.subr.bf16.mxu1 %v16852_v1  ;;  %16869 = vmatprep.subr.bf16.mxu0 %v16852_v1 }
0x185b   :  { %15653 = vmatprep.mubr.msk.f32.mxu1 %vm177_vm0, %v18689_v26  ;;  %15681 = vmatprep.mubr.msk.f32.mxu0 %vm177_vm0, %v18696_v27 }
0x185c   :  { %15654 = vmatmul.mubr.msk.f32.gmra.mrb[146].mxu1 %vm177_vm0, %v18703_v45  ;;  %15682 = vmatmul.mubr.msk.f32.gmra.mrb[170].mxu0 %vm177_vm0, %v18710_v59 }
0x185d   :  { %16855 = vmatpush3.bf16.msra.mxu1 %v16852_v1  ;;  %16871 = vmatpush3.bf16.msra.mxu0 %v16852_v1  ;;  %v17287_v1 = vld [vmem:[%s19490_s16 + $0x30] sm:$0xff] }
0x185e   :  { %15664 = vmatprep.mubr.msk.f32.mxu1 %vm177_vm0, %v19105_v48  ;;  %15692 = vmatprep.mubr.msk.f32.mxu0 %vm177_vm0, %v19112_v38 }
0x185f   :  { %16889 = vmatprep.subr.bf16.mxu0 %v17708_v60  ;;  %16873 = vmatprep.subr.bf16.mxu1 %v17708_v60 }
0x1860   :  { %15665 = vmatmul.mubr.msk.f32.vlgmr.msra.gmra.mrb[148].mxu1 %vm177_vm0, %v18682_v25  ;;  %15693 = vmatmul.mubr.msk.f32.vlgmr.msra.gmra.mrb[168].mxu0 %vm177_vm0, %v18675_v18 }
0x1861   :  { %15667 = vmatprep.mubr.msk.f32.mxu1 %vm177_vm0, %v18696_v27  ;;  %15695 = vmatprep.mubr.msk.f32.mxu0 %vm177_vm0, %v18689_v26 }
0x1862   :  { %16891 = vmatpush3.bf16.msra.mxu0 %v17708_v60  ;;  %16875 = vmatpush3.bf16.msra.mxu1 %v17708_v60 }
0x1863   :  { %16893 = vmatprep.subr.bf16.mxu0 %v17720_v63  ;;  %16877 = vmatprep.subr.bf16.mxu1 %v17720_v63 }
0x1864   :  { %15668 = vmatmul.mubr.msk.f32.gmra.mrb[150].mxu1 %vm177_vm0, %v18710_v59  ;;  %15696 = vmatmul.mubr.msk.f32.gmra.mrb[170].mxu0 %vm177_vm0, %v18703_v45 }
0x1866   :  { %16895 = vmatpush3.bf16.msra.mxu0 %v17720_v63  ;;  %16879 = vmatpush3.bf16.msra.mxu1 %v17720_v63 }
0x1867   :  { %16897 = vmatprep.subr.bf16.mxu0 %v17732_v6  ;;  %16881 = vmatprep.subr.bf16.mxu1 %v17732_v6 }
0x192b   :  { %v15652_v18 = vpop.f32.mrb[144].mxu1 }
0x192c   :  { %v9934_v25 = vpop.f32.mrb[145].mxu1 }
0x192f   :  { %v15655_v26 = vpop.f32.mrb[146].mxu1 }
0x1930   :  { %v9944_v27 = vpop.f32.mrb[147].mxu1 }
0x1933   :  { %v15666_v7 = vpop.f32.mrb[148].mxu1  ;;  %v15694_v50 = vpop.f32.mrb[168].mxu0 }
0x1934   :  { %v10039_v49 = vsub.f32 %v15652_v18, %v15666_v7  ;;  %v10019_v52 = vpop.f32.mrb[149].mxu1  ;;  %v10193_v59 = vpop.f32.mrb[169].mxu0 }
0x1935   :  { %v10038_v37 = vsub.f32 %v9934_v25, %v10019_v52  ;;  %15734 = vmatprep.mubr.msk.f32.mxu0 %vm177_vm0, %v10193_v59 }
0x1936   :  { %15735 = vmatmul.mubr.msk.f32.vlgmr.msra.gmra.mrb[172].mxu0 %vm177_vm0, %v15694_v50 }
0x1937   :  { %v15669_v45 = vpop.f32.mrb[150].mxu1  ;;  %v15697_v22 = vpop.f32.mrb[170].mxu0  ;;  %15706 = vmatprep.mubr.msk.f32.mxu1 %vm177_vm0, %v10038_v37  ;;  %16899 = vmatpush3.bf16.msra.mxu0 %v17732_v6 }
0x1938   :  { %v10041_v42 = vsub.f32 %v15655_v26, %v15669_v45  ;;  %v10029_v19 = vpop.f32.mrb[151].mxu1  ;;  %v10203_v33 = vpop.f32.mrb[171].mxu0  ;;  %15707 = vmatmul.mubr.msk.f32.vlgmr.msra.gmra.mrb[152].mxu1 %vm177_vm0, %v10039_v49  ;;  %16901 = vmatprep.subr.bf16.mxu0 %v19555_v43 }
0x1939   :  { %v10040_v61 = vsub.f32 %v9944_v27, %v10029_v19  ;;  %16883 = vmatpush3.bf16.msra.mxu1 %v17732_v6  ;;  %15737 = vmatprep.mubr.msk.f32.mxu0 %vm177_vm0, %v10203_v33 }
0x193a   :  { %15738 = vmatmul.mubr.msk.f32.gmra.mrb[174].mxu0 %vm177_vm0, %v15697_v22  ;;  %16885 = vmatprep.subr.bf16.mxu1 %v19555_v43 }
0x193b   :  { %15709 = vmatprep.mubr.msk.f32.mxu1 %vm177_vm0, %v10040_v61  ;;  %16903 = vmatpush3.bf16.msra.mxu0 %v19555_v43 }
0x193c   :  { %15748 = vmatprep.mubr.msk.f32.mxu0 %vm177_vm0, %v10038_v37  ;;  %15710 = vmatmul.mubr.msk.f32.gmra.mrb[154].mxu1 %vm177_vm0, %v10041_v42 }
0x193d   :  { %16887 = vmatpush3.bf16.msra.mxu1 %v19555_v43  ;;  %15720 = vmatprep.mubr.msk.f32.mxu1 %vm177_vm0, %v10193_v59 }
0x193e   :  { %15749 = vmatmul.mubr.msk.f32.vlgmr.msra.gmra.mrb[172].mxu0 %vm177_vm0, %v10039_v49 }
0x193f   :  { %15751 = vmatprep.mubr.msk.f32.mxu0 %vm177_vm0, %v10040_v61 }
0x1940   :  { %15721 = vmatmul.mubr.msk.f32.vlgmr.msra.gmra.mrb[156].mxu1 %vm177_vm0, %v15694_v50  ;;  %v17288_v50 = vld [vmem:[%s19489_s15 + $0x30] sm:$0xff] }
0x1941   :  { %15723 = vmatprep.mubr.msk.f32.mxu1 %vm177_vm0, %v10203_v33 }
0x1942   :  { %15752 = vmatmul.mubr.msk.f32.gmra.mrb[174].mxu0 %vm177_vm0, %v10041_v42 }
0x1943   :  { %15790 = vmatprep.mubr.msk.f32.mxu0 %vm177_vm0, %v19162_v11 }
0x1944   :  { %15724 = vmatmul.mubr.msk.f32.gmra.mrb[158].mxu1 %vm177_vm0, %v15697_v22 }
0x1945   :  { %15762 = vmatprep.mubr.msk.f32.mxu1 %vm177_vm0, %v19170_v35 }
0x1a0b   :  { %v15708_v0 = vpop.f32.mrb[152].mxu1 }
0x1a0c   :  { %v10290_v21 = vpop.f32.mrb[153].mxu1 }
0x1a0f   :  { %v15711_v55 = vpop.f32.mrb[154].mxu1 }
0x1a10   :  { %v10300_v41 = vpop.f32.mrb[155].mxu1 }
0x1a11   :  { %v15750_v2 = vpop.f32.mrb[172].mxu0 }
0x1a12   :  { %v10561_v14 = vpop.f32.mrb[173].mxu0  ;;  %v10585_v53 = vmul.f32 %v17281_v62, %v15750_v2  ;;  %v10597_v46 = vmul.f32 %v17282_v30, %v15750_v2 }
0x1a13   :  { %v15722_v54 = vpop.f32.mrb[156].mxu1  ;;  %v10584_v28 = vmul.f32 %v17283_v39, %v10561_v14  ;;  %v10596_v12 = vmul.f32 %v17284_v5, %v10561_v14 }
0x1a14   :  { %v10407_v47 = vsub.f32 %v15708_v0, %v15722_v54  ;;  %v10387_v40 = vpop.f32.mrb[157].mxu1 }
0x1a15   :  { %v10406_v58 = vsub.f32 %v10290_v21, %v10387_v40  ;;  %v15753_v32 = vpop.f32.mrb[174].mxu0 }
0x1a16   :  { %v10581_v56 = vmul.f32 %v17282_v30, %v10407_v47  ;;  %v10593_v9 = vmul.f32 %v17281_v62, %v10407_v47  ;;  %v10571_v3 = vpop.f32.mrb[175].mxu0  ;;  %v10587_v36 = vmul.f32 %v17285_v15, %v15753_v32  ;;  %v10599_v51 = vmul.f32 %v17286_v8, %v15753_v32  ;;  %v17292_v30 = vld [vmem:[%s19536_s6 + $0x10] sm:$0xff] }
0x1a17   :  { %v10580_v13 = vmul.f32 %v17284_v5, %v10406_v58  ;;  %v10592_v57 = vmul.f32 %v17283_v39, %v10406_v58  ;;  %v15725_v4 = vpop.f32.mrb[158].mxu1  ;;  %v10586_v18 = vmul.f32 %v17287_v1, %v10571_v3  ;;  %v10598_v49 = vmul.f32 %v17288_v50, %v10571_v3  ;;  %v17294_v58 = vld [vmem:[%s19536_s6 + $0x18] sm:$0xff] }
0x1a18   :  { %v10589_v29 = vsub.f32 %v10581_v56, %v10585_v53  ;;  %v10601_v31 = vadd.f32 %v10597_v46, %v10593_v9  ;;  %v10409_v25 = vsub.f32 %v15711_v55, %v15725_v4  ;;  %v10397_v26 = vpop.f32.mrb[159].mxu1  ;;  %v17291_v53 = vld [vmem:[%s19538_s9 + $0x10] sm:$0xff]  ;;  %v17293_v46 = vld [vmem:[%s19538_s9 + $0x18] sm:$0xff] }
0x1a19   :  { %v10588_v27 = vsub.f32 %v10580_v13, %v10584_v28  ;;  %v10600_v7 = vadd.f32 %v10596_v12, %v10592_v57  ;;  %v10408_v52 = vsub.f32 %v10300_v41, %v10397_v26 }
0x1a1a   :  { %v10605_v59 = vmul.f32 %v18771_v24, %v10589_v29  ;;  %v10609_v37 = vmul.f32 %v18771_v24, %v10601_v31  ;;  %v10583_v45 = vmul.f32 %v17286_v8, %v10409_v25  ;;  %v10595_v22 = vmul.f32 %v17285_v15, %v10409_v25 }
0x1a1b   :  { %v10604_v42 = vmul.f32 %v18778_v10, %v10588_v27  ;;  %v10608_v19 = vmul.f32 %v18778_v10, %v10600_v7  ;;  %v10582_v33 = vmul.f32 %v17288_v50, %v10408_v52  ;;  %v10594_v61 = vmul.f32 %v17287_v1, %v10408_v52  ;;  %v17295_v27 = vld [vmem:[%s19492_s14 + $0x8] sm:$0xff] }
0x1a1c   :  { %v10591_v0 = vsub.f32 %v10583_v45, %v10587_v36  ;;  %v10603_v21 = vadd.f32 %v10599_v51, %v10595_v22  ;;  %v17296_v50 = vld [vmem:[%s19491_s13 + $0x8] sm:$0xff]  ;;  %v17297_v45 = vld [vmem:[%s19492_s14] sm:$0xff] }
0x1a1d   :  { %v10590_v55 = vsub.f32 %v10582_v33, %v10586_v18  ;;  %v10602_v2 = vadd.f32 %v10598_v49, %v10594_v61  ;;  %v16904_v14 = vpack.c.bf16 %v10605_v59, %v10604_v42  ;;  %v16912_v54 = vpack.c.bf16 %v10609_v37, %v10608_v19  ;;  %v17298_v42 = vld [vmem:[%s19491_s13] sm:$0xff] }
0x1a1e   :  { %v10607_v41 = vmul.f32 %v18999_v16, %v10591_v0  ;;  %v10611_v47 = vmul.f32 %v18999_v16, %v10603_v21  ;;  %v17289_v16 = vld [vmem:[%s19538_s9 + $0x8] sm:$0xff] }
0x1a1f   :  { %v10606_v24 = vmul.f32 %v19006_v44, %v10590_v55  ;;  %v10610_v40 = vmul.f32 %v19006_v44, %v10602_v2  ;;  %16905 = vmatprep.subr.bf16.mxu1 %v16904_v14  ;;  %16921 = vmatprep.subr.bf16.mxu0 %v16904_v14  ;;  %v17290_v44 = vld [vmem:[%s19536_s6 + $0x8] sm:$0xff]  ;;  %v17299_v2 = vld [vmem:[%s19492_s14 + $0x18] sm:$0xff] }
0x1a20   :  { %16907 = vmatpush3.bf16.msra.mxu1 %v16904_v14  ;;  %16923 = vmatpush3.bf16.msra.mxu0 %v16904_v14 }
0x1a21   :  { %v16908_v10 = vpack.c.bf16 %v10607_v41, %v10606_v24  ;;  %v16916_v62 = vpack.c.bf16 %v10611_v47, %v10610_v40  ;;  %v17300_v40 = vld [vmem:[%s19491_s13 + $0x18] sm:$0xff] }
0x1a23   :  { %16909 = vmatprep.subr.bf16.mxu1 %v16908_v10  ;;  %16925 = vmatprep.subr.bf16.mxu0 %v16908_v10 }
0x1a24   :  { %16911 = vmatpush3.bf16.msra.mxu1 %v16908_v10  ;;  %16927 = vmatpush3.bf16.msra.mxu0 %v16908_v10 }
0x1a25   :  { %16913 = vmatprep.subr.bf16.mxu1 %v16912_v54  ;;  %16929 = vmatprep.subr.bf16.mxu0 %v16912_v54 }
0x1a27   :  { %15763 = vmatmul.mubr.msk.f32.vlgmr.msra.gmra.mrb[160].mxu1 %vm177_vm0, %v17289_v16  ;;  %15791 = vmatmul.mubr.msk.f32.vlgmr.msra.gmra.mrb[176].mxu0 %vm177_vm0, %v17290_v44 }
0x1a28   :  { %16915 = vmatpush3.bf16.msra.mxu1 %v16912_v54  ;;  %16931 = vmatpush3.bf16.msra.mxu0 %v16912_v54 }
0x1a29   :  { %16917 = vmatprep.subr.bf16.mxu1 %v16916_v62  ;;  %16933 = vmatprep.subr.bf16.mxu0 %v16916_v62 }
0x1a2a   :  { %15765 = vmatprep.mubr.msk.f32.mxu1 %vm177_vm0, %v17291_v53  ;;  %15793 = vmatprep.mubr.msk.f32.mxu0 %vm177_vm0, %v17292_v30 }
0x1a2b   :  { %15766 = vmatmul.mubr.msk.f32.gmra.mrb[162].mxu1 %vm177_vm0, %v17293_v46  ;;  %15794 = vmatmul.mubr.msk.f32.gmra.mrb[178].mxu0 %vm177_vm0, %v17294_v58 }
0x1a2c   :  { %16919 = vmatpush3.bf16.msra.mxu1 %v16916_v62  ;;  %16935 = vmatpush3.bf16.msra.mxu0 %v16916_v62 }
0x1a2d   :  { %15776 = vmatprep.mubr.msk.f32.mxu1 %vm177_vm0, %v19162_v11  ;;  %15804 = vmatprep.mubr.msk.f32.mxu0 %vm177_vm0, %v19170_v35 }
0x1a2e   :  { %16953 = vmatprep.subr.bf16.mxu0 %v17536_v17  ;;  %16937 = vmatprep.subr.bf16.mxu1 %v17536_v17 }
0x1a2f   :  { %15777 = vmatmul.mubr.msk.f32.vlgmr.msra.gmra.mrb[164].mxu1 %vm177_vm0, %v17290_v44  ;;  %15805 = vmatmul.mubr.msk.f32.vlgmr.msra.gmra.mrb[176].mxu0 %vm177_vm0, %v17289_v16  ;;  %v17301_v16 = vld [vmem:[%s19492_s14 + $0x10] sm:$0xff] }
0x1a30   :  { %15779 = vmatprep.mubr.msk.f32.mxu1 %vm177_vm0, %v17292_v30  ;;  %15807 = vmatprep.mubr.msk.f32.mxu0 %vm177_vm0, %v17291_v53  ;;  %v17302_v53 = vld [vmem:[%s19491_s13 + $0x10] sm:$0xff] }
0x1a31   :  { %16955 = vmatpush3.bf16.msra.mxu0 %v17536_v17  ;;  %16939 = vmatpush3.bf16.msra.mxu1 %v17536_v17 }
0x1a32   :  { %16957 = vmatprep.subr.bf16.mxu0 %v17548_v20  ;;  %16941 = vmatprep.subr.bf16.mxu1 %v17548_v20 }
0x1a33   :  { %15780 = vmatmul.mubr.msk.f32.gmra.mrb[166].mxu1 %vm177_vm0, %v17294_v58  ;;  %15808 = vmatmul.mubr.msk.f32.gmra.mrb[178].mxu0 %vm177_vm0, %v17293_v46 }
0x1a35   :  { %16959 = vmatpush3.bf16.msra.mxu0 %v17548_v20  ;;  %16943 = vmatpush3.bf16.msra.mxu1 %v17548_v20 }
0x1a36   :  { %16961 = vmatprep.subr.bf16.mxu0 %v17560_v23  ;;  %16945 = vmatprep.subr.bf16.mxu1 %v17560_v23 }
0x1afa   :  { %v15764_v11 = vpop.f32.mrb[160].mxu1 }
0x1afb   :  { %v10678_v35 = vpop.f32.mrb[161].mxu1 }
0x1afe   :  { %v15767_v32 = vpop.f32.mrb[162].mxu1 }
0x1aff   :  { %v10688_v17 = vpop.f32.mrb[163].mxu1 }
0x1b02   :  { %v15778_v39 = vpop.f32.mrb[164].mxu1  ;;  %v15806_v28 = vpop.f32.mrb[176].mxu0 }
0x1b03   :  { %v10783_v5 = vsub.f32 %v15764_v11, %v15778_v39  ;;  %v10763_v12 = vpop.f32.mrb[165].mxu1  ;;  %v10937_v56 = vpop.f32.mrb[177].mxu0 }
0x1b04   :  { %v10782_v9 = vsub.f32 %v10678_v35, %v10763_v12  ;;  %15846 = vmatprep.mubr.msk.f32.mxu0 %vm177_vm0, %v10937_v56 }
0x1b05   :  { %15847 = vmatmul.mubr.msk.f32.vlgmr.msra.gmra.mrb[180].mxu0 %vm177_vm0, %v15806_v28 }
0x1b06   :  { %v15781_v3 = vpop.f32.mrb[166].mxu1  ;;  %v15809_v20 = vpop.f32.mrb[178].mxu0  ;;  %15818 = vmatprep.mubr.msk.f32.mxu1 %vm177_vm0, %v10782_v9  ;;  %16963 = vmatpush3.bf16.msra.mxu0 %v17560_v23 }
0x1b07   :  { %v10785_v13 = vsub.f32 %v15767_v32, %v15781_v3  ;;  %v10773_v57 = vpop.f32.mrb[167].mxu1  ;;  %v10947_v15 = vpop.f32.mrb[179].mxu0  ;;  %15819 = vmatmul.mubr.msk.f32.vlgmr.msra.gmra.mrb[168].mxu1 %vm177_vm0, %v10783_v5  ;;  %16965 = vmatprep.subr.bf16.mxu0 %v17580_v34  ;;  %v17303_v3 = vld [vmem:[%s19541_s4 + $0x8] sm:$0xff] }
0x1b08   :  { %v10784_v36 = vsub.f32 %v10688_v17, %v10773_v57  ;;  %16947 = vmatpush3.bf16.msra.mxu1 %v17560_v23  ;;  %15849 = vmatprep.mubr.msk.f32.mxu0 %vm177_vm0, %v10947_v15  ;;  %v17306_v57 = vld [vmem:[%s19542_s5 + $0x10] sm:$0xff] }
0x1b09   :  { %15850 = vmatmul.mubr.msk.f32.gmra.mrb[182].mxu0 %vm177_vm0, %v15809_v20  ;;  %16949 = vmatprep.subr.bf16.mxu1 %v17580_v34 }
0x1b0a   :  { %15821 = vmatprep.mubr.msk.f32.mxu1 %vm177_vm0, %v10784_v36  ;;  %16967 = vmatpush3.bf16.msra.mxu0 %v17580_v34 }
0x1b0b   :  { %15860 = vmatprep.mubr.msk.f32.mxu0 %vm177_vm0, %v10782_v9  ;;  %15822 = vmatmul.mubr.msk.f32.gmra.mrb[170].mxu1 %vm177_vm0, %v10785_v13 }
0x1b0c   :  { %16951 = vmatpush3.bf16.msra.mxu1 %v17580_v34  ;;  %15832 = vmatprep.mubr.msk.f32.mxu1 %vm177_vm0, %v10937_v56 }
0x1b0d   :  { %15861 = vmatmul.mubr.msk.f32.vlgmr.msra.gmra.mrb[180].mxu0 %vm177_vm0, %v10783_v5 }
0x1b0e   :  { %15863 = vmatprep.mubr.msk.f32.mxu0 %vm177_vm0, %v10784_v36  ;;  %v17308_v36 = vld [vmem:[%s19542_s5 + $0x18] sm:$0xff] }
0x1b0f   :  { %15833 = vmatmul.mubr.msk.f32.vlgmr.msra.gmra.mrb[172].mxu1 %vm177_vm0, %v15806_v28 }
0x1b10   :  { %15835 = vmatprep.mubr.msk.f32.mxu1 %vm177_vm0, %v10947_v15  ;;  %v17307_v15 = vld [vmem:[%s19541_s4 + $0x18] sm:$0xff] }
0x1b11   :  { %15864 = vmatmul.mubr.msk.f32.gmra.mrb[182].mxu0 %vm177_vm0, %v10785_v13  ;;  %v17305_v13 = vld [vmem:[%s19541_s4 + $0x10] sm:$0xff] }
0x1b12   :  { %15902 = vmatprep.mubr.msk.f32.mxu0 %vm177_vm0, %v19105_v48 }
0x1b13   :  { %15836 = vmatmul.mubr.msk.f32.gmra.mrb[174].mxu1 %vm177_vm0, %v15809_v20  ;;  %v17304_v20 = vld [vmem:[%s19542_s5 + $0x8] sm:$0xff] }
0x1b14   :  { %15874 = vmatprep.mubr.msk.f32.mxu1 %vm177_vm0, %v19112_v38 }
0x1bda   :  { %v15820_v23 = vpop.f32.mrb[168].mxu1 }
0x1bdb   :  { %v11034_v34 = vpop.f32.mrb[169].mxu1 }
0x1bde   :  { %v15823_v8 = vpop.f32.mrb[170].mxu1 }
0x1bdf   :  { %v11044_v51 = vpop.f32.mrb[171].mxu1 }
0x1be0   :  { %v15862_v4 = vpop.f32.mrb[180].mxu0 }
0x1be1   :  { %v11305_v29 = vpop.f32.mrb[181].mxu0  ;;  %v11329_v7 = vmul.f32 %v17295_v27, %v15862_v4  ;;  %v11341_v49 = vmul.f32 %v17296_v50, %v15862_v4 }
0x1be2   :  { %v15834_v31 = vpop.f32.mrb[172].mxu1  ;;  %v11328_v22 = vmul.f32 %v17297_v45, %v11305_v29  ;;  %v11340_v19 = vmul.f32 %v17298_v42, %v11305_v29 }
0x1be3   :  { %v11151_v1 = vsub.f32 %v15820_v23, %v15834_v31  ;;  %v11131_v18 = vpop.f32.mrb[173].mxu1 }
0x1be4   :  { %v11150_v25 = vsub.f32 %v11034_v34, %v11131_v18  ;;  %v15865_v26 = vpop.f32.mrb[182].mxu0 }
0x1be5   :  { %v11325_v52 = vmul.f32 %v17296_v50, %v11151_v1  ;;  %v11337_v59 = vmul.f32 %v17295_v27, %v11151_v1  ;;  %v11315_v37 = vpop.f32.mrb[183].mxu0  ;;  %v11331_v14 = vmul.f32 %v17299_v2, %v15865_v26  ;;  %v11343_v10 = vmul.f32 %v17300_v40, %v15865_v26 }
0x1be6   :  { %v11324_v33 = vmul.f32 %v17298_v42, %v11150_v25  ;;  %v11336_v61 = vmul.f32 %v17297_v45, %v11150_v25  ;;  %v15837_v0 = vpop.f32.mrb[174].mxu1  ;;  %v11330_v44 = vmul.f32 %v17301_v16, %v11315_v37  ;;  %v11342_v30 = vmul.f32 %v17302_v53, %v11315_v37 }
0x1be7   :  { %v11333_v21 = vsub.f32 %v11325_v52, %v11329_v7  ;;  %v11345_v55 = vadd.f32 %v11341_v49, %v11337_v59  ;;  %v11153_v54 = vsub.f32 %v15823_v8, %v15837_v0  ;;  %v11141_v41 = vpop.f32.mrb[175].mxu1 }
0x1be8   :  { %v11332_v47 = vsub.f32 %v11324_v33, %v11328_v22  ;;  %v11344_v24 = vadd.f32 %v11340_v19, %v11336_v61  ;;  %v11152_v62 = vsub.f32 %v11044_v51, %v11141_v41 }
0x1be9   :  { %v11327_v46 = vmul.f32 %v17300_v40, %v11153_v54  ;;  %v11339_v58 = vmul.f32 %v17299_v2, %v11153_v54 }
0x1bea   :  { %v16968_v11 = vpack.c.bf16 %v11333_v21, %v11332_v47  ;;  %v16976_v35 = vpack.c.bf16 %v11345_v55, %v11344_v24  ;;  %v11326_v32 = vmul.f32 %v17302_v53, %v11152_v62  ;;  %v11338_v17 = vmul.f32 %v17301_v16, %v11152_v62 }
0x1beb   :  { %v11335_v39 = vsub.f32 %v11327_v46, %v11331_v14  ;;  %v11347_v28 = vadd.f32 %v11343_v10, %v11339_v58  ;;  %v19556_v58 = vld [vmem:[#allocation4_spill] sm:$0xff] }
0x1bec   :  { %v11334_v5 = vsub.f32 %v11326_v32, %v11330_v44  ;;  %v11346_v12 = vadd.f32 %v11342_v30, %v11338_v17  ;;  %16969 = vmatprep.subr.bf16.mxu1 %v16968_v11  ;;  %16985 = vmatprep.subr.bf16.mxu0 %v16968_v11 }
0x1bed   :  { %16971 = vmatpush3.bf16.msra.mxu1 %v16968_v11  ;;  %16987 = vmatpush3.bf16.msra.mxu0 %v16968_v11  ;;  %v17310_v11 = vld [vmem:[%s19493_s18 + $0x8] sm:$0xff] }
0x1bee   :  { %v16972_v56 = vpack.c.bf16 %v11335_v39, %v11334_v5  ;;  %v16980_v9 = vpack.c.bf16 %v11347_v28, %v11346_v12  ;;  %v19558_v39 = vld [vmem:[#allocation8_spill] sm:$0xff] }
0x1bef   :  { %v6270_v28 = vrot.slane %v19558_v39, 4 }
0x1bf0   :  { %16973 = vmatprep.subr.bf16.mxu1 %v16972_v56  ;;  %16989 = vmatprep.subr.bf16.mxu0 %v16972_v56 }
0x1bf1   :  { %16975 = vmatpush3.bf16.msra.mxu1 %v16972_v56  ;;  %16991 = vmatpush3.bf16.msra.mxu0 %v16972_v56  ;;  %v6271_v12 = vadd.f32 %v6270_v28, %v19558_v39  ;;  %v19559_v56 = vld [vmem:[#allocation6_spill] sm:$0xff] }
0x1bf2   :  { %16977 = vmatprep.subr.bf16.mxu1 %v16976_v35  ;;  %16993 = vmatprep.subr.bf16.mxu0 %v16976_v35 }
0x1bf4   :  { %15875 = vmatmul.mubr.msk.f32.vlgmr.msra.gmra.mrb[176].mxu1 %vm177_vm0, %v17303_v3  ;;  %15903 = vmatmul.mubr.msk.f32.vlgmr.msra.gmra.mrb[184].mxu0 %vm177_vm0, %v17304_v20 }
0x1bf5   :  { %16979 = vmatpush3.bf16.msra.mxu1 %v16976_v35  ;;  %16995 = vmatpush3.bf16.msra.mxu0 %v16976_v35  ;;  %v19557_v35 = vld [vmem:[#allocation5_spill] sm:$0xff] }
0x1bf6   :  { %16981 = vmatprep.subr.bf16.mxu1 %v16980_v9  ;;  %16997 = vmatprep.subr.bf16.mxu0 %v16980_v9 }
0x1bf7   :  { %15877 = vmatprep.mubr.msk.f32.mxu1 %vm177_vm0, %v17305_v13  ;;  %15905 = vmatprep.mubr.msk.f32.mxu0 %vm177_vm0, %v17306_v57 }
0x1bf8   :  { %15878 = vmatmul.mubr.msk.f32.gmra.mrb[178].mxu1 %vm177_vm0, %v17307_v15  ;;  %15906 = vmatmul.mubr.msk.f32.gmra.mrb[186].mxu0 %vm177_vm0, %v17308_v36 }
0x1bf9   :  { %16983 = vmatpush3.bf16.msra.mxu1 %v16980_v9  ;;  %16999 = vmatpush3.bf16.msra.mxu0 %v16980_v9 }
0x1bfa   :  { %15888 = vmatprep.mubr.msk.f32.mxu1 %vm177_vm0, %v19105_v48  ;;  %15916 = vmatprep.mubr.msk.f32.mxu0 %vm177_vm0, %v19112_v38 }
0x1bfb   :  { %17017 = vmatprep.subr.bf16.mxu0 %v17708_v60  ;;  %17001 = vmatprep.subr.bf16.mxu1 %v17708_v60 }
0x1bfc   :  { %15889 = vmatmul.mubr.msk.f32.vlgmr.msra.gmra.mrb[180].mxu1 %vm177_vm0, %v17304_v20  ;;  %15917 = vmatmul.mubr.msk.f32.vlgmr.msra.gmra.mrb[184].mxu0 %vm177_vm0, %v17303_v3  ;;  %v19560_v20 = vld [vmem:[#allocation7_spill] sm:$0xff] }
0x1bfd   :  { %15891 = vmatprep.mubr.msk.f32.mxu1 %vm177_vm0, %v17306_v57  ;;  %15919 = vmatprep.mubr.msk.f32.mxu0 %vm177_vm0, %v17305_v13 }
0x1bfe   :  { %17019 = vmatpush3.bf16.msra.mxu0 %v17708_v60  ;;  %17003 = vmatpush3.bf16.msra.mxu1 %v17708_v60 }
0x1bff   :  { %17021 = vmatprep.subr.bf16.mxu0 %v17720_v63  ;;  %17005 = vmatprep.subr.bf16.mxu1 %v17720_v63 }
0x1c00   :  { %15892 = vmatmul.mubr.msk.f32.gmra.mrb[182].mxu1 %vm177_vm0, %v17308_v36  ;;  %15920 = vmatmul.mubr.msk.f32.gmra.mrb[186].mxu0 %vm177_vm0, %v17307_v15  ;;  %v6272_v36 = vrot.slane %v6271_v12, 2 }
0x1c02   :  { %17023 = vmatpush3.bf16.msra.mxu0 %v17720_v63  ;;  %17007 = vmatpush3.bf16.msra.mxu1 %v17720_v63 }
0x1c03   :  { %17025 = vmatprep.subr.bf16.mxu0 %v17732_v6  ;;  %17009 = vmatprep.subr.bf16.mxu1 %v17732_v6 }
0x1cc7   :  { %v15876_v48 = vpop.f32.mrb[176].mxu1 }
0x1cc8   :  { %v11414_v38 = vpop.f32.mrb[177].mxu1 }
0x1ccb   :  { %v15879_v23 = vpop.f32.mrb[178].mxu1 }
0x1ccc   :  { %v11424_v60 = vpop.f32.mrb[179].mxu1 }
0x1ccf   :  { %v15890_v34 = vpop.f32.mrb[180].mxu1  ;;  %v15918_v8 = vpop.f32.mrb[184].mxu0 }
0x1cd0   :  { %v11519_v51 = vsub.f32 %v15876_v48, %v15890_v34  ;;  %v11499_v4 = vpop.f32.mrb[181].mxu1  ;;  %v11673_v29 = vpop.f32.mrb[185].mxu0 }
0x1cd1   :  { %v11518_v31 = vsub.f32 %v11414_v38, %v11499_v4  ;;  %15958 = vmatprep.mubr.msk.f32.mxu0 %vm177_vm0, %v11673_v29 }
0x1cd2   :  { %15959 = vmatmul.mubr.msk.f32.vlgmr.msra.gmra.mrb[188].mxu0 %vm177_vm0, %v15918_v8 }
0x1cd3   :  { %v15893_v1 = vpop.f32.mrb[182].mxu1  ;;  %v15921_v63 = vpop.f32.mrb[186].mxu0  ;;  %15930 = vmatprep.mubr.msk.f32.mxu1 %vm177_vm0, %v11518_v31  ;;  %17027 = vmatpush3.bf16.msra.mxu0 %v17732_v6 }
0x1cd4   :  { %v11521_v18 = vsub.f32 %v15879_v23, %v15893_v1  ;;  %v11509_v25 = vpop.f32.mrb[183].mxu1  ;;  %v11683_v26 = vpop.f32.mrb[187].mxu0  ;;  %15931 = vmatmul.mubr.msk.f32.vlgmr.msra.gmra.mrb[184].mxu1 %vm177_vm0, %v11519_v51  ;;  %17029 = vmatprep.subr.bf16.mxu0 %v19555_v43  ;;  %v6273_v23 = vadd.f32 %v6272_v36, %v6271_v12 }
0x1cd5   :  { %v11520_v27 = vsub.f32 %v11424_v60, %v11509_v25  ;;  %17011 = vmatpush3.bf16.msra.mxu1 %v17732_v6  ;;  %15961 = vmatprep.mubr.msk.f32.mxu0 %vm177_vm0, %v11683_v26  ;;  %v17309_v6 = vld [vmem:[%s19493_s18] sm:$0xff] }
0x1cd6   :  { %15962 = vmatmul.mubr.msk.f32.gmra.mrb[190].mxu0 %vm177_vm0, %v15921_v63  ;;  %17013 = vmatprep.subr.bf16.mxu1 %v19555_v43 }
0x1cd7   :  { %15933 = vmatprep.mubr.msk.f32.mxu1 %vm177_vm0, %v11520_v27  ;;  %17031 = vmatpush3.bf16.msra.mxu0 %v19555_v43 }
0x1cd8   :  { %15972 = vmatprep.mubr.msk.f32.mxu0 %vm177_vm0, %v11518_v31  ;;  %15934 = vmatmul.mubr.msk.f32.gmra.mrb[186].mxu1 %vm177_vm0, %v11521_v18 }
0x1cd9   :  { %17015 = vmatpush3.bf16.msra.mxu1 %v19555_v43  ;;  %15944 = vmatprep.mubr.msk.f32.mxu1 %vm177_vm0, %v11673_v29 }
0x1cda   :  { %15973 = vmatmul.mubr.msk.f32.vlgmr.msra.gmra.mrb[188].mxu0 %vm177_vm0, %v11519_v51 }
0x1cdb   :  { %15975 = vmatprep.mubr.msk.f32.mxu0 %vm177_vm0, %v11520_v27 }
0x1cdc   :  { %15945 = vmatmul.mubr.msk.f32.vlgmr.msra.gmra.mrb[188].mxu1 %vm177_vm0, %v15918_v8  ;;  %v6274_v8 = vrot.slane %v6273_v23, 1 }
0x1cdd   :  { %15947 = vmatprep.mubr.msk.f32.mxu1 %vm177_vm0, %v11683_v26 }
0x1cde   :  { %15976 = vmatmul.mubr.msk.f32.gmra.mrb[190].mxu0 %vm177_vm0, %v11521_v18  ;;  %v6275_v29 = vadd.f32 %v6274_v8, %v6273_v23 }
0x1ce0   :  { %15948 = vmatmul.mubr.msk.f32.gmra.mrb[190].mxu1 %vm177_vm0, %v15921_v63 }
0x1ce1   :  { %15986 = vmatprep.mubr.msk.f32.mxu1 %vm177_vm0, %v17309_v6  ;;  %v12244_v6 = vld [vmem:[%s19495_s20 + $0x18] sm:$0xff] }
0x1da7   :  { %v15932_v43 = vpop.f32.mrb[184].mxu1 }
0x1da8   :  { %v11770_v7 = vpop.f32.mrb[185].mxu1 }
0x1dab   :  { %v15935_v50 = vpop.f32.mrb[186].mxu1 }
0x1dac   :  { %v11780_v49 = vpop.f32.mrb[187].mxu1 }
0x1dad   :  { %v15974_v52 = vpop.f32.mrb[188].mxu0 }
0x1dae   :  { %v12041_v59 = vpop.f32.mrb[189].mxu0  ;;  %v12065_v33 = vmul.f32 %v15974_v52, %v15974_v52 }
0x1daf   :  { %v15946_v37 = vpop.f32.mrb[188].mxu1  ;;  %v12064_v21 = vmul.f32 %v12041_v59, %v12041_v59 }
0x1db0   :  { %v11887_v45 = vsub.f32 %v15932_v43, %v15946_v37  ;;  %v11867_v22 = vpop.f32.mrb[189].mxu1  ;;  %v12241_v43 = vld [vmem:[%s19495_s20] sm:$0xff]  ;;  %v12242_v37 = vld [vmem:[%s19495_s20 + $0x8] sm:$0xff] }
0x1db1   :  { %v11886_v42 = vsub.f32 %v11770_v7, %v11867_v22  ;;  %v15977_v19 = vpop.f32.mrb[190].mxu0 }
0x1db2   :  { %v12061_v61 = vmul.f32 %v11887_v45, %v11887_v45  ;;  %v12051_v0 = vpop.f32.mrb[191].mxu0  ;;  %v12067_v40 = vmul.f32 %v15977_v19, %v15977_v19  ;;  %v12243_v45 = vld [vmem:[%s19495_s20 + $0x10] sm:$0xff] }
0x1db3   :  { %v12060_v55 = vmul.f32 %v11886_v42, %v11886_v42  ;;  %v15949_v2 = vpop.f32.mrb[190].mxu1  ;;  %v12066_v62 = vmul.f32 %v12051_v0, %v12051_v0 }
0x1db4   :  { %v12069_v14 = vadd.f32 %v12065_v33, %v12061_v61  ;;  %v11889_v54 = vsub.f32 %v15935_v50, %v15949_v2  ;;  %v11877_v41 = vpop.f32.mrb[191].mxu1 }
0x1db5   :  { %v12068_v47 = vadd.f32 %v12064_v21, %v12060_v55  ;;  %v11888_v24 = vsub.f32 %v11780_v49, %v11877_v41 }
0x1db6   :  { %v12063_v10 = vmul.f32 %v11889_v54, %v11889_v54 }
0x1db7   :  { %v12062_v16 = vmul.f32 %v11888_v24, %v11888_v24  ;;  %v17032_v44 = vpack.c.bf16 %v12069_v14, %v12068_v47 }
0x1db8   :  { %v12071_v53 = vadd.f32 %v12067_v40, %v12063_v10 }
0x1db9   :  { %v12070_v30 = vadd.f32 %v12066_v62, %v12062_v16  ;;  %17033 = vmatprep.subr.bf16.mxu1 %v17032_v44 }
0x1dba   :  { %17035 = vmatpush3.bf16.msra.mxu1 %v17032_v44 }
0x1dbb   :  { %v17036_v46 = vpack.c.bf16 %v12071_v53, %v12070_v30 }
0x1dbd   :  { %17037 = vmatprep.subr.bf16.mxu1 %v17036_v46 }
0x1dbe   :  { %17039 = vmatpush3.bf16.msra.mxu1 %v17036_v46 }
0x1dbf   :  { %17041 = vmatprep.subr.bf16.mxu1 %v19556_v58 }
0x1dc1   :  { %15987 = vmatmul.mubr.msk.f32.vlgmr.msra.gmra.mrb[192].mxu1 %vm177_vm0, %v17310_v11 }
0x1dc2   :  { %17043 = vmatpush3.bf16.msra.mxu1 %v19556_v58 }
0x1dc3   :  { %17045 = vmatprep.subr.bf16.mxu1 %v19557_v35 }
0x1dc6   :  { %17047 = vmatpush3.bf16.msra.mxu1 %v19557_v35 }
0x1e94   :  { %v15988_v32 = vpop.f32.mrb[192].mxu1 }
0x1e95   :  { %v12138_v17 = vpop.f32.mrb[193].mxu1 }
0x1e96   :  { %15997 = vmatprep.mubr.msk.f32.mxu1 %vm177_vm0, %v12138_v17 }
0x1e97   :  { %15998 = vmatmul.mubr.msk.f32.vlgmr.msra.gmra.mrb[194].mxu1 %vm177_vm0, %v15988_v32 }
0x1f6a   :  { %v15999_v5 = vpop.f32.mrb[194].mxu1 }
0x1f6b   :  { %v12229_v9 = vmul.f32 %v15999_v5, %v19559_v56  ;;  %v12219_v3 = vpop.f32.mrb[195].mxu1  ;;  %v12342_v56 = vld [vmem:[%s19496_s21] sm:$0xff] }
0x1f6c   :  { %v12228_v13 = vmul.f32 %v12219_v3, %v19560_v20  ;;  %v12452_v20 = vld [vmem:[%s19497_s23] sm:$0xff] }
0x1f6d   :  { %v12231_v57 = vsel %vm6266_vm3, %v12229_v9, 0.0  ;;  %v12343_v9 = vld [vmem:[%s19496_s21 + $0x8] sm:$0xff] }
0x1f6e   :  { %v12230_v15 = vsel %vm6266_vm3, %v12228_v13, 0.0  ;;  %v17048_v3 = vpack.c.bf16 %v12343_v9, %v12342_v56  ;;  %v12453_v13 = vld [vmem:[%s19497_s23 + $0x8] sm:$0xff] }
0x1f6f   :  { %v12232_v48 = vadd.f32 %v12231_v57, %v12230_v15  ;;  %v17052_v57 = vpack.c.bf16 %v12453_v13, %v12452_v20 }
0x1f70   :  { %17049 = vmatprep.subr.bf16.mxu1 %v17048_v3 }
0x1f71   :  { %v12233_v38 = vrot.slane %v12232_v48, 4  ;;  %17051 = vmatpush3.bf16.msra.mxu1 %v17048_v3  ;;  %17053 = vmatprep.subr.bf16.mxu0 %v17052_v57 }
0x1f72   :  { %17055 = vmatpush3.bf16.msra.mxu0 %v17052_v57 }
0x1f73   :  { %v12234_v60 = vadd.f32 %v12233_v38, %v12232_v48 }
0x1f75   :  { %v12235_v34 = vrot.slane %v12234_v60, 2 }
0x1f77   :  { %v12236_v51 = vadd.f32 %v12235_v34, %v12234_v60 }
0x1f79   :  { %v12237_v4 = vrot.slane %v12236_v51, 1 }
0x1f7b   :  { %v12238_v31 = vadd.f32 %v12237_v4, %v12236_v51 }
0x1f7d   :  { %v12240_v1 = vsel %vm12239_vm4, %v6275_v29, %v12238_v31 }
0x1f7e   :  { %v12263_v63 = vsel %vm12262_vm5, %v12240_v1, 0.0  ;;  %v12270_v18 = vmul.f32 %v12240_v1, %v12240_v1  ;;  %v12246_v25 = vrot.slane %v12240_v1, 6  ;;  %v12248_v26 = vrot.slane %v12240_v1, 4 }
0x1f7f   :  { %v12264_v27 = vrot.slane %v12263_v63, 4  ;;  %v12250_v50 = vrot.slane %v12240_v1, 2 }
0x1f80   :  { %v12271_v7 = vsel %vm12262_vm5, %v12270_v18, 0.0  ;;  %v12253_v49 = vsel %vm12252_vm6, %v12240_v1, %v12246_v25 }
0x1f81   :  { %v12265_v52 = vadd.f32 %v12264_v27, %v12263_v63  ;;  %v12272_v59 = vrot.slane %v12271_v7, 4  ;;  %v12255_v22 = vsel %vm12254_vm7, %v12253_v49, %v12248_v26 }
0x1f82   :  { %v12257_v42 = vsel %vm12256_vm8, %v12255_v22, %v12250_v50 }
0x1f83   :  { %v12266_v19 = vrot.slane %v12265_v52, 2  ;;  %v12273_v33 = vadd.f32 %v12272_v59, %v12271_v7  ;;  %v19399_v61 = vmul.f32 %v12257_v42, %v12244_v6  ;;  %v19401_v0 = vmul.f32 %v12257_v42, %v12241_v43 }
0x1f84   :  { %v19403_v21 = vmul.f32 %v12257_v42, %v12242_v37  ;;  %v19405_v55 = vmul.f32 %v12257_v42, %v12243_v45 }
0x1f85   :  { %v12267_v2 = vadd.f32 %v12266_v19, %v12265_v52  ;;  %v12274_v14 = vrot.slane %v12273_v33, 2 }
0x1f87   :  { %v12268_v54 = vrot.slane %v12267_v2, 1  ;;  %v12275_v41 = vadd.f32 %v12274_v14, %v12273_v33 }
0x1f89   :  { %v12269_v47 = vadd.f32 %v12268_v54, %v12267_v2  ;;  %v12276_v24 = vrot.slane %v12275_v41, 1 }
0x1f8b   :  { %v12281_v40 = vmul.f32 %v12269_v47, %v12244_v6  ;;  %v12278_v10 = vmul.f32 %v12269_v47, %v12241_v43  ;;  %v12277_v62 = vadd.f32 %v12276_v24, %v12275_v41  ;;  %v12279_v30 = vmul.f32 %v12269_v47, %v12242_v37 }
0x1f8c   :  { %v12280_v35 = vmul.f32 %v12269_v47, %v12243_v45 }
0x1f8d   :  { %v12291_v16 = vsel %vm6266_vm3, %v12281_v40, 0.0  ;;  %v12282_v44 = vsel %vm6266_vm3, %v12278_v10, 0.0  ;;  %v12298_v53 = vmul.f32 %v12277_v62, %v12241_v43  ;;  %v12285_v58 = vsel %vm6266_vm3, %v12279_v30, 0.0 }
0x1f8e   :  { %12292 = vadd.xlane.f32.xlu1 %v12291_v16  ;;  %12283 = vadd.xlane.f32.xlu0 %v12282_v44  ;;  %v12299_v11 = vmul.f32 %v12277_v62, %v12242_v37  ;;  %v12288_v17 = vsel %vm6266_vm3, %v12280_v35, 0.0  ;;  %v12301_v39 = vmul.f32 %v12277_v62, %v12244_v6  ;;  %v12300_v28 = vmul.f32 %v12277_v62, %v12243_v45 }
0x1f8f   :  { %v12302_v46 = vsel %vm6266_vm3, %v12298_v53, 0.0 }
0x1f90   :  { %v12305_v32 = vsel %vm6266_vm3, %v12299_v11, 0.0  ;;  %v12311_v5 = vsel %vm6266_vm3, %v12301_v39, 0.0  ;;  %v12308_v12 = vsel %vm6266_vm3, %v12300_v28, 0.0 }
0x1f92   :  { %12303 = vadd.xlane.f32.xlu1 %v12302_v46  ;;  %12286 = vadd.xlane.f32.xlu0 %v12285_v58 }
0x1f96   :  { %12306 = vadd.xlane.f32.xlu1 %v12305_v32  ;;  %12289 = vadd.xlane.f32.xlu0 %v12288_v17 }
0x1f9a   :  { %12312 = vadd.xlane.f32.xlu1 %v12311_v5  ;;  %12309 = vadd.xlane.f32.xlu0 %v12308_v12  ;;  %v13146_v5 = vld [vmem:[%s19499_s24] ss:$0 sm:$0xff] }
0x201b   :  { %v12293_v15 = vpop.xlane.xlu1 %12292  ;;  %v12284_v36 = vpop.xlane.xlu0 %12283 }
0x201c   :  { %v12294_v48 = vmul.f32 0.03125, %v12284_v36  ;;  %v12297_v4 = vmul.f32 0.03125, %v12293_v15 }
0x201e   :  { %v12318_v60 = vmul.f32 %v12294_v48, %v12294_v48  ;;  %v12321_v27 = vmul.f32 %v12297_v4, %v12297_v4  ;;  %v12334_v42 = vsub.f32 %v19401_v0, %v12294_v48  ;;  %v12337_v41 = vsub.f32 %v19399_v61, %v12297_v4  ;;  %v12454_v0 = vld [vmem:[%s19497_s23 + $0x10] sm:$0xff]  ;;  %v12455_v61 = vld [vmem:[%s19497_s23 + $0x18] sm:$0xff] }
0x201f   :  { %v12304_v38 = vpop.xlane.xlu1 %12303  ;;  %v12287_v23 = vpop.xlane.xlu0 %12286 }
0x2020   :  { %v12314_v34 = vmul.f32 0.03125, %v12304_v38  ;;  %v12295_v8 = vmul.f32 0.03125, %v12287_v23 }
0x2022   :  { %v12322_v51 = vsub.f32 %v12314_v34, %v12318_v60  ;;  %v12319_v63 = vmul.f32 %v12295_v8, %v12295_v8  ;;  %v12335_v2 = vsub.f32 %v19403_v21, %v12295_v8  ;;  %v17056_v21 = vpack.c.bf16 %v12455_v61, %v12454_v0 }
0x2023   :  { %v12307_v29 = vpop.xlane.xlu1 %12306  ;;  %v12290_v31 = vpop.xlane.xlu0 %12289 }
0x2024   :  { %v12326_v1 = vadd.f32 1e-05, %v12322_v51  ;;  %v12315_v18 = vmul.f32 0.03125, %v12307_v29  ;;  %v12296_v25 = vmul.f32 0.03125, %v12290_v31  ;;  %17057 = vmatprep.subr.bf16.mxu0 %v17056_v21 }
0x2025   :  { %17059 = vmatpush3.bf16.msra.mxu0 %v17056_v21 }
0x2026   :  { %17189 = vrsqrt.f32 %v12326_v1  ;;  %v12323_v26 = vsub.f32 %v12315_v18, %v12319_v63  ;;  %v12320_v50 = vmul.f32 %v12296_v25, %v12296_v25  ;;  %v12336_v24 = vsub.f32 %v19405_v55, %v12296_v25  ;;  %v13141_v55 = vld [vmem:[%s19498_s22] ss:$0 sm:$0xff] }
0x2027   :  { %v12313_v6 = vpop.xlane.xlu1 %12312  ;;  %v12310_v43 = vpop.xlane.xlu0 %12309 }
0x2028   :  { %v12327_v7 = vadd.f32 1e-05, %v12323_v26  ;;  %v12317_v49 = vmul.f32 0.03125, %v12313_v6  ;;  %v12316_v52 = vmul.f32 0.03125, %v12310_v43 }
0x202a   :  { %17191 = vrsqrt.f32 %v12327_v7  ;;  %v12325_v59 = vsub.f32 %v12317_v49, %v12321_v27  ;;  %v12324_v37 = vsub.f32 %v12316_v52, %v12320_v50 }
0x202c   :  { %v12329_v45 = vadd.f32 1e-05, %v12325_v59  ;;  %v12328_v22 = vadd.f32 1e-05, %v12324_v37 }
0x202e   :  { %17193 = vrsqrt.f32 %v12329_v45 }
0x202f   :  { %17195 = vrsqrt.f32 %v12328_v22 }
0x2030   :  { %v17190_v19 = vpop.eup %17189 }
0x2031   :  { %v12338_v33 = vmul.f32 %v17190_v19, %v12334_v42 }
0x2033   :  { %16004 = vmatprep.mubr.msk.f32.mxu1 %vm6266_vm3, %v12338_v33 }
0x2034   :  { %v17192_v14 = vpop.eup %17191 }
0x2035   :  { %v12339_v54 = vmul.f32 %v17192_v14, %v12335_v2 }
0x2037   :  { %16005 = vmatmul.mubr.msk.f32.vlgmr.msra.gmra.mrb[196].mxu1 %vm6266_vm3, %v12339_v54 }
0x2038   :  { %v17194_v47 = vpop.eup %17193 }
0x2039   :  { %v17196_v40 = vpop.eup %17195  ;;  %v12341_v10 = vmul.f32 %v17194_v47, %v12337_v41 }
0x203a   :  { %v12340_v62 = vmul.f32 %v17196_v40, %v12336_v24 }
0x203c   :  { %16007 = vmatprep.mubr.msk.f32.mxu1 %vm6266_vm3, %v12340_v62 }
0x203d   :  { %16008 = vmatmul.mubr.msk.f32.gmra.mrb[198].mxu1 %vm6266_vm3, %v12341_v10 }
0x210a   :  { %v16006_v16 = vpop.f32.mrb[196].mxu1 }
0x210b   :  { %v12435_v44 = vadd.f32 %v16006_v16, %v13141_v55  ;;  %v12429_v53 = vpop.f32.mrb[197].mxu1 }
0x210c   :  { %v12430_v30 = vadd.f32 %v13141_v55, %v12429_v53 }
0x210d   :  { %v12449_v58 = vmax.f32 %v12435_v44, 0.0 }
0x210e   :  { %v12448_v46 = vmax.f32 %v12430_v30, 0.0 }
0x2110   :  { %v16009_v11 = vpop.f32.mrb[198].mxu1  ;;  %16018 = vmatprep.mubr.msk.f32.mxu0 %vm177_vm0, %v12448_v46 }
0x2111   :  { %v12445_v35 = vadd.f32 %v16009_v11, %v13141_v55  ;;  %v12439_v32 = vpop.f32.mrb[199].mxu1  ;;  %16019 = vmatmul.mubr.msk.f32.vlgmr.msra.gmra.mrb[192].mxu0 %vm177_vm0, %v12449_v58 }
0x2112   :  { %v12440_v17 = vadd.f32 %v13141_v55, %v12439_v32 }
0x2113   :  { %v12451_v28 = vmax.f32 %v12445_v35, 0.0 }
0x2114   :  { %v12450_v39 = vmax.f32 %v12440_v17, 0.0 }
0x2116   :  { %16021 = vmatprep.mubr.msk.f32.mxu0 %vm177_vm0, %v12450_v39 }
0x2117   :  { %16022 = vmatmul.mubr.msk.f32.gmra.mrb[194].mxu0 %vm177_vm0, %v12451_v28 }
0x21e4   :  { %v16020_v12 = vpop.f32.mrb[192].mxu0 }
0x21e5   :  { %v12547_v56 = vadd.f32 %v16020_v12, %v13146_v5  ;;  %v12541_v9 = vpop.f32.mrb[193].mxu0 }
0x21e6   :  { %v12542_v3 = vadd.f32 %v13146_v5, %v12541_v9 }
0x21e7   :  { %v12564_v20 = vsel %vm12560_vm9, %v12547_v56, -inf }
0x21e8   :  { %12565 = vmax.xlane.f32.xlu1 %v12564_v20  ;;  %v12561_v13 = vsel %vm12560_vm9, %v12542_v3, -inf }
0x21e9   :  { %12562 = vmax.xlane.f32.xlu0 %v12561_v13 }
0x21ea   :  { %v16023_v57 = vpop.f32.mrb[194].mxu0 }
0x21eb   :  { %v12557_v15 = vadd.f32 %v16023_v57, %v13146_v5  ;;  %v12551_v36 = vpop.f32.mrb[195].mxu0 }
0x21ec   :  { %v12552_v48 = vadd.f32 %v13146_v5, %v12551_v36 }
0x21ed   :  { %v12570_v38 = vsel %vm12560_vm9, %v12557_v15, -inf }
0x21ee   :  { %12571 = vmax.xlane.f32.xlu1 %v12570_v38  ;;  %v12567_v23 = vsel %vm12560_vm9, %v12552_v48, -inf }
0x21ef   :  { %12568 = vmax.xlane.f32.xlu0 %v12567_v23 }
0x2275   :  { %v12566_v60 = vpop.xlane.xlu1 %12565 }
0x2276   :  { %v12574_v34 = vsub.f32 %v12547_v56, %v12566_v60  ;;  %v12563_v8 = vpop.xlane.xlu0 %12562 }
0x2277   :  { %v12573_v51 = vsub.f32 %v12542_v3, %v12563_v8 }
0x2278   :  { %v12579_v4 = vmul.f32 1.442695, %v12574_v34 }
0x2279   :  { %v12577_v29 = vmul.f32 1.442695, %v12573_v51 }
0x227a   :  { %17197 = vpow2.f32 %v12579_v4 }
0x227b   :  { %17199 = vpow2.f32 %v12577_v29  ;;  %v12572_v31 = vpop.xlane.xlu1 %12571 }
0x227c   :  { %v12576_v1 = vsub.f32 %v12557_v15, %v12572_v31  ;;  %v12569_v63 = vpop.xlane.xlu0 %12568 }
0x227d   :  { %v12575_v18 = vsub.f32 %v12552_v48, %v12569_v63 }
0x227e   :  { %v12583_v25 = vmul.f32 1.442695, %v12576_v1 }
0x227f   :  { %v12581_v26 = vmul.f32 1.442695, %v12575_v18 }
0x2280   :  { %17201 = vpow2.f32 %v12583_v25 }
0x2281   :  { %17203 = vpow2.f32 %v12581_v26 }
0x2284   :  { %v17198_v27 = vpop.eup %17197 }
0x2285   :  { %v17200_v6 = vpop.eup %17199  ;;  %v12588_v43 = vsel %vm12560_vm9, %v17198_v27, 0.0 }
0x2286   :  { %12589 = vadd.xlane.f32.xlu1 %v12588_v43  ;;  %v12585_v7 = vsel %vm12560_vm9, %v17200_v6, 0.0 }
0x2287   :  { %12586 = vadd.xlane.f32.xlu0 %v12585_v7 }
0x228a   :  { %v17202_v50 = vpop.eup %17201 }
0x228b   :  { %v17204_v49 = vpop.eup %17203  ;;  %v12594_v52 = vsel %vm12560_vm9, %v17202_v50, 0.0 }
0x228c   :  { %12595 = vadd.xlane.f32.xlu1 %v12594_v52  ;;  %v12591_v59 = vsel %vm12560_vm9, %v17204_v49, 0.0 }
0x228d   :  { %12592 = vadd.xlane.f32.xlu0 %v12591_v59 }
0x2313   :  { %v12590_v37 = vpop.xlane.xlu1 %12589 }
0x2314   :  { %17205 = vrcp.f32 %v12590_v37  ;;  %v12587_v45 = vpop.xlane.xlu0 %12586 }
0x2315   :  { %17207 = vrcp.f32 %v12587_v45 }
0x2319   :  { %v12596_v22 = vpop.xlane.xlu1 %12595 }
0x231a   :  { %17209 = vrcp.f32 %v12596_v22  ;;  %v12593_v42 = vpop.xlane.xlu0 %12592 }
0x231b   :  { %17211 = vrcp.f32 %v12593_v42 }
0x231e   :  { %v17206_v19 = vpop.eup %17205 }
0x231f   :  { %v17208_v33 = vpop.eup %17207  ;;  %v12600_v2 = vmul.f32 %v17206_v19, %v17198_v27 }
0x2320   :  { %v12598_v14 = vmul.f32 %v17208_v33, %v17200_v6 }
0x2321   :  { %12606 = vst.msk [vmem:[%s19561_s30 + $0x8] sm:$0xff] %vm12560_vm9, %v12600_v2 }
0x2322   :  { %12605 = vst.msk [vmem:[%s19561_s30] sm:$0xff] %vm12560_vm9, %v12598_v14 }
0x2324   :  { %v17210_v54 = vpop.eup %17209 }
0x2325   :  { %v17212_v41 = vpop.eup %17211  ;;  %v12604_v47 = vmul.f32 %v17210_v54, %v17202_v50 }
0x2326   :  { %v12602_v24 = vmul.f32 %v17212_v41, %v17204_v49 }
0x2327   :  { %12608 = vst.msk [vmem:[%s19561_s30 + $0x18] sm:$0xff] %vm12560_vm9, %v12604_v47 }
0x2328   :  { %12607 = vst.msk [vmem:[%s19561_s30 + $0x10] sm:$0xff] %vm12560_vm9, %v12602_v24 }

</bundles_post_ra>
